<compile_context>
chip_gen: v7x
topology: tpu7x:2x2x1
jax: 0.10.0
libtpu: 0.0.40
codegen_flags: <defaults>
</compile_context>

<pallas_src>
import functools

import jax
import jax.numpy as jnp
from jax import lax
from jax.experimental import pallas as pl
from jax.experimental.pallas import tpu as pltpu


def _round_up(x, m):
    return -(-x // m) * m


# ----------------------------------------------------------------------------
# Pallas kernel: fused bidirectional LSTM recurrence, Tc timesteps per grid
# step, both directions interleaved in the same inner loop.
# ----------------------------------------------------------------------------
def _bilstm_kernel(wx_f_ref, wx_b_ref, whh_ref, bias_ref,
                   out_f_ref, out_b_ref, hT_ref, cT_ref,
                   h_sc, c_sc, *, seq_len, padded_len):
    c_idx = pl.program_id(0)
    Tc, _, _ = wx_f_ref.shape
    Hp = h_sc.shape[-1]

    @pl.when(c_idx == 0)
    def _():
        h_sc[...] = jnp.zeros_like(h_sc)
        c_sc[...] = jnp.zeros_like(c_sc)

    # Resident weights / bias, hoisted out of the time loop.
    whh_f = whh_ref[0]          # (Hp, Gp) bf16
    whh_b = whh_ref[1]
    bias_f = bias_ref[0]        # (1, Gp) f32
    bias_b = bias_ref[1]

    def gate_math(gates, c_prev):
        # PyTorch gate order [i | f | g | o]; slices are 128-aligned.
        i_g = jax.nn.sigmoid(gates[:, 0 * Hp:1 * Hp])
        f_g = jax.nn.sigmoid(gates[:, 1 * Hp:2 * Hp])
        g_g = jnp.tanh(gates[:, 2 * Hp:3 * Hp])
        o_g = jax.nn.sigmoid(gates[:, 3 * Hp:4 * Hp])
        c_new = f_g * c_prev + i_g * g_g
        h_new = o_g * jnp.tanh(c_new)
        return h_new, c_new

    @pl.loop(0, Tc, unroll=bool(Tc <= 8))
    def _(i):
        # ---- forward direction: padded time step  c_idx*Tc + i -------------
        h_prev_f = h_sc[0]
        c_prev_f = c_sc[0]
        rec_f = jnp.dot(h_prev_f.astype(jnp.bfloat16), whh_f,
                        preferred_element_type=jnp.float32)
        gates_f = rec_f + bias_f + wx_f_ref[i]            # bf16 Wx upcast here
        h_new_f, c_new_f = gate_math(gates_f, c_prev_f)

        # ---- backward direction: padded time step padded_len-1-(c_idx*Tc+i)
        h_prev_b = h_sc[1]
        c_prev_b = c_sc[1]
        rec_b = jnp.dot(h_prev_b.astype(jnp.bfloat16), whh_b,
                        preferred_element_type=jnp.float32)
        gates_b = rec_b + bias_b + wx_b_ref[Tc - 1 - i]
        h_new_b, c_new_b = gate_math(gates_b, c_prev_b)

        if padded_len != seq_len:                         # static Python branch
            t_lin = c_idx * Tc + i
            valid_f = t_lin < seq_len                     # forward real step
            valid_b = t_lin >= (padded_len - seq_len)     # backward real step
            h_new_f = jnp.where(valid_f, h_new_f, h_prev_f)
            c_new_f = jnp.where(valid_f, c_new_f, c_prev_f)
            h_new_b = jnp.where(valid_b, h_new_b, h_prev_b)
            c_new_b = jnp.where(valid_b, c_new_b, c_prev_b)

        h_sc[0] = h_new_f
        c_sc[0] = c_new_f
        h_sc[1] = h_new_b
        c_sc[1] = c_new_b

        out_f_ref[i] = h_new_f.astype(out_f_ref.dtype)
        out_b_ref[Tc - 1 - i] = h_new_b.astype(out_b_ref.dtype)

    # Final (h, c): these output blocks are resident across the whole grid
    # (constant index_map), so the cheap per-chunk copy only hits HBM once.
    hT_ref[...] = h_sc[...]
    cT_ref[...] = c_sc[...]


def _bilstm_pallas(wx, whh, bias, *, seq_len, time_chunk):
    """wx:   (Tp, Bp, 2*Gp) bf16 hoisted input projections (no bias),
              forward gates in lanes [0:Gp], backward in [Gp:2Gp].
       whh:  (2, Hp, Gp) bf16 recurrent weights (transposed, gate-aligned).
       bias: (2, 1, Gp)  f32 combined biases (b_ih + b_hh), gate-aligned."""
    Tp, Bp, G2p = wx.shape
    Gp = G2p // 2
    Hp = Gp // 4
    Tc = time_chunk
    num_chunks = Tp // Tc
    assert num_chunks * Tc == Tp

    kernel = functools.partial(_bilstm_kernel, seq_len=seq_len, padded_len=Tp)

    out_shapes = (
        jax.ShapeDtypeStruct((Tp, Bp, Hp), jnp.float32),   # forward h stream
        jax.ShapeDtypeStruct((Tp, Bp, Hp), jnp.float32),   # backward h stream
        jax.ShapeDtypeStruct((2, Bp, Hp), jnp.float32),    # final h (fwd, bwd)
        jax.ShapeDtypeStruct((2, Bp, Hp), jnp.float32),    # final c (fwd, bwd)
    )

    # Rough VMEM budget (double-buffered blocks) -> explicit limit with
    # headroom; stays under the v7x 64 MiB physical VMEM.
    bf16, f32 = 2, 4
    need = (2 * 2 * Tc * Bp * Gp * bf16        # fwd+bwd Wx streams
            + 2 * 2 * Hp * Gp * bf16           # whh (resident, dbl-buffered)
            + 2 * 2 * 1 * Gp * f32             # bias
            + 2 * 2 * Tc * Bp * Hp * f32       # out_f / out_b blocks
            + 2 * 2 * 2 * Bp * Hp * f32        # hT / cT blocks
            + 2 * 2 * Bp * Hp * f32)           # h/c scratch
    vmem_limit = int(min(max(2 * need, 32 * 1024 * 1024), 56 * 1024 * 1024))

    grid_spec = pltpu.PrefetchScalarGridSpec(
        num_scalar_prefetch=0,
        grid=(num_chunks,),
        in_specs=[
            # forward Wx chunk: time-block c, lane-block 0
            pl.BlockSpec((Tc, Bp, Gp), lambda c: (c, 0, 0)),
            # backward Wx chunk: time-block (last-c), lane-block 1
            pl.BlockSpec((Tc, Bp, Gp), lambda c: (num_chunks - 1 - c, 0, 1)),
            # recurrent weights (resident across the grid)
            pl.BlockSpec((2, Hp, Gp), lambda c: (0, 0, 0)),
            # combined bias (resident)
            pl.BlockSpec((2, 1, Gp), lambda c: (0, 0, 0)),
        ],
        out_specs=[
            pl.BlockSpec((Tc, Bp, Hp), lambda c: (c, 0, 0)),
            pl.BlockSpec((Tc, Bp, Hp), lambda c: (num_chunks - 1 - c, 0, 0)),
            pl.BlockSpec((2, Bp, Hp), lambda c: (0, 0, 0)),
            pl.BlockSpec((2, Bp, Hp), lambda c: (0, 0, 0)),
        ],
        scratch_shapes=[
            pltpu.VMEM((2, Bp, Hp), jnp.float32),   # h carry per direction
            pltpu.VMEM((2, Bp, Hp), jnp.float32),   # c carry per direction
        ],
    )

    return pl.pallas_call(
        kernel,
        out_shape=out_shapes,
        grid_spec=grid_spec,
        compiler_params=pltpu.CompilerParams(
            dimension_semantics=("arbitrary",),
            vmem_limit_bytes=vmem_limit),
    )(wx, wx, whh, bias)


# ----------------------------------------------------------------------------
# Parameters (PyTorch layout) + kernel-ready packing.
# ----------------------------------------------------------------------------
def init_encoder_params(key, input_vocab_size, embed_size, hidden_size,
                        num_direction=2):
    """PyTorch-layout parameters (f32): weight_ih (4H,E), weight_hh (4H,H),
    biases (4H,) per direction, gate order [i|f|g|o]."""
    H = hidden_size // num_direction
    keys = jax.random.split(key, 9)
    bound = 1.0 / jnp.sqrt(jnp.float32(H))

    def u(k, shape):
        return jax.random.uniform(k, shape, jnp.float32, -bound, bound)

    return {
        "embedding": jax.random.normal(
            keys[0], (input_vocab_size, embed_size), jnp.float32),
        "w_ih_f": u(keys[1], (4 * H, embed_size)),
        "w_hh_f": u(keys[2], (4 * H, H)),
        "b_ih_f": u(keys[3], (4 * H,)),
        "b_hh_f": u(keys[4], (4 * H,)),
        "w_ih_b": u(keys[5], (4 * H, embed_size)),
        "w_hh_b": u(keys[6], (4 * H, H)),
        "b_ih_b": u(keys[7], (4 * H,)),
        "b_hh_b": u(keys[8], (4 * H,)),
    }


def pack_encoder_params(params, hidden_size, num_direction=2):
    """Transpose, pad gate dim to Gp=4*Hp (Hp = round_up(H,128), each gate in
    its own 128-aligned slot), fold direction into the W_ih lane axis, pad whh
    rows to Hp, cast weights to bf16, fold the two biases together (f32)."""
    H = hidden_size // num_direction
    Hp = _round_up(H, 128)
    Gp = 4 * Hp

    def gate_align_cols(w_t):            # (X, 4H) -> (X, Gp)
        out = jnp.zeros((w_t.shape[0], Gp), jnp.float32)
        for g in range(4):
            out = out.at[:, g * Hp:g * Hp + H].set(w_t[:, g * H:(g + 1) * H])
        return out

    def pack_dir(w_ih, w_hh, b_ih, b_hh):
        wih = gate_align_cols(w_ih.T)                        # (E, Gp)
        whh = gate_align_cols(w_hh.T)                        # (H, Gp)
        whh = jnp.pad(whh, ((0, Hp - H), (0, 0)))            # (Hp, Gp)
        b4 = b_ih + b_hh
        b = jnp.zeros((Gp,), jnp.float32)
        for g in range(4):
            b = b.at[g * Hp:g * Hp + H].set(b4[g * H:(g + 1) * H])
        return wih, whh, b

    wih_f, whh_f, b_f = pack_dir(params["w_ih_f"], params["w_hh_f"],
                                 params["b_ih_f"], params["b_hh_f"])
    wih_b, whh_b, b_b = pack_dir(params["w_ih_b"], params["w_hh_b"],
                                 params["b_ih_b"], params["b_hh_b"])

    return {
        "embedding": params["embedding"],                                    # (V,E) f32
        "wih": jnp.concatenate([wih_f, wih_b], axis=1).astype(jnp.bfloat16), # (E,2Gp)
        "whh": jnp.stack([whh_f, whh_b]).astype(jnp.bfloat16),               # (2,Hp,Gp)
        "bias": jnp.stack([b_f, b_b])[:, None, :],                           # (2,1,Gp) f32
    }


def _choose_time_chunk(seq_len, Bp, Gp, max_chunk=32):
    """Largest time chunk such that the double-buffered bf16 Wx streams for
    both directions stay under ~8 MiB (leaves headroom on v7x's 64 MiB)."""
    budget = 8 * 1024 * 1024
    per_step = 2 * 2 * Bp * Gp * 2          # fwd+bwd, double-buffered, bf16
    return max(1, min(max_chunk, seq_len, budget // max(per_step, 1)))


# ----------------------------------------------------------------------------
# Forward pass.
# ----------------------------------------------------------------------------
@functools.partial(jax.jit, static_argnames=("hidden_per_dir", "max_time_chunk"))
def encoder_forward(packed, input_seqs_batch, *, hidden_per_dir,
                    max_time_chunk=32):
    """input_seqs_batch: (seq_len, batch) int32 token ids.
    Returns e_outputs (T,B,2H), (e_h, e_c) each (2,B,H) — PyTorch conventions."""
    T, B = input_seqs_batch.shape
    H = hidden_per_dir
    Hp = packed["whh"].shape[1]
    Gp = 4 * Hp
    Bp = _round_up(max(B, 1), 16)            # bf16 sublane packing

    Tc = _choose_time_chunk(T, Bp, Gp, max_time_chunk)
    num_chunks = pl.cdiv(T, Tc)
    Tp = num_chunks * Tc

    # embedding lookup (XLA gather) + time/batch padding
    emb = jnp.take(packed["embedding"], input_seqs_batch, axis=0)   # (T, B, E)
    emb = jnp.pad(emb, ((0, Tp - T), (0, Bp - B), (0, 0)))          # (Tp, Bp, E)
    E = emb.shape[-1]

    # Hoisted input projection: ONE transpose-free GEMM over all timesteps and
    # both directions, f32 accumulate, stored bf16 (bias added in-kernel).
    wx = jnp.dot(emb.reshape(Tp * Bp, E).astype(jnp.bfloat16), packed["wih"],
                 preferred_element_type=jnp.float32)
    wx = wx.astype(jnp.bfloat16).reshape(Tp, Bp, 2 * Gp)

    out_f, out_b, h_p, c_p = _bilstm_pallas(
        wx, packed["whh"], packed["bias"], seq_len=T, time_chunk=Tc)

    e_outputs = jnp.concatenate([out_f[:T, :B, :H], out_b[:T, :B, :H]], axis=-1)
    e_h = h_p[:, :B, :H]
    e_c = c_p[:, :B, :H]
    return e_outputs, (e_h, e_c)


# ----------------------------------------------------------------------------
# Pure-JAX reference (lax.scan) with the same precision policy (bf16 weights &
# bf16 hoisted Wx, f32 accumulate / gate math), for a correctness check.
# ----------------------------------------------------------------------------
def _lstm_dir_ref(embedded, w_ih, w_hh, b_ih, b_hh, reverse):
    H = w_hh.shape[1]
    T, B, E = embedded.shape
    wx = jnp.dot(embedded.reshape(T * B, E).astype(jnp.bfloat16),
                 w_ih.T.astype(jnp.bfloat16),
                 preferred_element_type=jnp.float32).astype(jnp.bfloat16)
    wx = wx.reshape(T, B, 4 * H)
    whh_t = w_hh.T.astype(jnp.bfloat16)
    b = (b_ih + b_hh)[None, :]
    xs = wx[::-1] if reverse else wx

    def step(carry, wx_t):
        h, c = carry
        gates = (jnp.dot(h.astype(jnp.bfloat16), whh_t,
                         preferred_element_type=jnp.float32) + b + wx_t)
        i_g = jax.nn.sigmoid(gates[:, 0 * H:1 * H])
        f_g = jax.nn.sigmoid(gates[:, 1 * H:2 * H])
        g_g = jnp.tanh(gates[:, 2 * H:3 * H])
        o_g = jax.nn.sigmoid(gates[:, 3 * H:4 * H])
        c_new = f_g * c + i_g * g_g
        h_new = o_g * jnp.tanh(c_new)
        return (h_new, c_new), h_new

    init = (jnp.zeros((B, H), jnp.float32), jnp.zeros((B, H), jnp.float32))
    (h_T, c_T), outs = lax.scan(step, init, xs)
    if reverse:
        outs = outs[::-1]
    return outs, h_T, c_T


def encoder_forward_ref(params, input_seqs_batch):
    embedded = jnp.take(params["embedding"], input_seqs_batch, axis=0)
    out_f, h_f, c_f = _lstm_dir_ref(embedded, params["w_ih_f"], params["w_hh_f"],
                                    params["b_ih_f"], params["b_hh_f"], False)
    out_b, h_b, c_b = _lstm_dir_ref(embedded, params["w_ih_b"], params["w_hh_b"],
                                    params["b_ih_b"], params["b_hh_b"], True)
    return (jnp.concatenate([out_f, out_b], axis=-1),
            (jnp.stack([h_f, h_b]), jnp.stack([c_f, c_b])))


if __name__ == "__main__":
    # Small, module-consistent shapes.
    input_vocab_size = 20
    embed_size = 16
    hidden_size = 32           # => 16 per direction (padded to 128 internally)
    seq_len = 8
    batch = 4

    key = jax.random.PRNGKey(0)
    k_param, k_data = jax.random.split(key)

    params = init_encoder_params(k_param, input_vocab_size, embed_size,
                                 hidden_size)
    packed = pack_encoder_params(params, hidden_size)
    input_seqs = jax.random.randint(
        k_data, (seq_len, batch), 0, input_vocab_size, dtype=jnp.int32)

    e_outputs, (e_h, e_c) = encoder_forward(
        packed, input_seqs, hidden_per_dir=hidden_size // 2)
    jax.block_until_ready((e_outputs, e_h, e_c))

    # sanity: shapes match PyTorch bidirectional LSTM conventions
    assert e_outputs.shape == (seq_len, batch, hidden_size)
    assert e_h.shape == (2, batch, hidden_size // 2)
    assert e_c.shape == (2, batch, hidden_size // 2)

    # numerical check against the pure-JAX reference (same precision policy)
    ref_out, (ref_h, ref_c) = encoder_forward_ref(params, input_seqs)
    assert jnp.allclose(e_outputs, ref_out, atol=2e-3, rtol=2e-3), (
        float(jnp.max(jnp.abs(e_outputs - ref_out))))
    assert jnp.allclose(e_h, ref_h, atol=2e-3, rtol=2e-3)
    assert jnp.allclose(e_c, ref_c, atol=2e-3, rtol=2e-3)

    print("KERNEL_OK")
</pallas_src>

<mosaic_0001>
module attributes {stable_mosaic.version = 11 : i64} {
  func.func @_bilstm_kernel(%arg0: i32, %arg1: memref<8x16x512xbf16, #tpu.memory_space<vmem>>, %arg2: memref<8x16x512xbf16, #tpu.memory_space<vmem>>, %arg3: memref<2x128x512xbf16, #tpu.memory_space<vmem>>, %arg4: memref<2x1x512xf32, #tpu.memory_space<vmem>>, %arg5: memref<8x16x128xf32, #tpu.memory_space<vmem>>, %arg6: memref<8x16x128xf32, #tpu.memory_space<vmem>>, %arg7: memref<2x16x128xf32, #tpu.memory_space<vmem>>, %arg8: memref<2x16x128xf32, #tpu.memory_space<vmem>>, %arg9: memref<2x16x128xf32, #tpu.memory_space<vmem>>, %arg10: memref<2x16x128xf32, #tpu.memory_space<vmem>>) attributes {dimension_semantics = [#tpu.dimension_semantics<arbitrary>], iteration_bounds = array<i64: 1>, scalar_prefetch = 0 : i64, scratch_operands = 2 : i64, tpu.core_type = #tpu.core_type<tc>, window_params = [{transform_indices = @transform_0, window_bounds = array<i64: 8, 16, 512>}, {transform_indices = @transform_1, window_bounds = array<i64: 8, 16, 512>}, {pipeline_mode = #tpu.pipeline_mode<synchronous>, transform_indices = @transform_2, window_bounds = array<i64: 2, 128, 512>}, {pipeline_mode = #tpu.pipeline_mode<synchronous>, transform_indices = @transform_3, window_bounds = array<i64: 2, 1, 512>}, {transform_indices = @transform_4, window_bounds = array<i64: 8, 16, 128>}, {transform_indices = @transform_5, window_bounds = array<i64: 8, 16, 128>}, {pipeline_mode = #tpu.pipeline_mode<synchronous>, transform_indices = @transform_6, window_bounds = array<i64: 2, 16, 128>}, {pipeline_mode = #tpu.pipeline_mode<synchronous>, transform_indices = @transform_7, window_bounds = array<i64: 2, 16, 128>}]} {
    %c0_i32 = arith.constant 0 : i32
    %0 = arith.cmpi eq, %arg0, %c0_i32 : i32
    %1 = arith.extui %0 : i1 to i32
    %c0_i32_0 = arith.constant 0 : i32
    %2 = arith.cmpi ne, %1, %c0_i32_0 : i32
    scf.if %2 {
      %cst_375 = arith.constant 0.000000e+00 : f32
      %815 = vector.broadcast %cst_375 : f32 to vector<2x16x128xf32>
      %c0_376 = arith.constant 0 : index
      %c0_377 = arith.constant 0 : index
      %c0_378 = arith.constant 0 : index
      %816 = vector.load %arg9[%c0_376, %c0_377, %c0_378] : memref<2x16x128xf32, #tpu.memory_space<vmem>>, vector<2x16x128xf32>
      tpu.vector_store %arg9[%c0_376, %c0_377, %c0_378], %815 {strides = array<i32>} : memref<2x16x128xf32, #tpu.memory_space<vmem>>, vector<2x16x128xf32>,
      %cst_379 = arith.constant 0.000000e+00 : f32
      %817 = vector.broadcast %cst_379 : f32 to vector<2x16x128xf32>
      %c0_380 = arith.constant 0 : index
      %c0_381 = arith.constant 0 : index
      %c0_382 = arith.constant 0 : index
      %818 = vector.load %arg10[%c0_380, %c0_381, %c0_382] : memref<2x16x128xf32, #tpu.memory_space<vmem>>, vector<2x16x128xf32>
      tpu.vector_store %arg10[%c0_380, %c0_381, %c0_382], %817 {strides = array<i32>} : memref<2x16x128xf32, #tpu.memory_space<vmem>>, vector<2x16x128xf32>,
    } else {
    }
    %c0 = arith.constant 0 : index
    %c0_1 = arith.constant 0 : index
    %c0_2 = arith.constant 0 : index
    %3 = vector.load %arg3[%c0, %c0_1, %c0_2] : memref<2x128x512xbf16, #tpu.memory_space<vmem>>, vector<1x128x512xbf16>
    %4 = vector.shape_cast %3 : vector<1x128x512xbf16> to vector<128x512xbf16>
    %c1 = arith.constant 1 : index
    %c0_3 = arith.constant 0 : index
    %c0_4 = arith.constant 0 : index
    %5 = vector.load %arg3[%c1, %c0_3, %c0_4] : memref<2x128x512xbf16, #tpu.memory_space<vmem>>, vector<1x128x512xbf16>
    %6 = vector.shape_cast %5 : vector<1x128x512xbf16> to vector<128x512xbf16>
    %c0_5 = arith.constant 0 : index
    %c0_6 = arith.constant 0 : index
    %c0_7 = arith.constant 0 : index
    %7 = vector.load %arg4[%c0_5, %c0_6, %c0_7] : memref<2x1x512xf32, #tpu.memory_space<vmem>>, vector<1x1x512xf32>
    %8 = vector.shape_cast %7 : vector<1x1x512xf32> to vector<1x512xf32>
    %c1_8 = arith.constant 1 : index
    %c0_9 = arith.constant 0 : index
    %c0_10 = arith.constant 0 : index
    %9 = vector.load %arg4[%c1_8, %c0_9, %c0_10] : memref<2x1x512xf32, #tpu.memory_space<vmem>>, vector<1x1x512xf32>
    %10 = vector.shape_cast %9 : vector<1x1x512xf32> to vector<1x512xf32>
    %c0_i32_11 = arith.constant 0 : i32
    %c1_i32 = arith.constant 1 : i32
    %11 = arith.muli %c0_i32_11, %c1_i32 : i32
    %c0_i32_12 = arith.constant 0 : i32
    %12 = arith.addi %c0_i32_12, %11 : i32
    %c0_13 = arith.constant 0 : index
    %c0_14 = arith.constant 0 : index
    %c0_15 = arith.constant 0 : index
    %13 = vector.load %arg9[%c0_13, %c0_14, %c0_15] : memref<2x16x128xf32, #tpu.memory_space<vmem>>, vector<1x16x128xf32>
    %14 = vector.shape_cast %13 : vector<1x16x128xf32> to vector<16x128xf32>
    %c0_16 = arith.constant 0 : index
    %c0_17 = arith.constant 0 : index
    %c0_18 = arith.constant 0 : index
    %15 = vector.load %arg10[%c0_16, %c0_17, %c0_18] : memref<2x16x128xf32, #tpu.memory_space<vmem>>, vector<1x16x128xf32>
    %16 = vector.shape_cast %15 : vector<1x16x128xf32> to vector<16x128xf32>
    %17 = arith.truncf %14 : vector<16x128xf32> to vector<16x128xbf16>
    %cst = arith.constant dense<0.000000e+00> : vector<16x512xf32>
    %18 = tpu.matmul %17, %4, %cst {dimension_numbers = #tpu.dot_dimension_numbers<[1], [0], [0], [1], [0, 0, 1, 1], [], []>} : vector<16x128xbf16>, vector<128x512xbf16>, vector<16x512xf32> -> vector<16x512xf32>
    %19 = vector.broadcast %8 : vector<1x512xf32> to vector<16x512xf32>
    %20 = arith.addf %18, %19 : vector<16x512xf32>
    %21 = arith.index_cast %12 : i32 to index
    %c0_19 = arith.constant 0 : index
    %c0_20 = arith.constant 0 : index
    %22 = vector.load %arg1[%21, %c0_19, %c0_20] : memref<8x16x512xbf16, #tpu.memory_space<vmem>>, vector<1x16x512xbf16>
    %23 = vector.shape_cast %22 : vector<1x16x512xbf16> to vector<16x512xbf16>
    %24 = arith.extf %23 : vector<16x512xbf16> to vector<16x512xf32>
    %25 = arith.addf %20, %24 : vector<16x512xf32>
    %26 = vector.extract_strided_slice %25 {offsets = [0, 0], sizes = [16, 128], strides = [1, 1]} : vector<16x512xf32> to vector<16x128xf32>
    %27 = arith.negf %26 : vector<16x128xf32>
    %28 = math.exp %27 : vector<16x128xf32>
    %cst_21 = arith.constant 1.000000e+00 : f32
    %29 = vector.broadcast %cst_21 : f32 to vector<16x128xf32>
    %30 = arith.addf %29, %28 : vector<16x128xf32>
    %31 = arith.divf %29, %30 : vector<16x128xf32>
    %32 = vector.extract_strided_slice %25 {offsets = [0, 128], sizes = [16, 128], strides = [1, 1]} : vector<16x512xf32> to vector<16x128xf32>
    %33 = arith.negf %32 : vector<16x128xf32>
    %34 = math.exp %33 : vector<16x128xf32>
    %cst_22 = arith.constant 1.000000e+00 : f32
    %35 = vector.broadcast %cst_22 : f32 to vector<16x128xf32>
    %36 = arith.addf %35, %34 : vector<16x128xf32>
    %37 = arith.divf %35, %36 : vector<16x128xf32>
    %38 = vector.extract_strided_slice %25 {offsets = [0, 256], sizes = [16, 128], strides = [1, 1]} : vector<16x512xf32> to vector<16x128xf32>
    %39 = math.tanh %38 : vector<16x128xf32>
    %40 = vector.extract_strided_slice %25 {offsets = [0, 384], sizes = [16, 128], strides = [1, 1]} : vector<16x512xf32> to vector<16x128xf32>
    %41 = arith.negf %40 : vector<16x128xf32>
    %42 = math.exp %41 : vector<16x128xf32>
    %cst_23 = arith.constant 1.000000e+00 : f32
    %43 = vector.broadcast %cst_23 : f32 to vector<16x128xf32>
    %44 = arith.addf %43, %42 : vector<16x128xf32>
    %45 = arith.divf %43, %44 : vector<16x128xf32>
    %46 = arith.mulf %37, %16 : vector<16x128xf32>
    %47 = arith.mulf %31, %39 : vector<16x128xf32>
    %48 = arith.addf %46, %47 : vector<16x128xf32>
    %49 = math.tanh %48 : vector<16x128xf32>
    %50 = arith.mulf %45, %49 : vector<16x128xf32>
    %c1_24 = arith.constant 1 : index
    %c0_25 = arith.constant 0 : index
    %c0_26 = arith.constant 0 : index
    %51 = vector.load %arg9[%c1_24, %c0_25, %c0_26] : memref<2x16x128xf32, #tpu.memory_space<vmem>>, vector<1x16x128xf32>
    %52 = vector.shape_cast %51 : vector<1x16x128xf32> to vector<16x128xf32>
    %c1_27 = arith.constant 1 : index
    %c0_28 = arith.constant 0 : index
    %c0_29 = arith.constant 0 : index
    %53 = vector.load %arg10[%c1_27, %c0_28, %c0_29] : memref<2x16x128xf32, #tpu.memory_space<vmem>>, vector<1x16x128xf32>
    %54 = vector.shape_cast %53 : vector<1x16x128xf32> to vector<16x128xf32>
    %55 = arith.truncf %52 : vector<16x128xf32> to vector<16x128xbf16>
    %cst_30 = arith.constant dense<0.000000e+00> : vector<16x512xf32>
    %56 = tpu.matmul %55, %6, %cst_30 {dimension_numbers = #tpu.dot_dimension_numbers<[1], [0], [0], [1], [0, 0, 1, 1], [], []>} : vector<16x128xbf16>, vector<128x512xbf16>, vector<16x512xf32> -> vector<16x512xf32>
    %57 = vector.broadcast %10 : vector<1x512xf32> to vector<16x512xf32>
    %58 = arith.addf %56, %57 : vector<16x512xf32>
    %c7_i32 = arith.constant 7 : i32
    %59 = arith.subi %c7_i32, %12 : i32
    %60 = arith.index_cast %59 : i32 to index
    %c0_31 = arith.constant 0 : index
    %c0_32 = arith.constant 0 : index
    %61 = vector.load %arg2[%60, %c0_31, %c0_32] : memref<8x16x512xbf16, #tpu.memory_space<vmem>>, vector<1x16x512xbf16>
    %62 = vector.shape_cast %61 : vector<1x16x512xbf16> to vector<16x512xbf16>
    %63 = arith.extf %62 : vector<16x512xbf16> to vector<16x512xf32>
    %64 = arith.addf %58, %63 : vector<16x512xf32>
    %65 = vector.extract_strided_slice %64 {offsets = [0, 0], sizes = [16, 128], strides = [1, 1]} : vector<16x512xf32> to vector<16x128xf32>
    %66 = arith.negf %65 : vector<16x128xf32>
    %67 = math.exp %66 : vector<16x128xf32>
    %cst_33 = arith.constant 1.000000e+00 : f32
    %68 = vector.broadcast %cst_33 : f32 to vector<16x128xf32>
    %69 = arith.addf %68, %67 : vector<16x128xf32>
    %70 = arith.divf %68, %69 : vector<16x128xf32>
    %71 = vector.extract_strided_slice %64 {offsets = [0, 128], sizes = [16, 128], strides = [1, 1]} : vector<16x512xf32> to vector<16x128xf32>
    %72 = arith.negf %71 : vector<16x128xf32>
    %73 = math.exp %72 : vector<16x128xf32>
    %cst_34 = arith.constant 1.000000e+00 : f32
    %74 = vector.broadcast %cst_34 : f32 to vector<16x128xf32>
    %75 = arith.addf %74, %73 : vector<16x128xf32>
    %76 = arith.divf %74, %75 : vector<16x128xf32>
    %77 = vector.extract_strided_slice %64 {offsets = [0, 256], sizes = [16, 128], strides = [1, 1]} : vector<16x512xf32> to vector<16x128xf32>
    %78 = math.tanh %77 : vector<16x128xf32>
    %79 = vector.extract_strided_slice %64 {offsets = [0, 384], sizes = [16, 128], strides = [1, 1]} : vector<16x512xf32> to vector<16x128xf32>
    %80 = arith.negf %79 : vector<16x128xf32>
    %81 = math.exp %80 : vector<16x128xf32>
    %cst_35 = arith.constant 1.000000e+00 : f32
    %82 = vector.broadcast %cst_35 : f32 to vector<16x128xf32>
    %83 = arith.addf %82, %81 : vector<16x128xf32>
    %84 = arith.divf %82, %83 : vector<16x128xf32>
    %85 = arith.mulf %76, %54 : vector<16x128xf32>
    %86 = arith.mulf %70, %78 : vector<16x128xf32>
    %87 = arith.addf %85, %86 : vector<16x128xf32>
    %88 = math.tanh %87 : vector<16x128xf32>
    %89 = arith.mulf %84, %88 : vector<16x128xf32>
    %c0_36 = arith.constant 0 : index
    %c0_37 = arith.constant 0 : index
    %c0_38 = arith.constant 0 : index
    %90 = vector.load %arg9[%c0_36, %c0_37, %c0_38] : memref<2x16x128xf32, #tpu.memory_space<vmem>>, vector<1x16x128xf32>
    %91 = vector.shape_cast %90 : vector<1x16x128xf32> to vector<16x128xf32>
    %92 = vector.shape_cast %50 : vector<16x128xf32> to vector<1x16x128xf32>
    tpu.vector_store %arg9[%c0_36, %c0_37, %c0_38], %92 {strides = array<i32>} : memref<2x16x128xf32, #tpu.memory_space<vmem>>, vector<1x16x128xf32>,
    %c0_39 = arith.constant 0 : index
    %c0_40 = arith.constant 0 : index
    %c0_41 = arith.constant 0 : index
    %93 = vector.load %arg10[%c0_39, %c0_40, %c0_41] : memref<2x16x128xf32, #tpu.memory_space<vmem>>, vector<1x16x128xf32>
    %94 = vector.shape_cast %93 : vector<1x16x128xf32> to vector<16x128xf32>
    %95 = vector.shape_cast %48 : vector<16x128xf32> to vector<1x16x128xf32>
    tpu.vector_store %arg10[%c0_39, %c0_40, %c0_41], %95 {strides = array<i32>} : memref<2x16x128xf32, #tpu.memory_space<vmem>>, vector<1x16x128xf32>,
    %c1_42 = arith.constant 1 : index
    %c0_43 = arith.constant 0 : index
    %c0_44 = arith.constant 0 : index
    %96 = vector.load %arg9[%c1_42, %c0_43, %c0_44] : memref<2x16x128xf32, #tpu.memory_space<vmem>>, vector<1x16x128xf32>
    %97 = vector.shape_cast %96 : vector<1x16x128xf32> to vector<16x128xf32>
    %98 = vector.shape_cast %89 : vector<16x128xf32> to vector<1x16x128xf32>
    tpu.vector_store %arg9[%c1_42, %c0_43, %c0_44], %98 {strides = array<i32>} : memref<2x16x128xf32, #tpu.memory_space<vmem>>, vector<1x16x128xf32>,
    %c1_45 = arith.constant 1 : index
    %c0_46 = arith.constant 0 : index
    %c0_47 = arith.constant 0 : index
    %99 = vector.load %arg10[%c1_45, %c0_46, %c0_47] : memref<2x16x128xf32, #tpu.memory_space<vmem>>, vector<1x16x128xf32>
    %100 = vector.shape_cast %99 : vector<1x16x128xf32> to vector<16x128xf32>
    %101 = vector.shape_cast %87 : vector<16x128xf32> to vector<1x16x128xf32>
    tpu.vector_store %arg10[%c1_45, %c0_46, %c0_47], %101 {strides = array<i32>} : memref<2x16x128xf32, #tpu.memory_space<vmem>>, vector<1x16x128xf32>,
    %102 = arith.index_cast %12 : i32 to index
    %c0_48 = arith.constant 0 : index
    %c0_49 = arith.constant 0 : index
    %103 = vector.load %arg5[%102, %c0_48, %c0_49] : memref<8x16x128xf32, #tpu.memory_space<vmem>>, vector<1x16x128xf32>
    %104 = vector.shape_cast %103 : vector<1x16x128xf32> to vector<16x128xf32>
    %105 = vector.shape_cast %50 : vector<16x128xf32> to vector<1x16x128xf32>
    tpu.vector_store %arg5[%102, %c0_48, %c0_49], %105 {strides = array<i32>} : memref<8x16x128xf32, #tpu.memory_space<vmem>>, vector<1x16x128xf32>,
    %c7_i32_50 = arith.constant 7 : i32
    %106 = arith.subi %c7_i32_50, %12 : i32
    %107 = arith.index_cast %106 : i32 to index
    %c0_51 = arith.constant 0 : index
    %c0_52 = arith.constant 0 : index
    %108 = vector.load %arg6[%107, %c0_51, %c0_52] : memref<8x16x128xf32, #tpu.memory_space<vmem>>, vector<1x16x128xf32>
    %109 = vector.shape_cast %108 : vector<1x16x128xf32> to vector<16x128xf32>
    %110 = vector.shape_cast %89 : vector<16x128xf32> to vector<1x16x128xf32>
    tpu.vector_store %arg6[%107, %c0_51, %c0_52], %110 {strides = array<i32>} : memref<8x16x128xf32, #tpu.memory_space<vmem>>, vector<1x16x128xf32>,
    %c1_i32_53 = arith.constant 1 : i32
    %c1_i32_54 = arith.constant 1 : i32
    %111 = arith.muli %c1_i32_53, %c1_i32_54 : i32
    %c0_i32_55 = arith.constant 0 : i32
    %112 = arith.addi %c0_i32_55, %111 : i32
    %c0_56 = arith.constant 0 : index
    %c0_57 = arith.constant 0 : index
    %c0_58 = arith.constant 0 : index
    %113 = vector.load %arg9[%c0_56, %c0_57, %c0_58] : memref<2x16x128xf32, #tpu.memory_space<vmem>>, vector<1x16x128xf32>
    %114 = vector.shape_cast %113 : vector<1x16x128xf32> to vector<16x128xf32>
    %c0_59 = arith.constant 0 : index
    %c0_60 = arith.constant 0 : index
    %c0_61 = arith.constant 0 : index
    %115 = vector.load %arg10[%c0_59, %c0_60, %c0_61] : memref<2x16x128xf32, #tpu.memory_space<vmem>>, vector<1x16x128xf32>
    %116 = vector.shape_cast %115 : vector<1x16x128xf32> to vector<16x128xf32>
    %117 = arith.truncf %114 : vector<16x128xf32> to vector<16x128xbf16>
    %cst_62 = arith.constant dense<0.000000e+00> : vector<16x512xf32>
    %118 = tpu.matmul %117, %4, %cst_62 {dimension_numbers = #tpu.dot_dimension_numbers<[1], [0], [0], [1], [0, 0, 1, 1], [], []>} : vector<16x128xbf16>, vector<128x512xbf16>, vector<16x512xf32> -> vector<16x512xf32>
    %119 = vector.broadcast %8 : vector<1x512xf32> to vector<16x512xf32>
    %120 = arith.addf %118, %119 : vector<16x512xf32>
    %121 = arith.index_cast %112 : i32 to index
    %c0_63 = arith.constant 0 : index
    %c0_64 = arith.constant 0 : index
    %122 = vector.load %arg1[%121, %c0_63, %c0_64] : memref<8x16x512xbf16, #tpu.memory_space<vmem>>, vector<1x16x512xbf16>
    %123 = vector.shape_cast %122 : vector<1x16x512xbf16> to vector<16x512xbf16>
    %124 = arith.extf %123 : vector<16x512xbf16> to vector<16x512xf32>
    %125 = arith.addf %120, %124 : vector<16x512xf32>
    %126 = vector.extract_strided_slice %125 {offsets = [0, 0], sizes = [16, 128], strides = [1, 1]} : vector<16x512xf32> to vector<16x128xf32>
    %127 = arith.negf %126 : vector<16x128xf32>
    %128 = math.exp %127 : vector<16x128xf32>
    %cst_65 = arith.constant 1.000000e+00 : f32
    %129 = vector.broadcast %cst_65 : f32 to vector<16x128xf32>
    %130 = arith.addf %129, %128 : vector<16x128xf32>
    %131 = arith.divf %129, %130 : vector<16x128xf32>
    %132 = vector.extract_strided_slice %125 {offsets = [0, 128], sizes = [16, 128], strides = [1, 1]} : vector<16x512xf32> to vector<16x128xf32>
    %133 = arith.negf %132 : vector<16x128xf32>
    %134 = math.exp %133 : vector<16x128xf32>
    %cst_66 = arith.constant 1.000000e+00 : f32
    %135 = vector.broadcast %cst_66 : f32 to vector<16x128xf32>
    %136 = arith.addf %135, %134 : vector<16x128xf32>
    %137 = arith.divf %135, %136 : vector<16x128xf32>
    %138 = vector.extract_strided_slice %125 {offsets = [0, 256], sizes = [16, 128], strides = [1, 1]} : vector<16x512xf32> to vector<16x128xf32>
    %139 = math.tanh %138 : vector<16x128xf32>
    %140 = vector.extract_strided_slice %125 {offsets = [0, 384], sizes = [16, 128], strides = [1, 1]} : vector<16x512xf32> to vector<16x128xf32>
    %141 = arith.negf %140 : vector<16x128xf32>
    %142 = math.exp %141 : vector<16x128xf32>
    %cst_67 = arith.constant 1.000000e+00 : f32
    %143 = vector.broadcast %cst_67 : f32 to vector<16x128xf32>
    %144 = arith.addf %143, %142 : vector<16x128xf32>
    %145 = arith.divf %143, %144 : vector<16x128xf32>
    %146 = arith.mulf %137, %116 : vector<16x128xf32>
    %147 = arith.mulf %131, %139 : vector<16x128xf32>
    %148 = arith.addf %146, %147 : vector<16x128xf32>
    %149 = math.tanh %148 : vector<16x128xf32>
    %150 = arith.mulf %145, %149 : vector<16x128xf32>
    %c1_68 = arith.constant 1 : index
    %c0_69 = arith.constant 0 : index
    %c0_70 = arith.constant 0 : index
    %151 = vector.load %arg9[%c1_68, %c0_69, %c0_70] : memref<2x16x128xf32, #tpu.memory_space<vmem>>, vector<1x16x128xf32>
    %152 = vector.shape_cast %151 : vector<1x16x128xf32> to vector<16x128xf32>
    %c1_71 = arith.constant 1 : index
    %c0_72 = arith.constant 0 : index
    %c0_73 = arith.constant 0 : index
    %153 = vector.load %arg10[%c1_71, %c0_72, %c0_73] : memref<2x16x128xf32, #tpu.memory_space<vmem>>, vector<1x16x128xf32>
    %154 = vector.shape_cast %153 : vector<1x16x128xf32> to vector<16x128xf32>
    %155 = arith.truncf %152 : vector<16x128xf32> to vector<16x128xbf16>
    %cst_74 = arith.constant dense<0.000000e+00> : vector<16x512xf32>
    %156 = tpu.matmul %155, %6, %cst_74 {dimension_numbers = #tpu.dot_dimension_numbers<[1], [0], [0], [1], [0, 0, 1, 1], [], []>} : vector<16x128xbf16>, vector<128x512xbf16>, vector<16x512xf32> -> vector<16x512xf32>
    %157 = vector.broadcast %10 : vector<1x512xf32> to vector<16x512xf32>
    %158 = arith.addf %156, %157 : vector<16x512xf32>
    %c7_i32_75 = arith.constant 7 : i32
    %159 = arith.subi %c7_i32_75, %112 : i32
    %160 = arith.index_cast %159 : i32 to index
    %c0_76 = arith.constant 0 : index
    %c0_77 = arith.constant 0 : index
    %161 = vector.load %arg2[%160, %c0_76, %c0_77] : memref<8x16x512xbf16, #tpu.memory_space<vmem>>, vector<1x16x512xbf16>
    %162 = vector.shape_cast %161 : vector<1x16x512xbf16> to vector<16x512xbf16>
    %163 = arith.extf %162 : vector<16x512xbf16> to vector<16x512xf32>
    %164 = arith.addf %158, %163 : vector<16x512xf32>
    %165 = vector.extract_strided_slice %164 {offsets = [0, 0], sizes = [16, 128], strides = [1, 1]} : vector<16x512xf32> to vector<16x128xf32>
    %166 = arith.negf %165 : vector<16x128xf32>
    %167 = math.exp %166 : vector<16x128xf32>
    %cst_78 = arith.constant 1.000000e+00 : f32
    %168 = vector.broadcast %cst_78 : f32 to vector<16x128xf32>
    %169 = arith.addf %168, %167 : vector<16x128xf32>
    %170 = arith.divf %168, %169 : vector<16x128xf32>
    %171 = vector.extract_strided_slice %164 {offsets = [0, 128], sizes = [16, 128], strides = [1, 1]} : vector<16x512xf32> to vector<16x128xf32>
    %172 = arith.negf %171 : vector<16x128xf32>
    %173 = math.exp %172 : vector<16x128xf32>
    %cst_79 = arith.constant 1.000000e+00 : f32
    %174 = vector.broadcast %cst_79 : f32 to vector<16x128xf32>
    %175 = arith.addf %174, %173 : vector<16x128xf32>
    %176 = arith.divf %174, %175 : vector<16x128xf32>
    %177 = vector.extract_strided_slice %164 {offsets = [0, 256], sizes = [16, 128], strides = [1, 1]} : vector<16x512xf32> to vector<16x128xf32>
    %178 = math.tanh %177 : vector<16x128xf32>
    %179 = vector.extract_strided_slice %164 {offsets = [0, 384], sizes = [16, 128], strides = [1, 1]} : vector<16x512xf32> to vector<16x128xf32>
    %180 = arith.negf %179 : vector<16x128xf32>
    %181 = math.exp %180 : vector<16x128xf32>
    %cst_80 = arith.constant 1.000000e+00 : f32
    %182 = vector.broadcast %cst_80 : f32 to vector<16x128xf32>
    %183 = arith.addf %182, %181 : vector<16x128xf32>
    %184 = arith.divf %182, %183 : vector<16x128xf32>
    %185 = arith.mulf %176, %154 : vector<16x128xf32>
    %186 = arith.mulf %170, %178 : vector<16x128xf32>
    %187 = arith.addf %185, %186 : vector<16x128xf32>
    %188 = math.tanh %187 : vector<16x128xf32>
    %189 = arith.mulf %184, %188 : vector<16x128xf32>
    %c0_81 = arith.constant 0 : index
    %c0_82 = arith.constant 0 : index
    %c0_83 = arith.constant 0 : index
    %190 = vector.load %arg9[%c0_81, %c0_82, %c0_83] : memref<2x16x128xf32, #tpu.memory_space<vmem>>, vector<1x16x128xf32>
    %191 = vector.shape_cast %190 : vector<1x16x128xf32> to vector<16x128xf32>
    %192 = vector.shape_cast %150 : vector<16x128xf32> to vector<1x16x128xf32>
    tpu.vector_store %arg9[%c0_81, %c0_82, %c0_83], %192 {strides = array<i32>} : memref<2x16x128xf32, #tpu.memory_space<vmem>>, vector<1x16x128xf32>,
    %c0_84 = arith.constant 0 : index
    %c0_85 = arith.constant 0 : index
    %c0_86 = arith.constant 0 : index
    %193 = vector.load %arg10[%c0_84, %c0_85, %c0_86] : memref<2x16x128xf32, #tpu.memory_space<vmem>>, vector<1x16x128xf32>
    %194 = vector.shape_cast %193 : vector<1x16x128xf32> to vector<16x128xf32>
    %195 = vector.shape_cast %148 : vector<16x128xf32> to vector<1x16x128xf32>
    tpu.vector_store %arg10[%c0_84, %c0_85, %c0_86], %195 {strides = array<i32>} : memref<2x16x128xf32, #tpu.memory_space<vmem>>, vector<1x16x128xf32>,
    %c1_87 = arith.constant 1 : index
    %c0_88 = arith.constant 0 : index
    %c0_89 = arith.constant 0 : index
    %196 = vector.load %arg9[%c1_87, %c0_88, %c0_89] : memref<2x16x128xf32, #tpu.memory_space<vmem>>, vector<1x16x128xf32>
    %197 = vector.shape_cast %196 : vector<1x16x128xf32> to vector<16x128xf32>
    %198 = vector.shape_cast %189 : vector<16x128xf32> to vector<1x16x128xf32>
    tpu.vector_store %arg9[%c1_87, %c0_88, %c0_89], %198 {strides = array<i32>} : memref<2x16x128xf32, #tpu.memory_space<vmem>>, vector<1x16x128xf32>,
    %c1_90 = arith.constant 1 : index
    %c0_91 = arith.constant 0 : index
    %c0_92 = arith.constant 0 : index
    %199 = vector.load %arg10[%c1_90, %c0_91, %c0_92] : memref<2x16x128xf32, #tpu.memory_space<vmem>>, vector<1x16x128xf32>
    %200 = vector.shape_cast %199 : vector<1x16x128xf32> to vector<16x128xf32>
    %201 = vector.shape_cast %187 : vector<16x128xf32> to vector<1x16x128xf32>
    tpu.vector_store %arg10[%c1_90, %c0_91, %c0_92], %201 {strides = array<i32>} : memref<2x16x128xf32, #tpu.memory_space<vmem>>, vector<1x16x128xf32>,
    %202 = arith.index_cast %112 : i32 to index
    %c0_93 = arith.constant 0 : index
    %c0_94 = arith.constant 0 : index
    %203 = vector.load %arg5[%202, %c0_93, %c0_94] : memref<8x16x128xf32, #tpu.memory_space<vmem>>, vector<1x16x128xf32>
    %204 = vector.shape_cast %203 : vector<1x16x128xf32> to vector<16x128xf32>
    %205 = vector.shape_cast %150 : vector<16x128xf32> to vector<1x16x128xf32>
    tpu.vector_store %arg5[%202, %c0_93, %c0_94], %205 {strides = array<i32>} : memref<8x16x128xf32, #tpu.memory_space<vmem>>, vector<1x16x128xf32>,
    %c7_i32_95 = arith.constant 7 : i32
    %206 = arith.subi %c7_i32_95, %112 : i32
    %207 = arith.index_cast %206 : i32 to index
    %c0_96 = arith.constant 0 : index
    %c0_97 = arith.constant 0 : index
    %208 = vector.load %arg6[%207, %c0_96, %c0_97] : memref<8x16x128xf32, #tpu.memory_space<vmem>>, vector<1x16x128xf32>
    %209 = vector.shape_cast %208 : vector<1x16x128xf32> to vector<16x128xf32>
    %210 = vector.shape_cast %189 : vector<16x128xf32> to vector<1x16x128xf32>
    tpu.vector_store %arg6[%207, %c0_96, %c0_97], %210 {strides = array<i32>} : memref<8x16x128xf32, #tpu.memory_space<vmem>>, vector<1x16x128xf32>,
    %c2_i32 = arith.constant 2 : i32
    %c1_i32_98 = arith.constant 1 : i32
    %211 = arith.muli %c2_i32, %c1_i32_98 : i32
    %c0_i32_99 = arith.constant 0 : i32
    %212 = arith.addi %c0_i32_99, %211 : i32
    %c0_100 = arith.constant 0 : index
    %c0_101 = arith.constant 0 : index
    %c0_102 = arith.constant 0 : index
    %213 = vector.load %arg9[%c0_100, %c0_101, %c0_102] : memref<2x16x128xf32, #tpu.memory_space<vmem>>, vector<1x16x128xf32>
    %214 = vector.shape_cast %213 : vector<1x16x128xf32> to vector<16x128xf32>
    %c0_103 = arith.constant 0 : index
    %c0_104 = arith.constant 0 : index
    %c0_105 = arith.constant 0 : index
    %215 = vector.load %arg10[%c0_103, %c0_104, %c0_105] : memref<2x16x128xf32, #tpu.memory_space<vmem>>, vector<1x16x128xf32>
    %216 = vector.shape_cast %215 : vector<1x16x128xf32> to vector<16x128xf32>
    %217 = arith.truncf %214 : vector<16x128xf32> to vector<16x128xbf16>
    %cst_106 = arith.constant dense<0.000000e+00> : vector<16x512xf32>
    %218 = tpu.matmul %217, %4, %cst_106 {dimension_numbers = #tpu.dot_dimension_numbers<[1], [0], [0], [1], [0, 0, 1, 1], [], []>} : vector<16x128xbf16>, vector<128x512xbf16>, vector<16x512xf32> -> vector<16x512xf32>
    %219 = vector.broadcast %8 : vector<1x512xf32> to vector<16x512xf32>
    %220 = arith.addf %218, %219 : vector<16x512xf32>
    %221 = arith.index_cast %212 : i32 to index
    %c0_107 = arith.constant 0 : index
    %c0_108 = arith.constant 0 : index
    %222 = vector.load %arg1[%221, %c0_107, %c0_108] : memref<8x16x512xbf16, #tpu.memory_space<vmem>>, vector<1x16x512xbf16>
    %223 = vector.shape_cast %222 : vector<1x16x512xbf16> to vector<16x512xbf16>
    %224 = arith.extf %223 : vector<16x512xbf16> to vector<16x512xf32>
    %225 = arith.addf %220, %224 : vector<16x512xf32>
    %226 = vector.extract_strided_slice %225 {offsets = [0, 0], sizes = [16, 128], strides = [1, 1]} : vector<16x512xf32> to vector<16x128xf32>
    %227 = arith.negf %226 : vector<16x128xf32>
    %228 = math.exp %227 : vector<16x128xf32>
    %cst_109 = arith.constant 1.000000e+00 : f32
    %229 = vector.broadcast %cst_109 : f32 to vector<16x128xf32>
    %230 = arith.addf %229, %228 : vector<16x128xf32>
    %231 = arith.divf %229, %230 : vector<16x128xf32>
    %232 = vector.extract_strided_slice %225 {offsets = [0, 128], sizes = [16, 128], strides = [1, 1]} : vector<16x512xf32> to vector<16x128xf32>
    %233 = arith.negf %232 : vector<16x128xf32>
    %234 = math.exp %233 : vector<16x128xf32>
    %cst_110 = arith.constant 1.000000e+00 : f32
    %235 = vector.broadcast %cst_110 : f32 to vector<16x128xf32>
    %236 = arith.addf %235, %234 : vector<16x128xf32>
    %237 = arith.divf %235, %236 : vector<16x128xf32>
    %238 = vector.extract_strided_slice %225 {offsets = [0, 256], sizes = [16, 128], strides = [1, 1]} : vector<16x512xf32> to vector<16x128xf32>
    %239 = math.tanh %238 : vector<16x128xf32>
    %240 = vector.extract_strided_slice %225 {offsets = [0, 384], sizes = [16, 128], strides = [1, 1]} : vector<16x512xf32> to vector<16x128xf32>
    %241 = arith.negf %240 : vector<16x128xf32>
    %242 = math.exp %241 : vector<16x128xf32>
    %cst_111 = arith.constant 1.000000e+00 : f32
    %243 = vector.broadcast %cst_111 : f32 to vector<16x128xf32>
    %244 = arith.addf %243, %242 : vector<16x128xf32>
    %245 = arith.divf %243, %244 : vector<16x128xf32>
    %246 = arith.mulf %237, %216 : vector<16x128xf32>
    %247 = arith.mulf %231, %239 : vector<16x128xf32>
    %248 = arith.addf %246, %247 : vector<16x128xf32>
    %249 = math.tanh %248 : vector<16x128xf32>
    %250 = arith.mulf %245, %249 : vector<16x128xf32>
    %c1_112 = arith.constant 1 : index
    %c0_113 = arith.constant 0 : index
    %c0_114 = arith.constant 0 : index
    %251 = vector.load %arg9[%c1_112, %c0_113, %c0_114] : memref<2x16x128xf32, #tpu.memory_space<vmem>>, vector<1x16x128xf32>
    %252 = vector.shape_cast %251 : vector<1x16x128xf32> to vector<16x128xf32>
    %c1_115 = arith.constant 1 : index
    %c0_116 = arith.constant 0 : index
    %c0_117 = arith.constant 0 : index
    %253 = vector.load %arg10[%c1_115, %c0_116, %c0_117] : memref<2x16x128xf32, #tpu.memory_space<vmem>>, vector<1x16x128xf32>
    %254 = vector.shape_cast %253 : vector<1x16x128xf32> to vector<16x128xf32>
    %255 = arith.truncf %252 : vector<16x128xf32> to vector<16x128xbf16>
    %cst_118 = arith.constant dense<0.000000e+00> : vector<16x512xf32>
    %256 = tpu.matmul %255, %6, %cst_118 {dimension_numbers = #tpu.dot_dimension_numbers<[1], [0], [0], [1], [0, 0, 1, 1], [], []>} : vector<16x128xbf16>, vector<128x512xbf16>, vector<16x512xf32> -> vector<16x512xf32>
    %257 = vector.broadcast %10 : vector<1x512xf32> to vector<16x512xf32>
    %258 = arith.addf %256, %257 : vector<16x512xf32>
    %c7_i32_119 = arith.constant 7 : i32
    %259 = arith.subi %c7_i32_119, %212 : i32
    %260 = arith.index_cast %259 : i32 to index
    %c0_120 = arith.constant 0 : index
    %c0_121 = arith.constant 0 : index
    %261 = vector.load %arg2[%260, %c0_120, %c0_121] : memref<8x16x512xbf16, #tpu.memory_space<vmem>>, vector<1x16x512xbf16>
    %262 = vector.shape_cast %261 : vector<1x16x512xbf16> to vector<16x512xbf16>
    %263 = arith.extf %262 : vector<16x512xbf16> to vector<16x512xf32>
    %264 = arith.addf %258, %263 : vector<16x512xf32>
    %265 = vector.extract_strided_slice %264 {offsets = [0, 0], sizes = [16, 128], strides = [1, 1]} : vector<16x512xf32> to vector<16x128xf32>
    %266 = arith.negf %265 : vector<16x128xf32>
    %267 = math.exp %266 : vector<16x128xf32>
    %cst_122 = arith.constant 1.000000e+00 : f32
    %268 = vector.broadcast %cst_122 : f32 to vector<16x128xf32>
    %269 = arith.addf %268, %267 : vector<16x128xf32>
    %270 = arith.divf %268, %269 : vector<16x128xf32>
    %271 = vector.extract_strided_slice %264 {offsets = [0, 128], sizes = [16, 128], strides = [1, 1]} : vector<16x512xf32> to vector<16x128xf32>
    %272 = arith.negf %271 : vector<16x128xf32>
    %273 = math.exp %272 : vector<16x128xf32>
    %cst_123 = arith.constant 1.000000e+00 : f32
    %274 = vector.broadcast %cst_123 : f32 to vector<16x128xf32>
    %275 = arith.addf %274, %273 : vector<16x128xf32>
    %276 = arith.divf %274, %275 : vector<16x128xf32>
    %277 = vector.extract_strided_slice %264 {offsets = [0, 256], sizes = [16, 128], strides = [1, 1]} : vector<16x512xf32> to vector<16x128xf32>
    %278 = math.tanh %277 : vector<16x128xf32>
    %279 = vector.extract_strided_slice %264 {offsets = [0, 384], sizes = [16, 128], strides = [1, 1]} : vector<16x512xf32> to vector<16x128xf32>
    %280 = arith.negf %279 : vector<16x128xf32>
    %281 = math.exp %280 : vector<16x128xf32>
    %cst_124 = arith.constant 1.000000e+00 : f32
    %282 = vector.broadcast %cst_124 : f32 to vector<16x128xf32>
    %283 = arith.addf %282, %281 : vector<16x128xf32>
    %284 = arith.divf %282, %283 : vector<16x128xf32>
    %285 = arith.mulf %276, %254 : vector<16x128xf32>
    %286 = arith.mulf %270, %278 : vector<16x128xf32>
    %287 = arith.addf %285, %286 : vector<16x128xf32>
    %288 = math.tanh %287 : vector<16x128xf32>
    %289 = arith.mulf %284, %288 : vector<16x128xf32>
    %c0_125 = arith.constant 0 : index
    %c0_126 = arith.constant 0 : index
    %c0_127 = arith.constant 0 : index
    %290 = vector.load %arg9[%c0_125, %c0_126, %c0_127] : memref<2x16x128xf32, #tpu.memory_space<vmem>>, vector<1x16x128xf32>
    %291 = vector.shape_cast %290 : vector<1x16x128xf32> to vector<16x128xf32>
    %292 = vector.shape_cast %250 : vector<16x128xf32> to vector<1x16x128xf32>
    tpu.vector_store %arg9[%c0_125, %c0_126, %c0_127], %292 {strides = array<i32>} : memref<2x16x128xf32, #tpu.memory_space<vmem>>, vector<1x16x128xf32>,
    %c0_128 = arith.constant 0 : index
    %c0_129 = arith.constant 0 : index
    %c0_130 = arith.constant 0 : index
    %293 = vector.load %arg10[%c0_128, %c0_129, %c0_130] : memref<2x16x128xf32, #tpu.memory_space<vmem>>, vector<1x16x128xf32>
    %294 = vector.shape_cast %293 : vector<1x16x128xf32> to vector<16x128xf32>
    %295 = vector.shape_cast %248 : vector<16x128xf32> to vector<1x16x128xf32>
    tpu.vector_store %arg10[%c0_128, %c0_129, %c0_130], %295 {strides = array<i32>} : memref<2x16x128xf32, #tpu.memory_space<vmem>>, vector<1x16x128xf32>,
    %c1_131 = arith.constant 1 : index
    %c0_132 = arith.constant 0 : index
    %c0_133 = arith.constant 0 : index
    %296 = vector.load %arg9[%c1_131, %c0_132, %c0_133] : memref<2x16x128xf32, #tpu.memory_space<vmem>>, vector<1x16x128xf32>
    %297 = vector.shape_cast %296 : vector<1x16x128xf32> to vector<16x128xf32>
    %298 = vector.shape_cast %289 : vector<16x128xf32> to vector<1x16x128xf32>
    tpu.vector_store %arg9[%c1_131, %c0_132, %c0_133], %298 {strides = array<i32>} : memref<2x16x128xf32, #tpu.memory_space<vmem>>, vector<1x16x128xf32>,
    %c1_134 = arith.constant 1 : index
    %c0_135 = arith.constant 0 : index
    %c0_136 = arith.constant 0 : index
    %299 = vector.load %arg10[%c1_134, %c0_135, %c0_136] : memref<2x16x128xf32, #tpu.memory_space<vmem>>, vector<1x16x128xf32>
    %300 = vector.shape_cast %299 : vector<1x16x128xf32> to vector<16x128xf32>
    %301 = vector.shape_cast %287 : vector<16x128xf32> to vector<1x16x128xf32>
    tpu.vector_store %arg10[%c1_134, %c0_135, %c0_136], %301 {strides = array<i32>} : memref<2x16x128xf32, #tpu.memory_space<vmem>>, vector<1x16x128xf32>,
    %302 = arith.index_cast %212 : i32 to index
    %c0_137 = arith.constant 0 : index
    %c0_138 = arith.constant 0 : index
    %303 = vector.load %arg5[%302, %c0_137, %c0_138] : memref<8x16x128xf32, #tpu.memory_space<vmem>>, vector<1x16x128xf32>
    %304 = vector.shape_cast %303 : vector<1x16x128xf32> to vector<16x128xf32>
    %305 = vector.shape_cast %250 : vector<16x128xf32> to vector<1x16x128xf32>
    tpu.vector_store %arg5[%302, %c0_137, %c0_138], %305 {strides = array<i32>} : memref<8x16x128xf32, #tpu.memory_space<vmem>>, vector<1x16x128xf32>,
    %c7_i32_139 = arith.constant 7 : i32
    %306 = arith.subi %c7_i32_139, %212 : i32
    %307 = arith.index_cast %306 : i32 to index
    %c0_140 = arith.constant 0 : index
    %c0_141 = arith.constant 0 : index
    %308 = vector.load %arg6[%307, %c0_140, %c0_141] : memref<8x16x128xf32, #tpu.memory_space<vmem>>, vector<1x16x128xf32>
    %309 = vector.shape_cast %308 : vector<1x16x128xf32> to vector<16x128xf32>
    %310 = vector.shape_cast %289 : vector<16x128xf32> to vector<1x16x128xf32>
    tpu.vector_store %arg6[%307, %c0_140, %c0_141], %310 {strides = array<i32>} : memref<8x16x128xf32, #tpu.memory_space<vmem>>, vector<1x16x128xf32>,
    %c3_i32 = arith.constant 3 : i32
    %c1_i32_142 = arith.constant 1 : i32
    %311 = arith.muli %c3_i32, %c1_i32_142 : i32
    %c0_i32_143 = arith.constant 0 : i32
    %312 = arith.addi %c0_i32_143, %311 : i32
    %c0_144 = arith.constant 0 : index
    %c0_145 = arith.constant 0 : index
    %c0_146 = arith.constant 0 : index
    %313 = vector.load %arg9[%c0_144, %c0_145, %c0_146] : memref<2x16x128xf32, #tpu.memory_space<vmem>>, vector<1x16x128xf32>
    %314 = vector.shape_cast %313 : vector<1x16x128xf32> to vector<16x128xf32>
    %c0_147 = arith.constant 0 : index
    %c0_148 = arith.constant 0 : index
    %c0_149 = arith.constant 0 : index
    %315 = vector.load %arg10[%c0_147, %c0_148, %c0_149] : memref<2x16x128xf32, #tpu.memory_space<vmem>>, vector<1x16x128xf32>
    %316 = vector.shape_cast %315 : vector<1x16x128xf32> to vector<16x128xf32>
    %317 = arith.truncf %314 : vector<16x128xf32> to vector<16x128xbf16>
    %cst_150 = arith.constant dense<0.000000e+00> : vector<16x512xf32>
    %318 = tpu.matmul %317, %4, %cst_150 {dimension_numbers = #tpu.dot_dimension_numbers<[1], [0], [0], [1], [0, 0, 1, 1], [], []>} : vector<16x128xbf16>, vector<128x512xbf16>, vector<16x512xf32> -> vector<16x512xf32>
    %319 = vector.broadcast %8 : vector<1x512xf32> to vector<16x512xf32>
    %320 = arith.addf %318, %319 : vector<16x512xf32>
    %321 = arith.index_cast %312 : i32 to index
    %c0_151 = arith.constant 0 : index
    %c0_152 = arith.constant 0 : index
    %322 = vector.load %arg1[%321, %c0_151, %c0_152] : memref<8x16x512xbf16, #tpu.memory_space<vmem>>, vector<1x16x512xbf16>
    %323 = vector.shape_cast %322 : vector<1x16x512xbf16> to vector<16x512xbf16>
    %324 = arith.extf %323 : vector<16x512xbf16> to vector<16x512xf32>
    %325 = arith.addf %320, %324 : vector<16x512xf32>
    %326 = vector.extract_strided_slice %325 {offsets = [0, 0], sizes = [16, 128], strides = [1, 1]} : vector<16x512xf32> to vector<16x128xf32>
    %327 = arith.negf %326 : vector<16x128xf32>
    %328 = math.exp %327 : vector<16x128xf32>
    %cst_153 = arith.constant 1.000000e+00 : f32
    %329 = vector.broadcast %cst_153 : f32 to vector<16x128xf32>
    %330 = arith.addf %329, %328 : vector<16x128xf32>
    %331 = arith.divf %329, %330 : vector<16x128xf32>
    %332 = vector.extract_strided_slice %325 {offsets = [0, 128], sizes = [16, 128], strides = [1, 1]} : vector<16x512xf32> to vector<16x128xf32>
    %333 = arith.negf %332 : vector<16x128xf32>
    %334 = math.exp %333 : vector<16x128xf32>
    %cst_154 = arith.constant 1.000000e+00 : f32
    %335 = vector.broadcast %cst_154 : f32 to vector<16x128xf32>
    %336 = arith.addf %335, %334 : vector<16x128xf32>
    %337 = arith.divf %335, %336 : vector<16x128xf32>
    %338 = vector.extract_strided_slice %325 {offsets = [0, 256], sizes = [16, 128], strides = [1, 1]} : vector<16x512xf32> to vector<16x128xf32>
    %339 = math.tanh %338 : vector<16x128xf32>
    %340 = vector.extract_strided_slice %325 {offsets = [0, 384], sizes = [16, 128], strides = [1, 1]} : vector<16x512xf32> to vector<16x128xf32>
    %341 = arith.negf %340 : vector<16x128xf32>
    %342 = math.exp %341 : vector<16x128xf32>
    %cst_155 = arith.constant 1.000000e+00 : f32
    %343 = vector.broadcast %cst_155 : f32 to vector<16x128xf32>
    %344 = arith.addf %343, %342 : vector<16x128xf32>
    %345 = arith.divf %343, %344 : vector<16x128xf32>
    %346 = arith.mulf %337, %316 : vector<16x128xf32>
    %347 = arith.mulf %331, %339 : vector<16x128xf32>
    %348 = arith.addf %346, %347 : vector<16x128xf32>
    %349 = math.tanh %348 : vector<16x128xf32>
    %350 = arith.mulf %345, %349 : vector<16x128xf32>
    %c1_156 = arith.constant 1 : index
    %c0_157 = arith.constant 0 : index
    %c0_158 = arith.constant 0 : index
    %351 = vector.load %arg9[%c1_156, %c0_157, %c0_158] : memref<2x16x128xf32, #tpu.memory_space<vmem>>, vector<1x16x128xf32>
    %352 = vector.shape_cast %351 : vector<1x16x128xf32> to vector<16x128xf32>
    %c1_159 = arith.constant 1 : index
    %c0_160 = arith.constant 0 : index
    %c0_161 = arith.constant 0 : index
    %353 = vector.load %arg10[%c1_159, %c0_160, %c0_161] : memref<2x16x128xf32, #tpu.memory_space<vmem>>, vector<1x16x128xf32>
    %354 = vector.shape_cast %353 : vector<1x16x128xf32> to vector<16x128xf32>
    %355 = arith.truncf %352 : vector<16x128xf32> to vector<16x128xbf16>
    %cst_162 = arith.constant dense<0.000000e+00> : vector<16x512xf32>
    %356 = tpu.matmul %355, %6, %cst_162 {dimension_numbers = #tpu.dot_dimension_numbers<[1], [0], [0], [1], [0, 0, 1, 1], [], []>} : vector<16x128xbf16>, vector<128x512xbf16>, vector<16x512xf32> -> vector<16x512xf32>
    %357 = vector.broadcast %10 : vector<1x512xf32> to vector<16x512xf32>
    %358 = arith.addf %356, %357 : vector<16x512xf32>
    %c7_i32_163 = arith.constant 7 : i32
    %359 = arith.subi %c7_i32_163, %312 : i32
    %360 = arith.index_cast %359 : i32 to index
    %c0_164 = arith.constant 0 : index
    %c0_165 = arith.constant 0 : index
    %361 = vector.load %arg2[%360, %c0_164, %c0_165] : memref<8x16x512xbf16, #tpu.memory_space<vmem>>, vector<1x16x512xbf16>
    %362 = vector.shape_cast %361 : vector<1x16x512xbf16> to vector<16x512xbf16>
    %363 = arith.extf %362 : vector<16x512xbf16> to vector<16x512xf32>
    %364 = arith.addf %358, %363 : vector<16x512xf32>
    %365 = vector.extract_strided_slice %364 {offsets = [0, 0], sizes = [16, 128], strides = [1, 1]} : vector<16x512xf32> to vector<16x128xf32>
    %366 = arith.negf %365 : vector<16x128xf32>
    %367 = math.exp %366 : vector<16x128xf32>
    %cst_166 = arith.constant 1.000000e+00 : f32
    %368 = vector.broadcast %cst_166 : f32 to vector<16x128xf32>
    %369 = arith.addf %368, %367 : vector<16x128xf32>
    %370 = arith.divf %368, %369 : vector<16x128xf32>
    %371 = vector.extract_strided_slice %364 {offsets = [0, 128], sizes = [16, 128], strides = [1, 1]} : vector<16x512xf32> to vector<16x128xf32>
    %372 = arith.negf %371 : vector<16x128xf32>
    %373 = math.exp %372 : vector<16x128xf32>
    %cst_167 = arith.constant 1.000000e+00 : f32
    %374 = vector.broadcast %cst_167 : f32 to vector<16x128xf32>
    %375 = arith.addf %374, %373 : vector<16x128xf32>
    %376 = arith.divf %374, %375 : vector<16x128xf32>
    %377 = vector.extract_strided_slice %364 {offsets = [0, 256], sizes = [16, 128], strides = [1, 1]} : vector<16x512xf32> to vector<16x128xf32>
    %378 = math.tanh %377 : vector<16x128xf32>
    %379 = vector.extract_strided_slice %364 {offsets = [0, 384], sizes = [16, 128], strides = [1, 1]} : vector<16x512xf32> to vector<16x128xf32>
    %380 = arith.negf %379 : vector<16x128xf32>
    %381 = math.exp %380 : vector<16x128xf32>
    %cst_168 = arith.constant 1.000000e+00 : f32
    %382 = vector.broadcast %cst_168 : f32 to vector<16x128xf32>
    %383 = arith.addf %382, %381 : vector<16x128xf32>
    %384 = arith.divf %382, %383 : vector<16x128xf32>
    %385 = arith.mulf %376, %354 : vector<16x128xf32>
    %386 = arith.mulf %370, %378 : vector<16x128xf32>
    %387 = arith.addf %385, %386 : vector<16x128xf32>
    %388 = math.tanh %387 : vector<16x128xf32>
    %389 = arith.mulf %384, %388 : vector<16x128xf32>
    %c0_169 = arith.constant 0 : index
    %c0_170 = arith.constant 0 : index
    %c0_171 = arith.constant 0 : index
    %390 = vector.load %arg9[%c0_169, %c0_170, %c0_171] : memref<2x16x128xf32, #tpu.memory_space<vmem>>, vector<1x16x128xf32>
    %391 = vector.shape_cast %390 : vector<1x16x128xf32> to vector<16x128xf32>
    %392 = vector.shape_cast %350 : vector<16x128xf32> to vector<1x16x128xf32>
    tpu.vector_store %arg9[%c0_169, %c0_170, %c0_171], %392 {strides = array<i32>} : memref<2x16x128xf32, #tpu.memory_space<vmem>>, vector<1x16x128xf32>,
    %c0_172 = arith.constant 0 : index
    %c0_173 = arith.constant 0 : index
    %c0_174 = arith.constant 0 : index
    %393 = vector.load %arg10[%c0_172, %c0_173, %c0_174] : memref<2x16x128xf32, #tpu.memory_space<vmem>>, vector<1x16x128xf32>
    %394 = vector.shape_cast %393 : vector<1x16x128xf32> to vector<16x128xf32>
    %395 = vector.shape_cast %348 : vector<16x128xf32> to vector<1x16x128xf32>
    tpu.vector_store %arg10[%c0_172, %c0_173, %c0_174], %395 {strides = array<i32>} : memref<2x16x128xf32, #tpu.memory_space<vmem>>, vector<1x16x128xf32>,
    %c1_175 = arith.constant 1 : index
    %c0_176 = arith.constant 0 : index
    %c0_177 = arith.constant 0 : index
    %396 = vector.load %arg9[%c1_175, %c0_176, %c0_177] : memref<2x16x128xf32, #tpu.memory_space<vmem>>, vector<1x16x128xf32>
    %397 = vector.shape_cast %396 : vector<1x16x128xf32> to vector<16x128xf32>
    %398 = vector.shape_cast %389 : vector<16x128xf32> to vector<1x16x128xf32>
    tpu.vector_store %arg9[%c1_175, %c0_176, %c0_177], %398 {strides = array<i32>} : memref<2x16x128xf32, #tpu.memory_space<vmem>>, vector<1x16x128xf32>,
    %c1_178 = arith.constant 1 : index
    %c0_179 = arith.constant 0 : index
    %c0_180 = arith.constant 0 : index
    %399 = vector.load %arg10[%c1_178, %c0_179, %c0_180] : memref<2x16x128xf32, #tpu.memory_space<vmem>>, vector<1x16x128xf32>
    %400 = vector.shape_cast %399 : vector<1x16x128xf32> to vector<16x128xf32>
    %401 = vector.shape_cast %387 : vector<16x128xf32> to vector<1x16x128xf32>
    tpu.vector_store %arg10[%c1_178, %c0_179, %c0_180], %401 {strides = array<i32>} : memref<2x16x128xf32, #tpu.memory_space<vmem>>, vector<1x16x128xf32>,
    %402 = arith.index_cast %312 : i32 to index
    %c0_181 = arith.constant 0 : index
    %c0_182 = arith.constant 0 : index
    %403 = vector.load %arg5[%402, %c0_181, %c0_182] : memref<8x16x128xf32, #tpu.memory_space<vmem>>, vector<1x16x128xf32>
    %404 = vector.shape_cast %403 : vector<1x16x128xf32> to vector<16x128xf32>
    %405 = vector.shape_cast %350 : vector<16x128xf32> to vector<1x16x128xf32>
    tpu.vector_store %arg5[%402, %c0_181, %c0_182], %405 {strides = array<i32>} : memref<8x16x128xf32, #tpu.memory_space<vmem>>, vector<1x16x128xf32>,
    %c7_i32_183 = arith.constant 7 : i32
    %406 = arith.subi %c7_i32_183, %312 : i32
    %407 = arith.index_cast %406 : i32 to index
    %c0_184 = arith.constant 0 : index
    %c0_185 = arith.constant 0 : index
    %408 = vector.load %arg6[%407, %c0_184, %c0_185] : memref<8x16x128xf32, #tpu.memory_space<vmem>>, vector<1x16x128xf32>
    %409 = vector.shape_cast %408 : vector<1x16x128xf32> to vector<16x128xf32>
    %410 = vector.shape_cast %389 : vector<16x128xf32> to vector<1x16x128xf32>
    tpu.vector_store %arg6[%407, %c0_184, %c0_185], %410 {strides = array<i32>} : memref<8x16x128xf32, #tpu.memory_space<vmem>>, vector<1x16x128xf32>,
    %c4_i32 = arith.constant 4 : i32
    %c1_i32_186 = arith.constant 1 : i32
    %411 = arith.muli %c4_i32, %c1_i32_186 : i32
    %c0_i32_187 = arith.constant 0 : i32
    %412 = arith.addi %c0_i32_187, %411 : i32
    %c0_188 = arith.constant 0 : index
    %c0_189 = arith.constant 0 : index
    %c0_190 = arith.constant 0 : index
    %413 = vector.load %arg9[%c0_188, %c0_189, %c0_190] : memref<2x16x128xf32, #tpu.memory_space<vmem>>, vector<1x16x128xf32>
    %414 = vector.shape_cast %413 : vector<1x16x128xf32> to vector<16x128xf32>
    %c0_191 = arith.constant 0 : index
    %c0_192 = arith.constant 0 : index
    %c0_193 = arith.constant 0 : index
    %415 = vector.load %arg10[%c0_191, %c0_192, %c0_193] : memref<2x16x128xf32, #tpu.memory_space<vmem>>, vector<1x16x128xf32>
    %416 = vector.shape_cast %415 : vector<1x16x128xf32> to vector<16x128xf32>
    %417 = arith.truncf %414 : vector<16x128xf32> to vector<16x128xbf16>
    %cst_194 = arith.constant dense<0.000000e+00> : vector<16x512xf32>
    %418 = tpu.matmul %417, %4, %cst_194 {dimension_numbers = #tpu.dot_dimension_numbers<[1], [0], [0], [1], [0, 0, 1, 1], [], []>} : vector<16x128xbf16>, vector<128x512xbf16>, vector<16x512xf32> -> vector<16x512xf32>
    %419 = vector.broadcast %8 : vector<1x512xf32> to vector<16x512xf32>
    %420 = arith.addf %418, %419 : vector<16x512xf32>
    %421 = arith.index_cast %412 : i32 to index
    %c0_195 = arith.constant 0 : index
    %c0_196 = arith.constant 0 : index
    %422 = vector.load %arg1[%421, %c0_195, %c0_196] : memref<8x16x512xbf16, #tpu.memory_space<vmem>>, vector<1x16x512xbf16>
    %423 = vector.shape_cast %422 : vector<1x16x512xbf16> to vector<16x512xbf16>
    %424 = arith.extf %423 : vector<16x512xbf16> to vector<16x512xf32>
    %425 = arith.addf %420, %424 : vector<16x512xf32>
    %426 = vector.extract_strided_slice %425 {offsets = [0, 0], sizes = [16, 128], strides = [1, 1]} : vector<16x512xf32> to vector<16x128xf32>
    %427 = arith.negf %426 : vector<16x128xf32>
    %428 = math.exp %427 : vector<16x128xf32>
    %cst_197 = arith.constant 1.000000e+00 : f32
    %429 = vector.broadcast %cst_197 : f32 to vector<16x128xf32>
    %430 = arith.addf %429, %428 : vector<16x128xf32>
    %431 = arith.divf %429, %430 : vector<16x128xf32>
    %432 = vector.extract_strided_slice %425 {offsets = [0, 128], sizes = [16, 128], strides = [1, 1]} : vector<16x512xf32> to vector<16x128xf32>
    %433 = arith.negf %432 : vector<16x128xf32>
    %434 = math.exp %433 : vector<16x128xf32>
    %cst_198 = arith.constant 1.000000e+00 : f32
    %435 = vector.broadcast %cst_198 : f32 to vector<16x128xf32>
    %436 = arith.addf %435, %434 : vector<16x128xf32>
    %437 = arith.divf %435, %436 : vector<16x128xf32>
    %438 = vector.extract_strided_slice %425 {offsets = [0, 256], sizes = [16, 128], strides = [1, 1]} : vector<16x512xf32> to vector<16x128xf32>
    %439 = math.tanh %438 : vector<16x128xf32>
    %440 = vector.extract_strided_slice %425 {offsets = [0, 384], sizes = [16, 128], strides = [1, 1]} : vector<16x512xf32> to vector<16x128xf32>
    %441 = arith.negf %440 : vector<16x128xf32>
    %442 = math.exp %441 : vector<16x128xf32>
    %cst_199 = arith.constant 1.000000e+00 : f32
    %443 = vector.broadcast %cst_199 : f32 to vector<16x128xf32>
    %444 = arith.addf %443, %442 : vector<16x128xf32>
    %445 = arith.divf %443, %444 : vector<16x128xf32>
    %446 = arith.mulf %437, %416 : vector<16x128xf32>
    %447 = arith.mulf %431, %439 : vector<16x128xf32>
    %448 = arith.addf %446, %447 : vector<16x128xf32>
    %449 = math.tanh %448 : vector<16x128xf32>
    %450 = arith.mulf %445, %449 : vector<16x128xf32>
    %c1_200 = arith.constant 1 : index
    %c0_201 = arith.constant 0 : index
    %c0_202 = arith.constant 0 : index
    %451 = vector.load %arg9[%c1_200, %c0_201, %c0_202] : memref<2x16x128xf32, #tpu.memory_space<vmem>>, vector<1x16x128xf32>
    %452 = vector.shape_cast %451 : vector<1x16x128xf32> to vector<16x128xf32>
    %c1_203 = arith.constant 1 : index
    %c0_204 = arith.constant 0 : index
    %c0_205 = arith.constant 0 : index
    %453 = vector.load %arg10[%c1_203, %c0_204, %c0_205] : memref<2x16x128xf32, #tpu.memory_space<vmem>>, vector<1x16x128xf32>
    %454 = vector.shape_cast %453 : vector<1x16x128xf32> to vector<16x128xf32>
    %455 = arith.truncf %452 : vector<16x128xf32> to vector<16x128xbf16>
    %cst_206 = arith.constant dense<0.000000e+00> : vector<16x512xf32>
    %456 = tpu.matmul %455, %6, %cst_206 {dimension_numbers = #tpu.dot_dimension_numbers<[1], [0], [0], [1], [0, 0, 1, 1], [], []>} : vector<16x128xbf16>, vector<128x512xbf16>, vector<16x512xf32> -> vector<16x512xf32>
    %457 = vector.broadcast %10 : vector<1x512xf32> to vector<16x512xf32>
    %458 = arith.addf %456, %457 : vector<16x512xf32>
    %c7_i32_207 = arith.constant 7 : i32
    %459 = arith.subi %c7_i32_207, %412 : i32
    %460 = arith.index_cast %459 : i32 to index
    %c0_208 = arith.constant 0 : index
    %c0_209 = arith.constant 0 : index
    %461 = vector.load %arg2[%460, %c0_208, %c0_209] : memref<8x16x512xbf16, #tpu.memory_space<vmem>>, vector<1x16x512xbf16>
    %462 = vector.shape_cast %461 : vector<1x16x512xbf16> to vector<16x512xbf16>
    %463 = arith.extf %462 : vector<16x512xbf16> to vector<16x512xf32>
    %464 = arith.addf %458, %463 : vector<16x512xf32>
    %465 = vector.extract_strided_slice %464 {offsets = [0, 0], sizes = [16, 128], strides = [1, 1]} : vector<16x512xf32> to vector<16x128xf32>
    %466 = arith.negf %465 : vector<16x128xf32>
    %467 = math.exp %466 : vector<16x128xf32>
    %cst_210 = arith.constant 1.000000e+00 : f32
    %468 = vector.broadcast %cst_210 : f32 to vector<16x128xf32>
    %469 = arith.addf %468, %467 : vector<16x128xf32>
    %470 = arith.divf %468, %469 : vector<16x128xf32>
    %471 = vector.extract_strided_slice %464 {offsets = [0, 128], sizes = [16, 128], strides = [1, 1]} : vector<16x512xf32> to vector<16x128xf32>
    %472 = arith.negf %471 : vector<16x128xf32>
    %473 = math.exp %472 : vector<16x128xf32>
    %cst_211 = arith.constant 1.000000e+00 : f32
    %474 = vector.broadcast %cst_211 : f32 to vector<16x128xf32>
    %475 = arith.addf %474, %473 : vector<16x128xf32>
    %476 = arith.divf %474, %475 : vector<16x128xf32>
    %477 = vector.extract_strided_slice %464 {offsets = [0, 256], sizes = [16, 128], strides = [1, 1]} : vector<16x512xf32> to vector<16x128xf32>
    %478 = math.tanh %477 : vector<16x128xf32>
    %479 = vector.extract_strided_slice %464 {offsets = [0, 384], sizes = [16, 128], strides = [1, 1]} : vector<16x512xf32> to vector<16x128xf32>
    %480 = arith.negf %479 : vector<16x128xf32>
    %481 = math.exp %480 : vector<16x128xf32>
    %cst_212 = arith.constant 1.000000e+00 : f32
    %482 = vector.broadcast %cst_212 : f32 to vector<16x128xf32>
    %483 = arith.addf %482, %481 : vector<16x128xf32>
    %484 = arith.divf %482, %483 : vector<16x128xf32>
    %485 = arith.mulf %476, %454 : vector<16x128xf32>
    %486 = arith.mulf %470, %478 : vector<16x128xf32>
    %487 = arith.addf %485, %486 : vector<16x128xf32>
    %488 = math.tanh %487 : vector<16x128xf32>
    %489 = arith.mulf %484, %488 : vector<16x128xf32>
    %c0_213 = arith.constant 0 : index
    %c0_214 = arith.constant 0 : index
    %c0_215 = arith.constant 0 : index
    %490 = vector.load %arg9[%c0_213, %c0_214, %c0_215] : memref<2x16x128xf32, #tpu.memory_space<vmem>>, vector<1x16x128xf32>
    %491 = vector.shape_cast %490 : vector<1x16x128xf32> to vector<16x128xf32>
    %492 = vector.shape_cast %450 : vector<16x128xf32> to vector<1x16x128xf32>
    tpu.vector_store %arg9[%c0_213, %c0_214, %c0_215], %492 {strides = array<i32>} : memref<2x16x128xf32, #tpu.memory_space<vmem>>, vector<1x16x128xf32>,
    %c0_216 = arith.constant 0 : index
    %c0_217 = arith.constant 0 : index
    %c0_218 = arith.constant 0 : index
    %493 = vector.load %arg10[%c0_216, %c0_217, %c0_218] : memref<2x16x128xf32, #tpu.memory_space<vmem>>, vector<1x16x128xf32>
    %494 = vector.shape_cast %493 : vector<1x16x128xf32> to vector<16x128xf32>
    %495 = vector.shape_cast %448 : vector<16x128xf32> to vector<1x16x128xf32>
    tpu.vector_store %arg10[%c0_216, %c0_217, %c0_218], %495 {strides = array<i32>} : memref<2x16x128xf32, #tpu.memory_space<vmem>>, vector<1x16x128xf32>,
    %c1_219 = arith.constant 1 : index
    %c0_220 = arith.constant 0 : index
    %c0_221 = arith.constant 0 : index
    %496 = vector.load %arg9[%c1_219, %c0_220, %c0_221] : memref<2x16x128xf32, #tpu.memory_space<vmem>>, vector<1x16x128xf32>
    %497 = vector.shape_cast %496 : vector<1x16x128xf32> to vector<16x128xf32>
    %498 = vector.shape_cast %489 : vector<16x128xf32> to vector<1x16x128xf32>
    tpu.vector_store %arg9[%c1_219, %c0_220, %c0_221], %498 {strides = array<i32>} : memref<2x16x128xf32, #tpu.memory_space<vmem>>, vector<1x16x128xf32>,
    %c1_222 = arith.constant 1 : index
    %c0_223 = arith.constant 0 : index
    %c0_224 = arith.constant 0 : index
    %499 = vector.load %arg10[%c1_222, %c0_223, %c0_224] : memref<2x16x128xf32, #tpu.memory_space<vmem>>, vector<1x16x128xf32>
    %500 = vector.shape_cast %499 : vector<1x16x128xf32> to vector<16x128xf32>
    %501 = vector.shape_cast %487 : vector<16x128xf32> to vector<1x16x128xf32>
    tpu.vector_store %arg10[%c1_222, %c0_223, %c0_224], %501 {strides = array<i32>} : memref<2x16x128xf32, #tpu.memory_space<vmem>>, vector<1x16x128xf32>,
    %502 = arith.index_cast %412 : i32 to index
    %c0_225 = arith.constant 0 : index
    %c0_226 = arith.constant 0 : index
    %503 = vector.load %arg5[%502, %c0_225, %c0_226] : memref<8x16x128xf32, #tpu.memory_space<vmem>>, vector<1x16x128xf32>
    %504 = vector.shape_cast %503 : vector<1x16x128xf32> to vector<16x128xf32>
    %505 = vector.shape_cast %450 : vector<16x128xf32> to vector<1x16x128xf32>
    tpu.vector_store %arg5[%502, %c0_225, %c0_226], %505 {strides = array<i32>} : memref<8x16x128xf32, #tpu.memory_space<vmem>>, vector<1x16x128xf32>,
    %c7_i32_227 = arith.constant 7 : i32
    %506 = arith.subi %c7_i32_227, %412 : i32
    %507 = arith.index_cast %506 : i32 to index
    %c0_228 = arith.constant 0 : index
    %c0_229 = arith.constant 0 : index
    %508 = vector.load %arg6[%507, %c0_228, %c0_229] : memref<8x16x128xf32, #tpu.memory_space<vmem>>, vector<1x16x128xf32>
    %509 = vector.shape_cast %508 : vector<1x16x128xf32> to vector<16x128xf32>
    %510 = vector.shape_cast %489 : vector<16x128xf32> to vector<1x16x128xf32>
    tpu.vector_store %arg6[%507, %c0_228, %c0_229], %510 {strides = array<i32>} : memref<8x16x128xf32, #tpu.memory_space<vmem>>, vector<1x16x128xf32>,
    %c5_i32 = arith.constant 5 : i32
    %c1_i32_230 = arith.constant 1 : i32
    %511 = arith.muli %c5_i32, %c1_i32_230 : i32
    %c0_i32_231 = arith.constant 0 : i32
    %512 = arith.addi %c0_i32_231, %511 : i32
    %c0_232 = arith.constant 0 : index
    %c0_233 = arith.constant 0 : index
    %c0_234 = arith.constant 0 : index
    %513 = vector.load %arg9[%c0_232, %c0_233, %c0_234] : memref<2x16x128xf32, #tpu.memory_space<vmem>>, vector<1x16x128xf32>
    %514 = vector.shape_cast %513 : vector<1x16x128xf32> to vector<16x128xf32>
    %c0_235 = arith.constant 0 : index
    %c0_236 = arith.constant 0 : index
    %c0_237 = arith.constant 0 : index
    %515 = vector.load %arg10[%c0_235, %c0_236, %c0_237] : memref<2x16x128xf32, #tpu.memory_space<vmem>>, vector<1x16x128xf32>
    %516 = vector.shape_cast %515 : vector<1x16x128xf32> to vector<16x128xf32>
    %517 = arith.truncf %514 : vector<16x128xf32> to vector<16x128xbf16>
    %cst_238 = arith.constant dense<0.000000e+00> : vector<16x512xf32>
    %518 = tpu.matmul %517, %4, %cst_238 {dimension_numbers = #tpu.dot_dimension_numbers<[1], [0], [0], [1], [0, 0, 1, 1], [], []>} : vector<16x128xbf16>, vector<128x512xbf16>, vector<16x512xf32> -> vector<16x512xf32>
    %519 = vector.broadcast %8 : vector<1x512xf32> to vector<16x512xf32>
    %520 = arith.addf %518, %519 : vector<16x512xf32>
    %521 = arith.index_cast %512 : i32 to index
    %c0_239 = arith.constant 0 : index
    %c0_240 = arith.constant 0 : index
    %522 = vector.load %arg1[%521, %c0_239, %c0_240] : memref<8x16x512xbf16, #tpu.memory_space<vmem>>, vector<1x16x512xbf16>
    %523 = vector.shape_cast %522 : vector<1x16x512xbf16> to vector<16x512xbf16>
    %524 = arith.extf %523 : vector<16x512xbf16> to vector<16x512xf32>
    %525 = arith.addf %520, %524 : vector<16x512xf32>
    %526 = vector.extract_strided_slice %525 {offsets = [0, 0], sizes = [16, 128], strides = [1, 1]} : vector<16x512xf32> to vector<16x128xf32>
    %527 = arith.negf %526 : vector<16x128xf32>
    %528 = math.exp %527 : vector<16x128xf32>
    %cst_241 = arith.constant 1.000000e+00 : f32
    %529 = vector.broadcast %cst_241 : f32 to vector<16x128xf32>
    %530 = arith.addf %529, %528 : vector<16x128xf32>
    %531 = arith.divf %529, %530 : vector<16x128xf32>
    %532 = vector.extract_strided_slice %525 {offsets = [0, 128], sizes = [16, 128], strides = [1, 1]} : vector<16x512xf32> to vector<16x128xf32>
    %533 = arith.negf %532 : vector<16x128xf32>
    %534 = math.exp %533 : vector<16x128xf32>
    %cst_242 = arith.constant 1.000000e+00 : f32
    %535 = vector.broadcast %cst_242 : f32 to vector<16x128xf32>
    %536 = arith.addf %535, %534 : vector<16x128xf32>
    %537 = arith.divf %535, %536 : vector<16x128xf32>
    %538 = vector.extract_strided_slice %525 {offsets = [0, 256], sizes = [16, 128], strides = [1, 1]} : vector<16x512xf32> to vector<16x128xf32>
    %539 = math.tanh %538 : vector<16x128xf32>
    %540 = vector.extract_strided_slice %525 {offsets = [0, 384], sizes = [16, 128], strides = [1, 1]} : vector<16x512xf32> to vector<16x128xf32>
    %541 = arith.negf %540 : vector<16x128xf32>
    %542 = math.exp %541 : vector<16x128xf32>
    %cst_243 = arith.constant 1.000000e+00 : f32
    %543 = vector.broadcast %cst_243 : f32 to vector<16x128xf32>
    %544 = arith.addf %543, %542 : vector<16x128xf32>
    %545 = arith.divf %543, %544 : vector<16x128xf32>
    %546 = arith.mulf %537, %516 : vector<16x128xf32>
    %547 = arith.mulf %531, %539 : vector<16x128xf32>
    %548 = arith.addf %546, %547 : vector<16x128xf32>
    %549 = math.tanh %548 : vector<16x128xf32>
    %550 = arith.mulf %545, %549 : vector<16x128xf32>
    %c1_244 = arith.constant 1 : index
    %c0_245 = arith.constant 0 : index
    %c0_246 = arith.constant 0 : index
    %551 = vector.load %arg9[%c1_244, %c0_245, %c0_246] : memref<2x16x128xf32, #tpu.memory_space<vmem>>, vector<1x16x128xf32>
    %552 = vector.shape_cast %551 : vector<1x16x128xf32> to vector<16x128xf32>
    %c1_247 = arith.constant 1 : index
    %c0_248 = arith.constant 0 : index
    %c0_249 = arith.constant 0 : index
    %553 = vector.load %arg10[%c1_247, %c0_248, %c0_249] : memref<2x16x128xf32, #tpu.memory_space<vmem>>, vector<1x16x128xf32>
    %554 = vector.shape_cast %553 : vector<1x16x128xf32> to vector<16x128xf32>
    %555 = arith.truncf %552 : vector<16x128xf32> to vector<16x128xbf16>
    %cst_250 = arith.constant dense<0.000000e+00> : vector<16x512xf32>
    %556 = tpu.matmul %555, %6, %cst_250 {dimension_numbers = #tpu.dot_dimension_numbers<[1], [0], [0], [1], [0, 0, 1, 1], [], []>} : vector<16x128xbf16>, vector<128x512xbf16>, vector<16x512xf32> -> vector<16x512xf32>
    %557 = vector.broadcast %10 : vector<1x512xf32> to vector<16x512xf32>
    %558 = arith.addf %556, %557 : vector<16x512xf32>
    %c7_i32_251 = arith.constant 7 : i32
    %559 = arith.subi %c7_i32_251, %512 : i32
    %560 = arith.index_cast %559 : i32 to index
    %c0_252 = arith.constant 0 : index
    %c0_253 = arith.constant 0 : index
    %561 = vector.load %arg2[%560, %c0_252, %c0_253] : memref<8x16x512xbf16, #tpu.memory_space<vmem>>, vector<1x16x512xbf16>
    %562 = vector.shape_cast %561 : vector<1x16x512xbf16> to vector<16x512xbf16>
    %563 = arith.extf %562 : vector<16x512xbf16> to vector<16x512xf32>
    %564 = arith.addf %558, %563 : vector<16x512xf32>
    %565 = vector.extract_strided_slice %564 {offsets = [0, 0], sizes = [16, 128], strides = [1, 1]} : vector<16x512xf32> to vector<16x128xf32>
    %566 = arith.negf %565 : vector<16x128xf32>
    %567 = math.exp %566 : vector<16x128xf32>
    %cst_254 = arith.constant 1.000000e+00 : f32
    %568 = vector.broadcast %cst_254 : f32 to vector<16x128xf32>
    %569 = arith.addf %568, %567 : vector<16x128xf32>
    %570 = arith.divf %568, %569 : vector<16x128xf32>
    %571 = vector.extract_strided_slice %564 {offsets = [0, 128], sizes = [16, 128], strides = [1, 1]} : vector<16x512xf32> to vector<16x128xf32>
    %572 = arith.negf %571 : vector<16x128xf32>
    %573 = math.exp %572 : vector<16x128xf32>
    %cst_255 = arith.constant 1.000000e+00 : f32
    %574 = vector.broadcast %cst_255 : f32 to vector<16x128xf32>
    %575 = arith.addf %574, %573 : vector<16x128xf32>
    %576 = arith.divf %574, %575 : vector<16x128xf32>
    %577 = vector.extract_strided_slice %564 {offsets = [0, 256], sizes = [16, 128], strides = [1, 1]} : vector<16x512xf32> to vector<16x128xf32>
    %578 = math.tanh %577 : vector<16x128xf32>
    %579 = vector.extract_strided_slice %564 {offsets = [0, 384], sizes = [16, 128], strides = [1, 1]} : vector<16x512xf32> to vector<16x128xf32>
    %580 = arith.negf %579 : vector<16x128xf32>
    %581 = math.exp %580 : vector<16x128xf32>
    %cst_256 = arith.constant 1.000000e+00 : f32
    %582 = vector.broadcast %cst_256 : f32 to vector<16x128xf32>
    %583 = arith.addf %582, %581 : vector<16x128xf32>
    %584 = arith.divf %582, %583 : vector<16x128xf32>
    %585 = arith.mulf %576, %554 : vector<16x128xf32>
    %586 = arith.mulf %570, %578 : vector<16x128xf32>
    %587 = arith.addf %585, %586 : vector<16x128xf32>
    %588 = math.tanh %587 : vector<16x128xf32>
    %589 = arith.mulf %584, %588 : vector<16x128xf32>
    %c0_257 = arith.constant 0 : index
    %c0_258 = arith.constant 0 : index
    %c0_259 = arith.constant 0 : index
    %590 = vector.load %arg9[%c0_257, %c0_258, %c0_259] : memref<2x16x128xf32, #tpu.memory_space<vmem>>, vector<1x16x128xf32>
    %591 = vector.shape_cast %590 : vector<1x16x128xf32> to vector<16x128xf32>
    %592 = vector.shape_cast %550 : vector<16x128xf32> to vector<1x16x128xf32>
    tpu.vector_store %arg9[%c0_257, %c0_258, %c0_259], %592 {strides = array<i32>} : memref<2x16x128xf32, #tpu.memory_space<vmem>>, vector<1x16x128xf32>,
    %c0_260 = arith.constant 0 : index
    %c0_261 = arith.constant 0 : index
    %c0_262 = arith.constant 0 : index
    %593 = vector.load %arg10[%c0_260, %c0_261, %c0_262] : memref<2x16x128xf32, #tpu.memory_space<vmem>>, vector<1x16x128xf32>
    %594 = vector.shape_cast %593 : vector<1x16x128xf32> to vector<16x128xf32>
    %595 = vector.shape_cast %548 : vector<16x128xf32> to vector<1x16x128xf32>
    tpu.vector_store %arg10[%c0_260, %c0_261, %c0_262], %595 {strides = array<i32>} : memref<2x16x128xf32, #tpu.memory_space<vmem>>, vector<1x16x128xf32>,
    %c1_263 = arith.constant 1 : index
    %c0_264 = arith.constant 0 : index
    %c0_265 = arith.constant 0 : index
    %596 = vector.load %arg9[%c1_263, %c0_264, %c0_265] : memref<2x16x128xf32, #tpu.memory_space<vmem>>, vector<1x16x128xf32>
    %597 = vector.shape_cast %596 : vector<1x16x128xf32> to vector<16x128xf32>
    %598 = vector.shape_cast %589 : vector<16x128xf32> to vector<1x16x128xf32>
    tpu.vector_store %arg9[%c1_263, %c0_264, %c0_265], %598 {strides = array<i32>} : memref<2x16x128xf32, #tpu.memory_space<vmem>>, vector<1x16x128xf32>,
    %c1_266 = arith.constant 1 : index
    %c0_267 = arith.constant 0 : index
    %c0_268 = arith.constant 0 : index
    %599 = vector.load %arg10[%c1_266, %c0_267, %c0_268] : memref<2x16x128xf32, #tpu.memory_space<vmem>>, vector<1x16x128xf32>
    %600 = vector.shape_cast %599 : vector<1x16x128xf32> to vector<16x128xf32>
    %601 = vector.shape_cast %587 : vector<16x128xf32> to vector<1x16x128xf32>
    tpu.vector_store %arg10[%c1_266, %c0_267, %c0_268], %601 {strides = array<i32>} : memref<2x16x128xf32, #tpu.memory_space<vmem>>, vector<1x16x128xf32>,
    %602 = arith.index_cast %512 : i32 to index
    %c0_269 = arith.constant 0 : index
    %c0_270 = arith.constant 0 : index
    %603 = vector.load %arg5[%602, %c0_269, %c0_270] : memref<8x16x128xf32, #tpu.memory_space<vmem>>, vector<1x16x128xf32>
    %604 = vector.shape_cast %603 : vector<1x16x128xf32> to vector<16x128xf32>
    %605 = vector.shape_cast %550 : vector<16x128xf32> to vector<1x16x128xf32>
    tpu.vector_store %arg5[%602, %c0_269, %c0_270], %605 {strides = array<i32>} : memref<8x16x128xf32, #tpu.memory_space<vmem>>, vector<1x16x128xf32>,
    %c7_i32_271 = arith.constant 7 : i32
    %606 = arith.subi %c7_i32_271, %512 : i32
    %607 = arith.index_cast %606 : i32 to index
    %c0_272 = arith.constant 0 : index
    %c0_273 = arith.constant 0 : index
    %608 = vector.load %arg6[%607, %c0_272, %c0_273] : memref<8x16x128xf32, #tpu.memory_space<vmem>>, vector<1x16x128xf32>
    %609 = vector.shape_cast %608 : vector<1x16x128xf32> to vector<16x128xf32>
    %610 = vector.shape_cast %589 : vector<16x128xf32> to vector<1x16x128xf32>
    tpu.vector_store %arg6[%607, %c0_272, %c0_273], %610 {strides = array<i32>} : memref<8x16x128xf32, #tpu.memory_space<vmem>>, vector<1x16x128xf32>,
    %c6_i32 = arith.constant 6 : i32
    %c1_i32_274 = arith.constant 1 : i32
    %611 = arith.muli %c6_i32, %c1_i32_274 : i32
    %c0_i32_275 = arith.constant 0 : i32
    %612 = arith.addi %c0_i32_275, %611 : i32
    %c0_276 = arith.constant 0 : index
    %c0_277 = arith.constant 0 : index
    %c0_278 = arith.constant 0 : index
    %613 = vector.load %arg9[%c0_276, %c0_277, %c0_278] : memref<2x16x128xf32, #tpu.memory_space<vmem>>, vector<1x16x128xf32>
    %614 = vector.shape_cast %613 : vector<1x16x128xf32> to vector<16x128xf32>
    %c0_279 = arith.constant 0 : index
    %c0_280 = arith.constant 0 : index
    %c0_281 = arith.constant 0 : index
    %615 = vector.load %arg10[%c0_279, %c0_280, %c0_281] : memref<2x16x128xf32, #tpu.memory_space<vmem>>, vector<1x16x128xf32>
    %616 = vector.shape_cast %615 : vector<1x16x128xf32> to vector<16x128xf32>
    %617 = arith.truncf %614 : vector<16x128xf32> to vector<16x128xbf16>
    %cst_282 = arith.constant dense<0.000000e+00> : vector<16x512xf32>
    %618 = tpu.matmul %617, %4, %cst_282 {dimension_numbers = #tpu.dot_dimension_numbers<[1], [0], [0], [1], [0, 0, 1, 1], [], []>} : vector<16x128xbf16>, vector<128x512xbf16>, vector<16x512xf32> -> vector<16x512xf32>
    %619 = vector.broadcast %8 : vector<1x512xf32> to vector<16x512xf32>
    %620 = arith.addf %618, %619 : vector<16x512xf32>
    %621 = arith.index_cast %612 : i32 to index
    %c0_283 = arith.constant 0 : index
    %c0_284 = arith.constant 0 : index
    %622 = vector.load %arg1[%621, %c0_283, %c0_284] : memref<8x16x512xbf16, #tpu.memory_space<vmem>>, vector<1x16x512xbf16>
    %623 = vector.shape_cast %622 : vector<1x16x512xbf16> to vector<16x512xbf16>
    %624 = arith.extf %623 : vector<16x512xbf16> to vector<16x512xf32>
    %625 = arith.addf %620, %624 : vector<16x512xf32>
    %626 = vector.extract_strided_slice %625 {offsets = [0, 0], sizes = [16, 128], strides = [1, 1]} : vector<16x512xf32> to vector<16x128xf32>
    %627 = arith.negf %626 : vector<16x128xf32>
    %628 = math.exp %627 : vector<16x128xf32>
    %cst_285 = arith.constant 1.000000e+00 : f32
    %629 = vector.broadcast %cst_285 : f32 to vector<16x128xf32>
    %630 = arith.addf %629, %628 : vector<16x128xf32>
    %631 = arith.divf %629, %630 : vector<16x128xf32>
    %632 = vector.extract_strided_slice %625 {offsets = [0, 128], sizes = [16, 128], strides = [1, 1]} : vector<16x512xf32> to vector<16x128xf32>
    %633 = arith.negf %632 : vector<16x128xf32>
    %634 = math.exp %633 : vector<16x128xf32>
    %cst_286 = arith.constant 1.000000e+00 : f32
    %635 = vector.broadcast %cst_286 : f32 to vector<16x128xf32>
    %636 = arith.addf %635, %634 : vector<16x128xf32>
    %637 = arith.divf %635, %636 : vector<16x128xf32>
    %638 = vector.extract_strided_slice %625 {offsets = [0, 256], sizes = [16, 128], strides = [1, 1]} : vector<16x512xf32> to vector<16x128xf32>
    %639 = math.tanh %638 : vector<16x128xf32>
    %640 = vector.extract_strided_slice %625 {offsets = [0, 384], sizes = [16, 128], strides = [1, 1]} : vector<16x512xf32> to vector<16x128xf32>
    %641 = arith.negf %640 : vector<16x128xf32>
    %642 = math.exp %641 : vector<16x128xf32>
    %cst_287 = arith.constant 1.000000e+00 : f32
    %643 = vector.broadcast %cst_287 : f32 to vector<16x128xf32>
    %644 = arith.addf %643, %642 : vector<16x128xf32>
    %645 = arith.divf %643, %644 : vector<16x128xf32>
    %646 = arith.mulf %637, %616 : vector<16x128xf32>
    %647 = arith.mulf %631, %639 : vector<16x128xf32>
    %648 = arith.addf %646, %647 : vector<16x128xf32>
    %649 = math.tanh %648 : vector<16x128xf32>
    %650 = arith.mulf %645, %649 : vector<16x128xf32>
    %c1_288 = arith.constant 1 : index
    %c0_289 = arith.constant 0 : index
    %c0_290 = arith.constant 0 : index
    %651 = vector.load %arg9[%c1_288, %c0_289, %c0_290] : memref<2x16x128xf32, #tpu.memory_space<vmem>>, vector<1x16x128xf32>
    %652 = vector.shape_cast %651 : vector<1x16x128xf32> to vector<16x128xf32>
    %c1_291 = arith.constant 1 : index
    %c0_292 = arith.constant 0 : index
    %c0_293 = arith.constant 0 : index
    %653 = vector.load %arg10[%c1_291, %c0_292, %c0_293] : memref<2x16x128xf32, #tpu.memory_space<vmem>>, vector<1x16x128xf32>
    %654 = vector.shape_cast %653 : vector<1x16x128xf32> to vector<16x128xf32>
    %655 = arith.truncf %652 : vector<16x128xf32> to vector<16x128xbf16>
    %cst_294 = arith.constant dense<0.000000e+00> : vector<16x512xf32>
    %656 = tpu.matmul %655, %6, %cst_294 {dimension_numbers = #tpu.dot_dimension_numbers<[1], [0], [0], [1], [0, 0, 1, 1], [], []>} : vector<16x128xbf16>, vector<128x512xbf16>, vector<16x512xf32> -> vector<16x512xf32>
    %657 = vector.broadcast %10 : vector<1x512xf32> to vector<16x512xf32>
    %658 = arith.addf %656, %657 : vector<16x512xf32>
    %c7_i32_295 = arith.constant 7 : i32
    %659 = arith.subi %c7_i32_295, %612 : i32
    %660 = arith.index_cast %659 : i32 to index
    %c0_296 = arith.constant 0 : index
    %c0_297 = arith.constant 0 : index
    %661 = vector.load %arg2[%660, %c0_296, %c0_297] : memref<8x16x512xbf16, #tpu.memory_space<vmem>>, vector<1x16x512xbf16>
    %662 = vector.shape_cast %661 : vector<1x16x512xbf16> to vector<16x512xbf16>
    %663 = arith.extf %662 : vector<16x512xbf16> to vector<16x512xf32>
    %664 = arith.addf %658, %663 : vector<16x512xf32>
    %665 = vector.extract_strided_slice %664 {offsets = [0, 0], sizes = [16, 128], strides = [1, 1]} : vector<16x512xf32> to vector<16x128xf32>
    %666 = arith.negf %665 : vector<16x128xf32>
    %667 = math.exp %666 : vector<16x128xf32>
    %cst_298 = arith.constant 1.000000e+00 : f32
    %668 = vector.broadcast %cst_298 : f32 to vector<16x128xf32>
    %669 = arith.addf %668, %667 : vector<16x128xf32>
    %670 = arith.divf %668, %669 : vector<16x128xf32>
    %671 = vector.extract_strided_slice %664 {offsets = [0, 128], sizes = [16, 128], strides = [1, 1]} : vector<16x512xf32> to vector<16x128xf32>
    %672 = arith.negf %671 : vector<16x128xf32>
    %673 = math.exp %672 : vector<16x128xf32>
    %cst_299 = arith.constant 1.000000e+00 : f32
    %674 = vector.broadcast %cst_299 : f32 to vector<16x128xf32>
    %675 = arith.addf %674, %673 : vector<16x128xf32>
    %676 = arith.divf %674, %675 : vector<16x128xf32>
    %677 = vector.extract_strided_slice %664 {offsets = [0, 256], sizes = [16, 128], strides = [1, 1]} : vector<16x512xf32> to vector<16x128xf32>
    %678 = math.tanh %677 : vector<16x128xf32>
    %679 = vector.extract_strided_slice %664 {offsets = [0, 384], sizes = [16, 128], strides = [1, 1]} : vector<16x512xf32> to vector<16x128xf32>
    %680 = arith.negf %679 : vector<16x128xf32>
    %681 = math.exp %680 : vector<16x128xf32>
    %cst_300 = arith.constant 1.000000e+00 : f32
    %682 = vector.broadcast %cst_300 : f32 to vector<16x128xf32>
    %683 = arith.addf %682, %681 : vector<16x128xf32>
    %684 = arith.divf %682, %683 : vector<16x128xf32>
    %685 = arith.mulf %676, %654 : vector<16x128xf32>
    %686 = arith.mulf %670, %678 : vector<16x128xf32>
    %687 = arith.addf %685, %686 : vector<16x128xf32>
    %688 = math.tanh %687 : vector<16x128xf32>
    %689 = arith.mulf %684, %688 : vector<16x128xf32>
    %c0_301 = arith.constant 0 : index
    %c0_302 = arith.constant 0 : index
    %c0_303 = arith.constant 0 : index
    %690 = vector.load %arg9[%c0_301, %c0_302, %c0_303] : memref<2x16x128xf32, #tpu.memory_space<vmem>>, vector<1x16x128xf32>
    %691 = vector.shape_cast %690 : vector<1x16x128xf32> to vector<16x128xf32>
    %692 = vector.shape_cast %650 : vector<16x128xf32> to vector<1x16x128xf32>
    tpu.vector_store %arg9[%c0_301, %c0_302, %c0_303], %692 {strides = array<i32>} : memref<2x16x128xf32, #tpu.memory_space<vmem>>, vector<1x16x128xf32>,
    %c0_304 = arith.constant 0 : index
    %c0_305 = arith.constant 0 : index
    %c0_306 = arith.constant 0 : index
    %693 = vector.load %arg10[%c0_304, %c0_305, %c0_306] : memref<2x16x128xf32, #tpu.memory_space<vmem>>, vector<1x16x128xf32>
    %694 = vector.shape_cast %693 : vector<1x16x128xf32> to vector<16x128xf32>
    %695 = vector.shape_cast %648 : vector<16x128xf32> to vector<1x16x128xf32>
    tpu.vector_store %arg10[%c0_304, %c0_305, %c0_306], %695 {strides = array<i32>} : memref<2x16x128xf32, #tpu.memory_space<vmem>>, vector<1x16x128xf32>,
    %c1_307 = arith.constant 1 : index
    %c0_308 = arith.constant 0 : index
    %c0_309 = arith.constant 0 : index
    %696 = vector.load %arg9[%c1_307, %c0_308, %c0_309] : memref<2x16x128xf32, #tpu.memory_space<vmem>>, vector<1x16x128xf32>
    %697 = vector.shape_cast %696 : vector<1x16x128xf32> to vector<16x128xf32>
    %698 = vector.shape_cast %689 : vector<16x128xf32> to vector<1x16x128xf32>
    tpu.vector_store %arg9[%c1_307, %c0_308, %c0_309], %698 {strides = array<i32>} : memref<2x16x128xf32, #tpu.memory_space<vmem>>, vector<1x16x128xf32>,
    %c1_310 = arith.constant 1 : index
    %c0_311 = arith.constant 0 : index
    %c0_312 = arith.constant 0 : index
    %699 = vector.load %arg10[%c1_310, %c0_311, %c0_312] : memref<2x16x128xf32, #tpu.memory_space<vmem>>, vector<1x16x128xf32>
    %700 = vector.shape_cast %699 : vector<1x16x128xf32> to vector<16x128xf32>
    %701 = vector.shape_cast %687 : vector<16x128xf32> to vector<1x16x128xf32>
    tpu.vector_store %arg10[%c1_310, %c0_311, %c0_312], %701 {strides = array<i32>} : memref<2x16x128xf32, #tpu.memory_space<vmem>>, vector<1x16x128xf32>,
    %702 = arith.index_cast %612 : i32 to index
    %c0_313 = arith.constant 0 : index
    %c0_314 = arith.constant 0 : index
    %703 = vector.load %arg5[%702, %c0_313, %c0_314] : memref<8x16x128xf32, #tpu.memory_space<vmem>>, vector<1x16x128xf32>
    %704 = vector.shape_cast %703 : vector<1x16x128xf32> to vector<16x128xf32>
    %705 = vector.shape_cast %650 : vector<16x128xf32> to vector<1x16x128xf32>
    tpu.vector_store %arg5[%702, %c0_313, %c0_314], %705 {strides = array<i32>} : memref<8x16x128xf32, #tpu.memory_space<vmem>>, vector<1x16x128xf32>,
    %c7_i32_315 = arith.constant 7 : i32
    %706 = arith.subi %c7_i32_315, %612 : i32
    %707 = arith.index_cast %706 : i32 to index
    %c0_316 = arith.constant 0 : index
    %c0_317 = arith.constant 0 : index
    %708 = vector.load %arg6[%707, %c0_316, %c0_317] : memref<8x16x128xf32, #tpu.memory_space<vmem>>, vector<1x16x128xf32>
    %709 = vector.shape_cast %708 : vector<1x16x128xf32> to vector<16x128xf32>
    %710 = vector.shape_cast %689 : vector<16x128xf32> to vector<1x16x128xf32>
    tpu.vector_store %arg6[%707, %c0_316, %c0_317], %710 {strides = array<i32>} : memref<8x16x128xf32, #tpu.memory_space<vmem>>, vector<1x16x128xf32>,
    %c7_i32_318 = arith.constant 7 : i32
    %c1_i32_319 = arith.constant 1 : i32
    %711 = arith.muli %c7_i32_318, %c1_i32_319 : i32
    %c0_i32_320 = arith.constant 0 : i32
    %712 = arith.addi %c0_i32_320, %711 : i32
    %c0_321 = arith.constant 0 : index
    %c0_322 = arith.constant 0 : index
    %c0_323 = arith.constant 0 : index
    %713 = vector.load %arg9[%c0_321, %c0_322, %c0_323] : memref<2x16x128xf32, #tpu.memory_space<vmem>>, vector<1x16x128xf32>
    %714 = vector.shape_cast %713 : vector<1x16x128xf32> to vector<16x128xf32>
    %c0_324 = arith.constant 0 : index
    %c0_325 = arith.constant 0 : index
    %c0_326 = arith.constant 0 : index
    %715 = vector.load %arg10[%c0_324, %c0_325, %c0_326] : memref<2x16x128xf32, #tpu.memory_space<vmem>>, vector<1x16x128xf32>
    %716 = vector.shape_cast %715 : vector<1x16x128xf32> to vector<16x128xf32>
    %717 = arith.truncf %714 : vector<16x128xf32> to vector<16x128xbf16>
    %cst_327 = arith.constant dense<0.000000e+00> : vector<16x512xf32>
    %718 = tpu.matmul %717, %4, %cst_327 {dimension_numbers = #tpu.dot_dimension_numbers<[1], [0], [0], [1], [0, 0, 1, 1], [], []>} : vector<16x128xbf16>, vector<128x512xbf16>, vector<16x512xf32> -> vector<16x512xf32>
    %719 = vector.broadcast %8 : vector<1x512xf32> to vector<16x512xf32>
    %720 = arith.addf %718, %719 : vector<16x512xf32>
    %721 = arith.index_cast %712 : i32 to index
    %c0_328 = arith.constant 0 : index
    %c0_329 = arith.constant 0 : index
    %722 = vector.load %arg1[%721, %c0_328, %c0_329] : memref<8x16x512xbf16, #tpu.memory_space<vmem>>, vector<1x16x512xbf16>
    %723 = vector.shape_cast %722 : vector<1x16x512xbf16> to vector<16x512xbf16>
    %724 = arith.extf %723 : vector<16x512xbf16> to vector<16x512xf32>
    %725 = arith.addf %720, %724 : vector<16x512xf32>
    %726 = vector.extract_strided_slice %725 {offsets = [0, 0], sizes = [16, 128], strides = [1, 1]} : vector<16x512xf32> to vector<16x128xf32>
    %727 = arith.negf %726 : vector<16x128xf32>
    %728 = math.exp %727 : vector<16x128xf32>
    %cst_330 = arith.constant 1.000000e+00 : f32
    %729 = vector.broadcast %cst_330 : f32 to vector<16x128xf32>
    %730 = arith.addf %729, %728 : vector<16x128xf32>
    %731 = arith.divf %729, %730 : vector<16x128xf32>
    %732 = vector.extract_strided_slice %725 {offsets = [0, 128], sizes = [16, 128], strides = [1, 1]} : vector<16x512xf32> to vector<16x128xf32>
    %733 = arith.negf %732 : vector<16x128xf32>
    %734 = math.exp %733 : vector<16x128xf32>
    %cst_331 = arith.constant 1.000000e+00 : f32
    %735 = vector.broadcast %cst_331 : f32 to vector<16x128xf32>
    %736 = arith.addf %735, %734 : vector<16x128xf32>
    %737 = arith.divf %735, %736 : vector<16x128xf32>
    %738 = vector.extract_strided_slice %725 {offsets = [0, 256], sizes = [16, 128], strides = [1, 1]} : vector<16x512xf32> to vector<16x128xf32>
    %739 = math.tanh %738 : vector<16x128xf32>
    %740 = vector.extract_strided_slice %725 {offsets = [0, 384], sizes = [16, 128], strides = [1, 1]} : vector<16x512xf32> to vector<16x128xf32>
    %741 = arith.negf %740 : vector<16x128xf32>
    %742 = math.exp %741 : vector<16x128xf32>
    %cst_332 = arith.constant 1.000000e+00 : f32
    %743 = vector.broadcast %cst_332 : f32 to vector<16x128xf32>
    %744 = arith.addf %743, %742 : vector<16x128xf32>
    %745 = arith.divf %743, %744 : vector<16x128xf32>
    %746 = arith.mulf %737, %716 : vector<16x128xf32>
    %747 = arith.mulf %731, %739 : vector<16x128xf32>
    %748 = arith.addf %746, %747 : vector<16x128xf32>
    %749 = math.tanh %748 : vector<16x128xf32>
    %750 = arith.mulf %745, %749 : vector<16x128xf32>
    %c1_333 = arith.constant 1 : index
    %c0_334 = arith.constant 0 : index
    %c0_335 = arith.constant 0 : index
    %751 = vector.load %arg9[%c1_333, %c0_334, %c0_335] : memref<2x16x128xf32, #tpu.memory_space<vmem>>, vector<1x16x128xf32>
    %752 = vector.shape_cast %751 : vector<1x16x128xf32> to vector<16x128xf32>
    %c1_336 = arith.constant 1 : index
    %c0_337 = arith.constant 0 : index
    %c0_338 = arith.constant 0 : index
    %753 = vector.load %arg10[%c1_336, %c0_337, %c0_338] : memref<2x16x128xf32, #tpu.memory_space<vmem>>, vector<1x16x128xf32>
    %754 = vector.shape_cast %753 : vector<1x16x128xf32> to vector<16x128xf32>
    %755 = arith.truncf %752 : vector<16x128xf32> to vector<16x128xbf16>
    %cst_339 = arith.constant dense<0.000000e+00> : vector<16x512xf32>
    %756 = tpu.matmul %755, %6, %cst_339 {dimension_numbers = #tpu.dot_dimension_numbers<[1], [0], [0], [1], [0, 0, 1, 1], [], []>} : vector<16x128xbf16>, vector<128x512xbf16>, vector<16x512xf32> -> vector<16x512xf32>
    %757 = vector.broadcast %10 : vector<1x512xf32> to vector<16x512xf32>
    %758 = arith.addf %756, %757 : vector<16x512xf32>
    %c7_i32_340 = arith.constant 7 : i32
    %759 = arith.subi %c7_i32_340, %712 : i32
    %760 = arith.index_cast %759 : i32 to index
    %c0_341 = arith.constant 0 : index
    %c0_342 = arith.constant 0 : index
    %761 = vector.load %arg2[%760, %c0_341, %c0_342] : memref<8x16x512xbf16, #tpu.memory_space<vmem>>, vector<1x16x512xbf16>
    %762 = vector.shape_cast %761 : vector<1x16x512xbf16> to vector<16x512xbf16>
    %763 = arith.extf %762 : vector<16x512xbf16> to vector<16x512xf32>
    %764 = arith.addf %758, %763 : vector<16x512xf32>
    %765 = vector.extract_strided_slice %764 {offsets = [0, 0], sizes = [16, 128], strides = [1, 1]} : vector<16x512xf32> to vector<16x128xf32>
    %766 = arith.negf %765 : vector<16x128xf32>
    %767 = math.exp %766 : vector<16x128xf32>
    %cst_343 = arith.constant 1.000000e+00 : f32
    %768 = vector.broadcast %cst_343 : f32 to vector<16x128xf32>
    %769 = arith.addf %768, %767 : vector<16x128xf32>
    %770 = arith.divf %768, %769 : vector<16x128xf32>
    %771 = vector.extract_strided_slice %764 {offsets = [0, 128], sizes = [16, 128], strides = [1, 1]} : vector<16x512xf32> to vector<16x128xf32>
    %772 = arith.negf %771 : vector<16x128xf32>
    %773 = math.exp %772 : vector<16x128xf32>
    %cst_344 = arith.constant 1.000000e+00 : f32
    %774 = vector.broadcast %cst_344 : f32 to vector<16x128xf32>
    %775 = arith.addf %774, %773 : vector<16x128xf32>
    %776 = arith.divf %774, %775 : vector<16x128xf32>
    %777 = vector.extract_strided_slice %764 {offsets = [0, 256], sizes = [16, 128], strides = [1, 1]} : vector<16x512xf32> to vector<16x128xf32>
    %778 = math.tanh %777 : vector<16x128xf32>
    %779 = vector.extract_strided_slice %764 {offsets = [0, 384], sizes = [16, 128], strides = [1, 1]} : vector<16x512xf32> to vector<16x128xf32>
    %780 = arith.negf %779 : vector<16x128xf32>
    %781 = math.exp %780 : vector<16x128xf32>
    %cst_345 = arith.constant 1.000000e+00 : f32
    %782 = vector.broadcast %cst_345 : f32 to vector<16x128xf32>
    %783 = arith.addf %782, %781 : vector<16x128xf32>
    %784 = arith.divf %782, %783 : vector<16x128xf32>
    %785 = arith.mulf %776, %754 : vector<16x128xf32>
    %786 = arith.mulf %770, %778 : vector<16x128xf32>
    %787 = arith.addf %785, %786 : vector<16x128xf32>
    %788 = math.tanh %787 : vector<16x128xf32>
    %789 = arith.mulf %784, %788 : vector<16x128xf32>
    %c0_346 = arith.constant 0 : index
    %c0_347 = arith.constant 0 : index
    %c0_348 = arith.constant 0 : index
    %790 = vector.load %arg9[%c0_346, %c0_347, %c0_348] : memref<2x16x128xf32, #tpu.memory_space<vmem>>, vector<1x16x128xf32>
    %791 = vector.shape_cast %790 : vector<1x16x128xf32> to vector<16x128xf32>
    %792 = vector.shape_cast %750 : vector<16x128xf32> to vector<1x16x128xf32>
    tpu.vector_store %arg9[%c0_346, %c0_347, %c0_348], %792 {strides = array<i32>} : memref<2x16x128xf32, #tpu.memory_space<vmem>>, vector<1x16x128xf32>,
    %c0_349 = arith.constant 0 : index
    %c0_350 = arith.constant 0 : index
    %c0_351 = arith.constant 0 : index
    %793 = vector.load %arg10[%c0_349, %c0_350, %c0_351] : memref<2x16x128xf32, #tpu.memory_space<vmem>>, vector<1x16x128xf32>
    %794 = vector.shape_cast %793 : vector<1x16x128xf32> to vector<16x128xf32>
    %795 = vector.shape_cast %748 : vector<16x128xf32> to vector<1x16x128xf32>
    tpu.vector_store %arg10[%c0_349, %c0_350, %c0_351], %795 {strides = array<i32>} : memref<2x16x128xf32, #tpu.memory_space<vmem>>, vector<1x16x128xf32>,
    %c1_352 = arith.constant 1 : index
    %c0_353 = arith.constant 0 : index
    %c0_354 = arith.constant 0 : index
    %796 = vector.load %arg9[%c1_352, %c0_353, %c0_354] : memref<2x16x128xf32, #tpu.memory_space<vmem>>, vector<1x16x128xf32>
    %797 = vector.shape_cast %796 : vector<1x16x128xf32> to vector<16x128xf32>
    %798 = vector.shape_cast %789 : vector<16x128xf32> to vector<1x16x128xf32>
    tpu.vector_store %arg9[%c1_352, %c0_353, %c0_354], %798 {strides = array<i32>} : memref<2x16x128xf32, #tpu.memory_space<vmem>>, vector<1x16x128xf32>,
    %c1_355 = arith.constant 1 : index
    %c0_356 = arith.constant 0 : index
    %c0_357 = arith.constant 0 : index
    %799 = vector.load %arg10[%c1_355, %c0_356, %c0_357] : memref<2x16x128xf32, #tpu.memory_space<vmem>>, vector<1x16x128xf32>
    %800 = vector.shape_cast %799 : vector<1x16x128xf32> to vector<16x128xf32>
    %801 = vector.shape_cast %787 : vector<16x128xf32> to vector<1x16x128xf32>
    tpu.vector_store %arg10[%c1_355, %c0_356, %c0_357], %801 {strides = array<i32>} : memref<2x16x128xf32, #tpu.memory_space<vmem>>, vector<1x16x128xf32>,
    %802 = arith.index_cast %712 : i32 to index
    %c0_358 = arith.constant 0 : index
    %c0_359 = arith.constant 0 : index
    %803 = vector.load %arg5[%802, %c0_358, %c0_359] : memref<8x16x128xf32, #tpu.memory_space<vmem>>, vector<1x16x128xf32>
    %804 = vector.shape_cast %803 : vector<1x16x128xf32> to vector<16x128xf32>
    %805 = vector.shape_cast %750 : vector<16x128xf32> to vector<1x16x128xf32>
    tpu.vector_store %arg5[%802, %c0_358, %c0_359], %805 {strides = array<i32>} : memref<8x16x128xf32, #tpu.memory_space<vmem>>, vector<1x16x128xf32>,
    %c7_i32_360 = arith.constant 7 : i32
    %806 = arith.subi %c7_i32_360, %712 : i32
    %807 = arith.index_cast %806 : i32 to index
    %c0_361 = arith.constant 0 : index
    %c0_362 = arith.constant 0 : index
    %808 = vector.load %arg6[%807, %c0_361, %c0_362] : memref<8x16x128xf32, #tpu.memory_space<vmem>>, vector<1x16x128xf32>
    %809 = vector.shape_cast %808 : vector<1x16x128xf32> to vector<16x128xf32>
    %810 = vector.shape_cast %789 : vector<16x128xf32> to vector<1x16x128xf32>
    tpu.vector_store %arg6[%807, %c0_361, %c0_362], %810 {strides = array<i32>} : memref<8x16x128xf32, #tpu.memory_space<vmem>>, vector<1x16x128xf32>,
    %c8_i32 = arith.constant 8 : i32
    %c0_363 = arith.constant 0 : index
    %c0_364 = arith.constant 0 : index
    %c0_365 = arith.constant 0 : index
    %811 = vector.load %arg9[%c0_363, %c0_364, %c0_365] : memref<2x16x128xf32, #tpu.memory_space<vmem>>, vector<2x16x128xf32>
    %c0_366 = arith.constant 0 : index
    %c0_367 = arith.constant 0 : index
    %c0_368 = arith.constant 0 : index
    %812 = vector.load %arg7[%c0_366, %c0_367, %c0_368] : memref<2x16x128xf32, #tpu.memory_space<vmem>>, vector<2x16x128xf32>
    tpu.vector_store %arg7[%c0_366, %c0_367, %c0_368], %811 {strides = array<i32>} : memref<2x16x128xf32, #tpu.memory_space<vmem>>, vector<2x16x128xf32>,
    %c0_369 = arith.constant 0 : index
    %c0_370 = arith.constant 0 : index
    %c0_371 = arith.constant 0 : index
    %813 = vector.load %arg10[%c0_369, %c0_370, %c0_371] : memref<2x16x128xf32, #tpu.memory_space<vmem>>, vector<2x16x128xf32>
    %c0_372 = arith.constant 0 : index
    %c0_373 = arith.constant 0 : index
    %c0_374 = arith.constant 0 : index
    %814 = vector.load %arg8[%c0_372, %c0_373, %c0_374] : memref<2x16x128xf32, #tpu.memory_space<vmem>>, vector<2x16x128xf32>
    tpu.vector_store %arg8[%c0_372, %c0_373, %c0_374], %813 {strides = array<i32>} : memref<2x16x128xf32, #tpu.memory_space<vmem>>, vector<2x16x128xf32>,
    return
  }
  func.func @transform_0(%arg0: i32) -> (i32, i32, i32) {
    %c0_i32 = arith.constant 0 : i32
    %c0_i32_0 = arith.constant 0 : i32
    %c0_i32_1 = arith.constant 0 : i32
    return %arg0, %c0_i32, %c0_i32_0 : i32, i32, i32
  }
  func.func @transform_1(%arg0: i32) -> (i32, i32, i32) {
    %c0_i32 = arith.constant 0 : i32
    %0 = arith.subi %c0_i32, %arg0 : i32
    %c0_i32_0 = arith.constant 0 : i32
    %c1_i32 = arith.constant 1 : i32
    %c0_i32_1 = arith.constant 0 : i32
    return %0, %c0_i32_0, %c1_i32 : i32, i32, i32
  }
  func.func @transform_2(%arg0: i32) -> (i32, i32, i32) {
    %c0_i32 = arith.constant 0 : i32
    %c0_i32_0 = arith.constant 0 : i32
    %c0_i32_1 = arith.constant 0 : i32
    %c0_i32_2 = arith.constant 0 : i32
    return %c0_i32, %c0_i32_0, %c0_i32_1 : i32, i32, i32
  }
  func.func @transform_3(%arg0: i32) -> (i32, i32, i32) {
    %c0_i32 = arith.constant 0 : i32
    %c0_i32_0 = arith.constant 0 : i32
    %c0_i32_1 = arith.constant 0 : i32
    %c0_i32_2 = arith.constant 0 : i32
    return %c0_i32, %c0_i32_0, %c0_i32_1 : i32, i32, i32
  }
  func.func @transform_4(%arg0: i32) -> (i32, i32, i32) {
    %c0_i32 = arith.constant 0 : i32
    %c0_i32_0 = arith.constant 0 : i32
    %c0_i32_1 = arith.constant 0 : i32
    return %arg0, %c0_i32, %c0_i32_0 : i32, i32, i32
  }
  func.func @transform_5(%arg0: i32) -> (i32, i32, i32) {
    %c0_i32 = arith.constant 0 : i32
    %0 = arith.subi %c0_i32, %arg0 : i32
    %c0_i32_0 = arith.constant 0 : i32
    %c0_i32_1 = arith.constant 0 : i32
    %c0_i32_2 = arith.constant 0 : i32
    return %0, %c0_i32_0, %c0_i32_1 : i32, i32, i32
  }
  func.func @transform_6(%arg0: i32) -> (i32, i32, i32) {
    %c0_i32 = arith.constant 0 : i32
    %c0_i32_0 = arith.constant 0 : i32
    %c0_i32_1 = arith.constant 0 : i32
    %c0_i32_2 = arith.constant 0 : i32
    return %c0_i32, %c0_i32_0, %c0_i32_1 : i32, i32, i32
  }
  func.func @transform_7(%arg0: i32) -> (i32, i32, i32) {
    %c0_i32 = arith.constant 0 : i32
    %c0_i32_0 = arith.constant 0 : i32
    %c0_i32_1 = arith.constant 0 : i32
    %c0_i32_2 = arith.constant 0 : i32
    return %c0_i32, %c0_i32_0, %c0_i32_1 : i32, i32, i32
  }
}

</mosaic_0001>

<bundles_post_ra>
// kernel: encoder_forward.1
= control target key start
LH: loop header
LB: loop body
LE: loop exit
PB: predicated region body
PF: predicated region fallthrough
CT: control target
= control target key end

     0   :  { %v6533_v2 = vmov 0   ;;  %v6535_v37 = vmov 0.0|0.0   ;;  %s6525_s0 = inlined_call_operand.vmem [shape: bf16[8,16,1024], index: 0, kind: input, shape index: {}, may-alias: {0,1}]   ;;  %s6526_s1 = inlined_call_operand.vmem [shape: bf16[8,16,1024], index: 1, kind: input, shape index: {}, may-alias: {0,1}]   ;;  %s6527_s2 = inlined_call_operand.vmem [shape: bf16[2,128,512], index: 2, kind: input, shape index: {}]   ;;  %s6528_s3 = inlined_call_operand.vmem [shape: f32[2,1,512], index: 3, kind: input, shape index: {}]   ;;  %s6529_s4 = inlined_call_operand.vmem [shape: f32[8,16,128], index: 4, kind: output, shape index: {0}]   ;;  %s6530_s5 = inlined_call_operand.vmem [shape: f32[8,16,128], index: 5, kind: output, shape index: {1}]   ;;  %s6531_s6 = inlined_call_operand.vmem [shape: f32[2,16,128], index: 6, kind: output, shape index: {2}]   ;;  %s6532_s7 = inlined_call_operand.vmem [shape: f32[2,16,128], index: 7, kind: output, shape index: {3}]  }
   0x1   :  { %v4424_v0 = vld [vmem:[%s6527_s2 + $0x4] ss:$16 sps:$4 sm:$0xff]   ;;  %v4429_v1 = vld [vmem:[%s6527_s2] ss:$16 sps:$4 sm:$0xff]   ;;  %506 = vmatprep.mubr.bf16.mxu0 %v6533_v2  ;;  %549 = vmatprep.mubr.bf16.mxu1 %v6533_v2  ;;  %v4454_v6 = vld [vmem:[%s6527_s2 + $0xc] ss:$16 sps:$4 sm:$0xff]  }
   0x2   :  { %474 = vmatprep.subr.bf16.mxu0 %v4424_v0  ;;  %v4437_v3 = vld [vmem:[%s6527_s2 + $0x24] ss:$16 sps:$4 sm:$0xff]   ;;  %v4443_v4 = vld [vmem:[%s6527_s2 + $0x20] ss:$16 sps:$4 sm:$0xff]   ;;  %v4459_v7 = vld [vmem:[%s6527_s2 + $0x8] ss:$16 sps:$4 sm:$0xff]   ;;  %517 = vmatprep.subr.bf16.mxu1 %v4454_v6 }
   0x3   :  { %475 = vmatpush1.bf16.msra.mxu0 %v4429_v1  ;;  %v4449_v5 = vld [vmem:[%s6527_s2 + $0x44] ss:$16 sps:$4 sm:$0xff]   ;;  %v4465_v8 = vld [vmem:[%s6527_s2 + $0x40] ss:$16 sps:$4 sm:$0xff]   ;;  %518 = vmatpush1.bf16.msra.mxu1 %v4459_v7  ;;  %v4478_v10 = vld [vmem:[%s6527_s2 + $0x2c] ss:$16 sps:$4 sm:$0xff]  }
   0x4   :  { %476 = vmatprep.subr.bf16.mxu0 %v4437_v3  ;;  %6711 = vst [vmem:[#allocation6_spill] sm:$0xff] %v4449_v5  ;;  %6712 = vst [vmem:[#allocation7_spill] sm:$0xff] %v4465_v8  ;;  %v4472_v9 = vld [vmem:[%s6527_s2 + $0x64] ss:$16 sps:$4 sm:$0xff]   ;;  %v4483_v11 = vld [vmem:[%s6527_s2 + $0x28] ss:$16 sps:$4 sm:$0xff]   ;;  %519 = vmatprep.subr.bf16.mxu1 %v4478_v10 }
   0x5   :  { %6713 = vst [vmem:[#allocation8_spill] sm:$0xff] %v4472_v9  ;;  %6714 = vst [vmem:[#allocation9_spill] sm:$0xff] %v4483_v11  ;;  %v4490_v12 = vld [vmem:[%s6527_s2 + $0x60] ss:$16 sps:$4 sm:$0xff]   ;;  %v4495_v13 = vld [vmem:[%s6527_s2 + $0x84] ss:$16 sps:$4 sm:$0xff]  }
   0x6   :  { %6715 = vst [vmem:[#allocation10_spill] sm:$0xff] %v4490_v12  ;;  %6716 = vst [vmem:[#allocation11_spill] sm:$0xff] %v4495_v13  ;;  %v4500_v14 = vld [vmem:[%s6527_s2 + $0x4c] ss:$16 sps:$4 sm:$0xff]   ;;  %v4507_v15 = vld [vmem:[%s6527_s2 + $0x48] ss:$16 sps:$4 sm:$0xff]  }
   0x7   :  { %477 = vmatpush1.bf16.msra.mxu0 %v4443_v4  ;;  %6717 = vst [vmem:[#allocation12_spill] sm:$0xff] %v4500_v14  ;;  %520 = vmatpush1.bf16.msra.mxu1 %v4483_v11  ;;  %6718 = vst [vmem:[#allocation13_spill] sm:$0xff] %v4507_v15  ;;  %v4513_v16 = vld [vmem:[%s6527_s2 + $0x6c] ss:$16 sps:$4 sm:$0xff]   ;;  %v4519_v17 = vld [vmem:[%s6527_s2 + $0x80] ss:$16 sps:$4 sm:$0xff]  }
   0x8   :  { %478 = vmatprep.subr.bf16.mxu0 %v4449_v5  ;;  %521 = vmatprep.subr.bf16.mxu1 %v4500_v14  ;;  %6719 = vst [vmem:[#allocation14_spill] sm:$0xff] %v4513_v16  ;;  %6720 = vst [vmem:[#allocation15_spill] sm:$0xff] %v4519_v17  ;;  %v4525_v18 = vld [vmem:[%s6527_s2 + $0xa4] ss:$16 sps:$4 sm:$0xff]   ;;  %v4531_v19 = vld [vmem:[%s6527_s2 + $0x68] ss:$16 sps:$4 sm:$0xff]  }
   0x9   :  { %6721 = vst [vmem:[#allocation16_spill] sm:$0xff] %v4525_v18  ;;  %6722 = vst [vmem:[#allocation17_spill] sm:$0xff] %v4531_v19  ;;  %v4537_v20 = vld [vmem:[%s6527_s2 + $0x8c] ss:$16 sps:$4 sm:$0xff]   ;;  %v4543_v21 = vld [vmem:[%s6527_s2 + $0xa0] ss:$16 sps:$4 sm:$0xff]  }
   0xa   :  { %6723 = vst [vmem:[#allocation18_spill] sm:$0xff] %v4537_v20  ;;  %6724 = vst [vmem:[#allocation19_spill] sm:$0xff] %v4543_v21  ;;  %v4548_v22 = vld [vmem:[%s6527_s2 + $0xc4] ss:$16 sps:$4 sm:$0xff]   ;;  %v4555_v23 = vld [vmem:[%s6527_s2 + $0x88] ss:$16 sps:$4 sm:$0xff]  }
   0xb   :  { %479 = vmatpush1.bf16.msra.mxu0 %v4465_v8  ;;  %522 = vmatpush1.bf16.msra.mxu1 %v4507_v15  ;;  %6725 = vst [vmem:[#allocation20_spill] sm:$0xff] %v4548_v22  ;;  %6726 = vst [vmem:[#allocation21_spill] sm:$0xff] %v4555_v23  ;;  %v4561_v24 = vld [vmem:[%s6527_s2 + $0xac] ss:$16 sps:$4 sm:$0xff]   ;;  %v4567_v25 = vld [vmem:[%s6527_s2 + $0xc0] ss:$16 sps:$4 sm:$0xff]  }
   0xc   :  { %480 = vmatprep.subr.bf16.mxu0 %v4472_v9  ;;  %523 = vmatprep.subr.bf16.mxu1 %v4513_v16  ;;  %6727 = vst [vmem:[#allocation22_spill] sm:$0xff] %v4561_v24  ;;  %6728 = vst [vmem:[#allocation23_spill] sm:$0xff] %v4567_v25  ;;  %v4573_v26 = vld [vmem:[%s6527_s2 + $0xe4] ss:$16 sps:$4 sm:$0xff]   ;;  %v4579_v27 = vld [vmem:[%s6527_s2 + $0xa8] ss:$16 sps:$4 sm:$0xff]  }
   0xd   :  { %6729 = vst [vmem:[#allocation24_spill] sm:$0xff] %v4573_v26  ;;  %6730 = vst [vmem:[#allocation25_spill] sm:$0xff] %v4579_v27  ;;  %v4585_v28 = vld [vmem:[%s6527_s2 + $0xcc] ss:$16 sps:$4 sm:$0xff]   ;;  %v4591_v29 = vld [vmem:[%s6527_s2 + $0xe0] ss:$16 sps:$4 sm:$0xff]  }
   0xe   :  { %6731 = vst [vmem:[#allocation26_spill] sm:$0xff] %v4585_v28  ;;  %6732 = vst [vmem:[#allocation27_spill] sm:$0xff] %v4591_v29  ;;  %v4596_v30 = vld [vmem:[%s6527_s2 + $0x104] ss:$16 sps:$4 sm:$0xff]   ;;  %v4603_v31 = vld [vmem:[%s6527_s2 + $0xc8] ss:$16 sps:$4 sm:$0xff]  }
   0xf   :  { %481 = vmatpush1.bf16.msra.mxu0 %v4490_v12  ;;  %524 = vmatpush1.bf16.msra.mxu1 %v4531_v19  ;;  %6733 = vst [vmem:[#allocation28_spill] sm:$0xff] %v4596_v30  ;;  %6734 = vst [vmem:[#allocation29_spill] sm:$0xff] %v4603_v31  ;;  %v4609_v32 = vld [vmem:[%s6527_s2 + $0xec] ss:$16 sps:$4 sm:$0xff]   ;;  %v4615_v33 = vld [vmem:[%s6527_s2 + $0x100] ss:$16 sps:$4 sm:$0xff]  }
  0x10   :  { %482 = vmatprep.subr.bf16.mxu0 %v4495_v13  ;;  %525 = vmatprep.subr.bf16.mxu1 %v4537_v20  ;;  %6735 = vst [vmem:[#allocation30_spill] sm:$0xff] %v4609_v32  ;;  %v4621_v34 = vld [vmem:[%s6527_s2 + $0x124] ss:$16 sps:$4 sm:$0xff]   ;;  %v4627_v35 = vld [vmem:[%s6527_s2 + $0xe8] ss:$16 sps:$4 sm:$0xff]  }
  0x11   :  { %6736 = vst [vmem:[#allocation31_spill] sm:$0xff] %v4627_v35  ;;  %v4633_v36 = vld [vmem:[%s6527_s2 + $0x10c] ss:$16 sps:$4 sm:$0xff]   ;;  %v4640_v38 = vld [vmem:[%s6527_s2 + $0x120] ss:$16 sps:$4 sm:$0xff]  }
  0x12   :  { %6737 = vst [vmem:[#allocation32_spill] sm:$0xff] %v4633_v36  ;;  %v4645_v39 = vld [vmem:[%s6527_s2 + $0x144] ss:$16 sps:$4 sm:$0xff]   ;;  %v4653_v40 = vld [vmem:[%s6527_s2 + $0x108] ss:$16 sps:$4 sm:$0xff]  }
  0x13   :  { %483 = vmatpush1.bf16.msra.mxu0 %v4519_v17  ;;  %526 = vmatpush1.bf16.msra.mxu1 %v4555_v23  ;;  %v4659_v41 = vld [vmem:[%s6527_s2 + $0x12c] ss:$16 sps:$4 sm:$0xff]   ;;  %v4665_v42 = vld [vmem:[%s6527_s2 + $0x140] ss:$16 sps:$4 sm:$0xff]   ;;  %v4670_v43 = vld [vmem:[%s6527_s2 + $0x164] ss:$16 sps:$4 sm:$0xff]  }
  0x14   :  { %484 = vmatprep.subr.bf16.mxu0 %v4525_v18  ;;  %527 = vmatprep.subr.bf16.mxu1 %v4561_v24  ;;  %v4678_v44 = vld [vmem:[%s6527_s2 + $0x128] ss:$16 sps:$4 sm:$0xff]   ;;  %v4684_v45 = vld [vmem:[%s6527_s2 + $0x14c] ss:$16 sps:$4 sm:$0xff]   ;;  %v4691_v46 = vld [vmem:[%s6527_s2 + $0x160] ss:$16 sps:$4 sm:$0xff]  }
  0x15   :  { %v4697_v47 = vld [vmem:[%s6527_s2 + $0x184] ss:$16 sps:$4 sm:$0xff]   ;;  %v4703_v48 = vld [vmem:[%s6527_s2 + $0x148] ss:$16 sps:$4 sm:$0xff]   ;;  %v4709_v49 = vld [vmem:[%s6527_s2 + $0x16c] ss:$16 sps:$4 sm:$0xff]  }
  0x16   :  { %v4715_v50 = vld [vmem:[%s6527_s2 + $0x180] ss:$16 sps:$4 sm:$0xff]   ;;  %v4721_v51 = vld [vmem:[%s6527_s2 + $0x1a4] ss:$16 sps:$4 sm:$0xff]   ;;  %v4727_v52 = vld [vmem:[%s6527_s2 + $0x168] ss:$16 sps:$4 sm:$0xff]  }
  0x17   :  { %485 = vmatpush1.bf16.msra.mxu0 %v4543_v21  ;;  %528 = vmatpush1.bf16.msra.mxu1 %v4579_v27  ;;  %v4733_v53 = vld [vmem:[%s6527_s2 + $0x18c] ss:$16 sps:$4 sm:$0xff]   ;;  %v4739_v54 = vld [vmem:[%s6527_s2 + $0x1a0] ss:$16 sps:$4 sm:$0xff]   ;;  %v4745_v55 = vld [vmem:[%s6527_s2 + $0x1c4] ss:$16 sps:$4 sm:$0xff]  }
  0x18   :  { %486 = vmatprep.subr.bf16.mxu0 %v4548_v22  ;;  %529 = vmatprep.subr.bf16.mxu1 %v4585_v28  ;;  %v4751_v56 = vld [vmem:[%s6527_s2 + $0x188] ss:$16 sps:$4 sm:$0xff]   ;;  %v4757_v57 = vld [vmem:[%s6527_s2 + $0x1ac] ss:$16 sps:$4 sm:$0xff]   ;;  %v4763_v58 = vld [vmem:[%s6527_s2 + $0x1c0] ss:$16 sps:$4 sm:$0xff]  }
  0x19   :  { %6738 = vst [vmem:[#allocation33_spill] sm:$0xff] %v4763_v58  ;;  %v4769_v59 = vld [vmem:[%s6527_s2 + $0x1e4] ss:$16 sps:$4 sm:$0xff]   ;;  %v4775_v60 = vld [vmem:[%s6527_s2 + $0x1a8] ss:$16 sps:$4 sm:$0xff]  }
  0x1a   :  { %6739 = vst [vmem:[#allocation34_spill] sm:$0xff] %v4769_v59  ;;  %v4781_v61 = vld [vmem:[%s6527_s2 + $0x1cc] ss:$16 sps:$4 sm:$0xff]   ;;  %v4787_v62 = vld [vmem:[%s6527_s2 + $0x1e0] ss:$16 sps:$4 sm:$0xff]  }
  0x1b   :  { %487 = vmatpush1.bf16.msra.mxu0 %v4567_v25  ;;  %530 = vmatpush1.bf16.msra.mxu1 %v4603_v31  ;;  %v4794_v63 = vld [vmem:[%s6527_s2 + $0x1c8] ss:$16 sps:$4 sm:$0xff]  }
  0x1c   :  { %488 = vmatprep.subr.bf16.mxu0 %v4573_v26  ;;  %531 = vmatprep.subr.bf16.mxu1 %v4609_v32 }
  0x1f   :  { %489 = vmatpush1.bf16.msra.mxu0 %v4591_v29  ;;  %532 = vmatpush1.bf16.msra.mxu1 %v4627_v35 }
  0x20   :  { %816 = vmatprep.subr.bf16.mxu0 %v4596_v30  ;;  %859 = vmatprep.subr.bf16.mxu1 %v4633_v36 }
  0x22   :  { %507 = vmatmul.mubr.bf16.vlgmr.msra.gmra.mrb[0].mxu0 %v6535_v37  ;;  %550 = vmatmul.mubr.bf16.vlgmr.msra.gmra.mrb[0].mxu1 %v6535_v37  ;;  %v4807_v37 = vld [vmem:[%s6527_s2 + $0x1e8] ss:$16 sps:$4 sm:$0xff]  }
  0x23   :  { %817 = vmatpush1.bf16.msra.mxu0 %v4615_v33  ;;  %848 = vmatprep.mubr.bf16.mxu0 %v6533_v2 }
  0x24   :  { %818 = vmatprep.subr.bf16.mxu0 %v4621_v34  ;;  %860 = vmatpush1.bf16.msra.mxu1 %v4653_v40 }
  0x25   :  { %861 = vmatprep.subr.bf16.mxu1 %v4659_v41  ;;  %891 = vmatprep.mubr.bf16.mxu1 %v6533_v2  ;;  %v4800_v2 = vld [vmem:[%s6527_s2 + $0x1ec] ss:$16 sps:$4 sm:$0xff]  }
  0x27   :  { %819 = vmatpush1.bf16.msra.mxu0 %v4640_v38 }
  0x28   :  { %820 = vmatprep.subr.bf16.mxu0 %v4645_v39  ;;  %862 = vmatpush1.bf16.msra.mxu1 %v4678_v44 }
  0x29   :  { %863 = vmatprep.subr.bf16.mxu1 %v4684_v45 }
  0x2b   :  { %821 = vmatpush1.bf16.msra.mxu0 %v4665_v42 }
  0x2c   :  { %822 = vmatprep.subr.bf16.mxu0 %v4670_v43  ;;  %864 = vmatpush1.bf16.msra.mxu1 %v4703_v48 }
  0x2d   :  { %865 = vmatprep.subr.bf16.mxu1 %v4709_v49 }
  0x2f   :  { %823 = vmatpush1.bf16.msra.mxu0 %v4691_v46 }
  0x30   :  { %824 = vmatprep.subr.bf16.mxu0 %v4697_v47  ;;  %866 = vmatpush1.bf16.msra.mxu1 %v4727_v52 }
  0x31   :  { %867 = vmatprep.subr.bf16.mxu1 %v4733_v53 }
  0x33   :  { %825 = vmatpush1.bf16.msra.mxu0 %v4715_v50 }
  0x34   :  { %826 = vmatprep.subr.bf16.mxu0 %v4721_v51  ;;  %868 = vmatpush1.bf16.msra.mxu1 %v4751_v56 }
  0x35   :  { %869 = vmatprep.subr.bf16.mxu1 %v4757_v57 }
  0x37   :  { %827 = vmatpush1.bf16.msra.mxu0 %v4739_v54 }
  0x38   :  { %828 = vmatprep.subr.bf16.mxu0 %v4745_v55  ;;  %870 = vmatpush1.bf16.msra.mxu1 %v4775_v60 }
  0x39   :  { %871 = vmatprep.subr.bf16.mxu1 %v4781_v61 }
  0x3b   :  { %829 = vmatpush1.bf16.msra.mxu0 %v4763_v58  ;;  %v6741_v58 = vmov 0  }
  0x3c   :  { %830 = vmatprep.subr.bf16.mxu0 %v4769_v59  ;;  %872 = vmatpush1.bf16.msra.mxu1 %v4794_v63  ;;  %v6740_v59 = vmov 0.0|0.0  }
  0x3d   :  { %873 = vmatprep.subr.bf16.mxu1 %v4800_v2 }
  0x3f   :  { %831 = vmatpush1.bf16.msra.mxu0 %v4787_v62 }
  0x40   :  { %989 = vmatprep.subr.bf16.mxu0 %v4424_v0  ;;  %874 = vmatpush1.bf16.msra.mxu1 %v4807_v37 }
  0x41   :  { %1032 = vmatprep.subr.bf16.mxu1 %v4454_v6 }
  0x42   :  { %849 = vmatmul.mubr.bf16.vlgmr.msra.gmra.mrb[4].mxu0 %v6740_v59 }
  0x43   :  { %990 = vmatpush1.bf16.msra.mxu0 %v4429_v1  ;;  %1021 = vmatprep.mubr.bf16.mxu0 %v6741_v58 }
  0x44   :  { %991 = vmatprep.subr.bf16.mxu0 %v4437_v3  ;;  %892 = vmatmul.mubr.bf16.vlgmr.msra.gmra.mrb[4].mxu1 %v6740_v59  ;;  %v294_v59 = vlaneseq }
  0x45   :  { %1033 = vmatpush1.bf16.msra.mxu1 %v4459_v7  ;;  %1064 = vmatprep.mubr.bf16.mxu1 %v6741_v58 }
  0x46   :  { %1034 = vmatprep.subr.bf16.mxu1 %v4478_v10 }
  0x47   :  { %992 = vmatpush1.bf16.msra.mxu0 %v4443_v4 }
  0x48   :  { %993 = vmatprep.subr.bf16.mxu0 %v4449_v5 }
  0x49   :  { %1035 = vmatpush1.bf16.msra.mxu1 %v4483_v11 }
  0x4a   :  { %1036 = vmatprep.subr.bf16.mxu1 %v4500_v14 }
  0x4b   :  { %994 = vmatpush1.bf16.msra.mxu0 %v4465_v8 }
  0x4c   :  { %995 = vmatprep.subr.bf16.mxu0 %v4472_v9 }
  0x4d   :  { %1037 = vmatpush1.bf16.msra.mxu1 %v4507_v15 }
  0x4e   :  { %1038 = vmatprep.subr.bf16.mxu1 %v4513_v16 }
  0x4f   :  { %996 = vmatpush1.bf16.msra.mxu0 %v4490_v12 }
  0x50   :  { %997 = vmatprep.subr.bf16.mxu0 %v4495_v13 }
  0x51   :  { %1039 = vmatpush1.bf16.msra.mxu1 %v4531_v19 }
  0x52   :  { %1040 = vmatprep.subr.bf16.mxu1 %v4537_v20  ;;  %v29_v20 = vld [vmem:[%s6525_s0 + $0x8] sm:$0xff] }
  0x53   :  { %998 = vmatpush1.bf16.msra.mxu0 %v4519_v17 }
  0x54   :  { %999 = vmatprep.subr.bf16.mxu0 %v4525_v18 }
  0x55   :  { %1041 = vmatpush1.bf16.msra.mxu1 %v4555_v23 }
  0x56   :  { %1042 = vmatprep.subr.bf16.mxu1 %v4561_v24 }
  0x57   :  { %1000 = vmatpush1.bf16.msra.mxu0 %v4543_v21 }
  0x58   :  { %1001 = vmatprep.subr.bf16.mxu0 %v4548_v22 }
  0x59   :  { %1043 = vmatpush1.bf16.msra.mxu1 %v4579_v27 }
  0x5a   :  { %1044 = vmatprep.subr.bf16.mxu1 %v4585_v28 }
  0x5b   :  { %1002 = vmatpush1.bf16.msra.mxu0 %v4567_v25  ;;  %v4849_v25 = vshrl.u32 %v294_v59, 7 }
  0x5c   :  { %1003 = vmatprep.subr.bf16.mxu0 %v4573_v26  ;;  %v285_v26 = vld [vmem:[%s6528_s3] sm:$0xf] }
  0x5d   :  { %1045 = vmatpush1.bf16.msra.mxu1 %v4603_v31  ;;  %v6553_v22 = vsub.s32 0, %v4849_v25  ;;  %v6746_v16 = vsub.s32 2, %v4849_v25 }
  0x5e   :  { %1046 = vmatprep.subr.bf16.mxu1 %v4609_v32 }
  0x5f   :  { %1004 = vmatpush1.bf16.msra.mxu0 %v4591_v29  ;;  %v6556_v29 = vsub.s32 1, %v4849_v25 }
  0x60   :  { %1149 = vmatprep.subr.bf16.mxu0 %v4596_v30  ;;  %v27_v30 = vld [vmem:[%s6525_s0] sm:$0xff] }
  0x61   :  { %1047 = vmatpush1.bf16.msra.mxu1 %v4627_v35  ;;  %v4861_v35 = vrot.slane %v285_v26, %v6553_v22  ;;  %v4865_v59 = vrot.slane %v285_v26, %v6556_v29  ;;  %v564_v32 = vunpack.c.l.bf16 %v27_v30  ;;  %v565_v27 = vunpack.c.h.bf16 %v27_v30 }
  0x62   :  { %1192 = vmatprep.subr.bf16.mxu1 %v4633_v36  ;;  %v31_v36 = vld [vmem:[%s6525_s0 + $0x20] sm:$0xff]  ;;  %v6744_v30 = vsub.s32 3, %v4849_v25 }
  0x63   :  { %6742 = vst [vmem:[#allocation35_spill] sm:$0xff] %v4861_v35  ;;  %6743 = vst [vmem:[#allocation36_spill] sm:$0xff] %v4865_v59  ;;  %v568_v22 = vunpack.c.l.bf16 %v31_v36  ;;  %v569_v29 = vunpack.c.h.bf16 %v31_v36  ;;  %v33_v36 = vld [vmem:[%s6525_s0 + $0x28] sm:$0xff] }
  0x64   :  { %v4880_v12 = vrot.slane %v285_v26, %v6744_v30 }
  0x66   :  { %6745 = vst [vmem:[#allocation37_spill] sm:$0xff] %v4880_v12 }
  0xf5   :  { %v508_v28 = vpop.f32.mrb[0].mxu0 }
  0xf6   :  { %v509_v24 = vadd.f32 %v508_v28, %v4861_v35  ;;  %v510_v18 = vpop.f32.mrb[1].mxu0 }
  0xf7   :  { %v511_v23 = vadd.f32 %v510_v18, %v4865_v59  ;;  %v512_v17 = vpop.f32.mrb[2].mxu0  ;;  %v4885_v18 = vrot.slane %v285_v26, %v6746_v16 }
  0xf8   :  { %v572_v13 = vadd.f32 %v564_v32, %v509_v24  ;;  %v513_v19 = vadd.f32 %v512_v17, %v4861_v35  ;;  %v514_v31 = vpop.f32.mrb[3].mxu0  ;;  %v551_v32 = vpop.f32.mrb[0].mxu1  ;;  %v567_v17 = vunpack.c.h.bf16 %v29_v20 }
  0xf9   :  { %v573_v21 = vadd.f32 %v565_v27, %v511_v23  ;;  %v515_v28 = vadd.f32 %v514_v31, %v4865_v59  ;;  %6747 = vst [vmem:[#allocation38_spill] sm:$0xff] %v4885_v18  ;;  %v553_v8 = vpop.f32.mrb[1].mxu1  ;;  %v571_v31 = vunpack.c.h.bf16 %v33_v36  ;;  %v552_v26 = vadd.f32 %v551_v32, %v4885_v18 }
  0xfa   :  { %v3485_v9 = vmul.f32 -1.442695, %v572_v13  ;;  %v576_v24 = vadd.f32 %v568_v22, %v513_v19  ;;  %v554_v23 = vadd.f32 %v553_v8, %v4880_v12  ;;  %v555_v27 = vpop.f32.mrb[2].mxu1  ;;  %v566_v59 = vunpack.c.l.bf16 %v29_v20 }
  0xfb   :  { %v3487_v35 = vmul.f32 -1.442695, %v573_v21  ;;  %v577_v15 = vadd.f32 %v569_v29, %v515_v28  ;;  %v557_v14 = vpop.f32.mrb[3].mxu1  ;;  %v556_v21 = vadd.f32 %v555_v27, %v4885_v18  ;;  %v570_v22 = vunpack.c.l.bf16 %v33_v36  ;;  %v3452_v36 = vld [vmem:[%s6528_s3 + $0x4] sm:$0xf] }
  0xfc   :  { %3739 = vpow2.f32 %v3485_v9  ;;  %v3486_v30 = vmul.f32 -1.442695, %v576_v24  ;;  %v575_v13 = vadd.f32 %v567_v17, %v554_v23  ;;  %v558_v19 = vadd.f32 %v557_v14, %v4880_v12 }
  0xfd   :  { %3741 = vpow2.f32 %v3487_v35  ;;  %v3488_v16 = vmul.f32 -1.442695, %v577_v15  ;;  %v574_v29 = vadd.f32 %v566_v59, %v552_v26  ;;  %v578_v8 = vadd.f32 %v570_v22, %v556_v21  ;;  %v3418_v21 = vld [vmem:[%s6526_s1 + $0x1f0] sm:$0xff] }
  0xfe   :  { %3743 = vpow2.f32 %v3486_v30  ;;  %v579_v9 = vadd.f32 %v571_v31, %v558_v19  ;;  %v3489_v28 = vmul.f32 -1.442695, %v575_v13  ;;  %v6748_v13 = vsub.s32 0, %v4849_v25 }
  0xff   :  { %3745 = vpow2.f32 %v3488_v16  ;;  %v3416_v16 = vld [vmem:[%s6526_s1 + $0x1d0] sm:$0xff]  ;;  %v912_v5 = vunpack.c.h.bf16 %v3418_v21 }
 0x100   :  { %v3490_v24 = vmul.f32 -1.442695, %v579_v9  ;;  %3747 = vtanh.f32 %v574_v29  ;;  %v4902_v19 = vrot.slane %v3452_v36, %v6748_v13  ;;  %v6750_v29 = vsub.s32 1, %v4849_v25 }
 0x101   :  { %3749 = vpow2.f32 %v3489_v28 }
 0x102   :  { %3751 = vtanh.f32 %v578_v8  ;;  %6749 = vst [vmem:[#allocation39_spill] sm:$0xff] %v4902_v19  ;;  %v4909_v28 = vrot.slane %v3452_v36, %v6750_v29 }
 0x103   :  { %3753 = vpow2.f32 %v3490_v24 }
 0x104   :  { %6751 = vst [vmem:[#allocation40_spill] sm:$0xff] %v4909_v28 }
 0x106   :  { %v3740_v35 = vpop.eup %3739 }
 0x107   :  { %v3742_v15 = vpop.eup %3741  ;;  %v586_v32 = vadd.f32 1.0, %v3740_v35  ;;  %v907_v35 = vunpack.c.l.bf16 %v3416_v16 }
 0x108   :  { %v3744_v20 = vpop.eup %3743  ;;  %v598_v30 = vadd.f32 1.0, %v3742_v15 }
 0x109   :  { %v3746_v17 = vpop.eup %3745  ;;  %3755 = vrcp.f32 %v586_v32  ;;  %v587_v14 = vadd.f32 1.0, %v3744_v20 }
 0x10a   :  { %3757 = vrcp.f32 %v598_v30  ;;  %v599_v23 = vadd.f32 1.0, %v3746_v17  ;;  %v3748_v59 = vpop.eup %3747  ;;  %v908_v30 = vunpack.c.h.bf16 %v3416_v16  ;;  %v911_v17 = vunpack.c.l.bf16 %v3418_v21 }
 0x10b   :  { %3759 = vrcp.f32 %v587_v14  ;;  %v3750_v27 = vpop.eup %3749  ;;  %v6753_v21 = vsub.s32 3, %v4849_v25 }
 0x10c   :  { %3761 = vrcp.f32 %v599_v23  ;;  %v3752_v31 = vpop.eup %3751  ;;  %v612_v9 = vadd.f32 1.0, %v3750_v27 }
 0x10d   :  { %v3754_v26 = vpop.eup %3753 }
 0x10e   :  { %v613_v13 = vadd.f32 1.0, %v3754_v26  ;;  %3763 = vrcp.f32 %v612_v9  ;;  %v6752_v26 = vsub.s32 2, %v4849_v25 }
 0x113   :  { %v3756_v22 = vpop.eup %3755 }
 0x114   :  { %v3758_v8 = vpop.eup %3757  ;;  %v620_v24 = vmul.f32 %v3756_v22, %v3748_v59  ;;  %v3417_v22 = vld [vmem:[%s6526_s1 + $0x1d8] sm:$0xff] }
 0x115   :  { %v3760_v15 = vpop.eup %3759  ;;  %v618_v32 = vmul.f32 0.0, %v3758_v8  ;;  %v850_v20 = vpop.f32.mrb[4].mxu0 }
 0x116   :  { %v3762_v14 = vpop.eup %3761  ;;  %v621_v23 = vmul.f32 %v3760_v15, %v3752_v31  ;;  %v851_v12 = vadd.f32 %v850_v20, %v4902_v19  ;;  %v852_v18 = vpop.f32.mrb[5].mxu0  ;;  %v4921_v15 = vrot.slane %v3452_v36, %v6752_v26 }
 0x117   :  { %v619_v27 = vmul.f32 0.0, %v3762_v14  ;;  %v4912_v11 = vadd.f32 %v620_v24, %v618_v32  ;;  %v853_v29 = vadd.f32 %v852_v18, %v4909_v28  ;;  %v854_v59 = vpop.f32.mrb[6].mxu0  ;;  %v4925_v24 = vrot.slane %v3452_v36, %v6753_v21  ;;  %v893_v14 = vpop.f32.mrb[4].mxu1 }
 0x118   :  { %v915_v16 = vadd.f32 %v907_v35, %v851_v12  ;;  %v855_v8 = vadd.f32 %v854_v59, %v4902_v19  ;;  %v856_v31 = vpop.f32.mrb[7].mxu0  ;;  %v3419_v12 = vld [vmem:[%s6526_s1 + $0x1f8] sm:$0xff]  ;;  %v910_v59 = vunpack.c.h.bf16 %v3417_v22  ;;  %v895_v26 = vpop.f32.mrb[5].mxu1  ;;  %v894_v21 = vadd.f32 %v893_v14, %v4921_v15 }
 0x119   :  { %3765 = vtanh.f32 %v4912_v11  ;;  %v4928_v18 = vadd.f32 %v621_v23, %v619_v27  ;;  %v916_v9 = vadd.f32 %v908_v30, %v853_v29  ;;  %v857_v32 = vadd.f32 %v856_v31, %v4909_v28  ;;  %v897_v27 = vpop.f32.mrb[6].mxu1 }
 0x11a   :  { %3767 = vrcp.f32 %v613_v13  ;;  %v3523_v35 = vmul.f32 -1.442695, %v915_v16  ;;  %v919_v20 = vadd.f32 %v911_v17, %v855_v8  ;;  %v896_v30 = vadd.f32 %v895_v26, %v4925_v24  ;;  %v899_v16 = vpop.f32.mrb[7].mxu1 }
 0x11b   :  { %6754 = vst [vmem:[#allocation41_spill] sm:$0xff] %v4928_v18  ;;  %3769 = vtanh.f32 %v4928_v18  ;;  %v3525_v25 = vmul.f32 -1.442695, %v916_v9  ;;  %v920_v36 = vadd.f32 %v912_v5, %v857_v32  ;;  %v914_v29 = vunpack.c.h.bf16 %v3419_v12 }
 0x11c   :  { %3771 = vpow2.f32 %v3523_v35  ;;  %v3524_v23 = vmul.f32 -1.442695, %v919_v20  ;;  %v909_v13 = vunpack.c.l.bf16 %v3417_v22  ;;  %v918_v17 = vadd.f32 %v910_v59, %v896_v30  ;;  %v3764_v35 = vpop.eup %3763 }
 0x11d   :  { %3773 = vpow2.f32 %v3525_v25  ;;  %v3526_v31 = vmul.f32 -1.442695, %v920_v36  ;;  %v900_v8 = vadd.f32 %v899_v16, %v4925_v24  ;;  %v898_v5 = vadd.f32 %v897_v27, %v4921_v15 }
 0x11e   :  { %3775 = vpow2.f32 %v3524_v23  ;;  %v913_v9 = vunpack.c.l.bf16 %v3419_v12  ;;  %v917_v20 = vadd.f32 %v909_v13, %v894_v21  ;;  %v3527_v26 = vmul.f32 -1.442695, %v918_v17 }
 0x11f   :  { %3777 = vpow2.f32 %v3526_v31  ;;  %v922_v32 = vadd.f32 %v914_v29, %v900_v8 }
 0x120   :  { %v921_v28 = vadd.f32 %v913_v9, %v898_v5  ;;  %3779 = vtanh.f32 %v917_v20  ;;  %v6774_v9 = vld [vmem:[#allocation20_spill] sm:$0xff]  ;;  %v6777_v20 = vld [vmem:[#allocation29_spill] sm:$0xff] }
 0x121   :  { %v3528_v36 = vmul.f32 -1.442695, %v922_v32  ;;  %3781 = vpow2.f32 %v3527_v26  ;;  %v6775_v32 = vld [vmem:[#allocation26_spill] sm:$0xff]  ;;  %v6778_v26 = vld [vmem:[#allocation24_spill] sm:$0xff] }
 0x122   :  { %3783 = vtanh.f32 %v921_v28 }
 0x123   :  { %v3766_v18 = vpop.eup %3765  ;;  %3785 = vpow2.f32 %v3528_v36  ;;  %v6780_v36 = vld [vmem:[#allocation27_spill] sm:$0xff] }
 0x124   :  { %v3768_v25 = vpop.eup %3767  ;;  %v626_v19 = vmul.f32 %v3766_v18, %v3764_v35  ;;  %v6776_v35 = vld [vmem:[#allocation23_spill] sm:$0xff] }
 0x125   :  { %v3770_v14 = vpop.eup %3769 }
 0x126   :  { %v3772_v22 = vpop.eup %3771  ;;  %v627_v59 = vmul.f32 %v3770_v14, %v3768_v25  ;;  %979 = vst [vmem:[%s6529_s4] sm:$0xff] %v626_v19  ;;  %v6779_v25 = vld [vmem:[#allocation30_spill] sm:$0xff]  ;;  %v6781_v14 = vld [vmem:[#allocation31_spill] sm:$0xff] }
 0x127   :  { %v3774_v23 = vpop.eup %3773  ;;  %v929_v12 = vadd.f32 1.0, %v3772_v22  ;;  %v6782_v22 = vld [vmem:[#allocation28_spill] sm:$0xff] }
 0x128   :  { %v3776_v30 = vpop.eup %3775  ;;  %v941_v27 = vadd.f32 1.0, %v3774_v23  ;;  %980 = vst [vmem:[%s6529_s4 + $0x8] sm:$0xff] %v627_v59  ;;  %v988_v18 = vpack.c.bf16 %v627_v59, %v626_v19  ;;  %v6783_v59 = vld [vmem:[#allocation32_spill] sm:$0xff]  ;;  %v35_v23 = vld [vmem:[%s6525_s0 + $0x40] sm:$0xff] }
 0x129   :  { %v3778_v29 = vpop.eup %3777  ;;  %3787 = vrcp.f32 %v929_v12  ;;  %v930_v31 = vadd.f32 1.0, %v3776_v30  ;;  %v39_v12 = vld [vmem:[%s6525_s0 + $0x60] sm:$0xff]  ;;  %v1080_v30 = vunpack.c.l.bf16 %v35_v23 }
 0x12a   :  { %3789 = vrcp.f32 %v941_v27  ;;  %v942_v21 = vadd.f32 1.0, %v3778_v29  ;;  %1022 = vmatmul.mubr.bf16.vlgmr.msra.gmra.mrb[8].mxu0 %v988_v18  ;;  %1065 = vmatmul.mubr.bf16.vlgmr.msra.gmra.mrb[8].mxu1 %v988_v18  ;;  %v3780_v19 = vpop.eup %3779  ;;  %v1081_v29 = vunpack.c.h.bf16 %v35_v23 }
 0x12b   :  { %3791 = vrcp.f32 %v930_v31  ;;  %1150 = vmatpush1.bf16.msra.mxu0 %v4615_v33  ;;  %1193 = vmatpush1.bf16.msra.mxu1 %v4653_v40  ;;  %v3782_v28 = vpop.eup %3781  ;;  %v6784_v31 = vld [vmem:[#allocation35_spill] sm:$0xff] }
 0x12c   :  { %3793 = vrcp.f32 %v942_v21  ;;  %1151 = vmatprep.subr.bf16.mxu0 %v4621_v34  ;;  %1194 = vmatprep.subr.bf16.mxu1 %v4659_v41  ;;  %v3784_v33 = vpop.eup %3783  ;;  %v955_v34 = vadd.f32 1.0, %v3782_v28 }
 0x12d   :  { %1181 = vmatprep.mubr.bf16.mxu0 %v6741_v58  ;;  %1224 = vmatprep.mubr.bf16.mxu1 %v6741_v58  ;;  %v3786_v40 = vpop.eup %3785 }
 0x12e   :  { %v956_v8 = vadd.f32 1.0, %v3786_v40  ;;  %3795 = vrcp.f32 %v955_v34  ;;  %v6785_v40 = vld [vmem:[#allocation36_spill] sm:$0xff] }
 0x12f   :  { %1152 = vmatpush1.bf16.msra.mxu0 %v4640_v38  ;;  %1195 = vmatpush1.bf16.msra.mxu1 %v4678_v44 }
 0x130   :  { %1153 = vmatprep.subr.bf16.mxu0 %v4645_v39  ;;  %1196 = vmatprep.subr.bf16.mxu1 %v4684_v45 }
 0x133   :  { %v3788_v13 = vpop.eup %3787  ;;  %1154 = vmatpush1.bf16.msra.mxu0 %v4665_v42  ;;  %1197 = vmatpush1.bf16.msra.mxu1 %v4703_v48 }
 0x134   :  { %v3790_v41 = vpop.eup %3789  ;;  %v963_v16 = vmul.f32 %v3788_v13, %v3780_v19  ;;  %1155 = vmatprep.subr.bf16.mxu0 %v4670_v43  ;;  %1198 = vmatprep.subr.bf16.mxu1 %v4709_v49  ;;  %v6756_v49 = vld [vmem:[#allocation34_spill] sm:$0xff] }
 0x135   :  { %v3792_v38 = vpop.eup %3791  ;;  %v961_v44 = vmul.f32 0.0, %v3790_v41 }
 0x136   :  { %v3794_v17 = vpop.eup %3793  ;;  %v964_v39 = vmul.f32 %v3792_v38, %v3784_v33  ;;  %v1084_v33 = vunpack.c.l.bf16 %v39_v12 }
 0x137   :  { %v962_v45 = vmul.f32 0.0, %v3794_v17  ;;  %v4959_v5 = vadd.f32 %v963_v16, %v961_v44  ;;  %1156 = vmatpush1.bf16.msra.mxu0 %v4691_v46  ;;  %1199 = vmatpush1.bf16.msra.mxu1 %v4727_v52  ;;  %v1085_v16 = vunpack.c.h.bf16 %v39_v12 }
 0x138   :  { %1157 = vmatprep.subr.bf16.mxu0 %v4697_v47  ;;  %1200 = vmatprep.subr.bf16.mxu1 %v4733_v53  ;;  %v3796_v43 = vpop.eup %3795  ;;  %v6755_v47 = vld [vmem:[#allocation33_spill] sm:$0xff] }
 0x139   :  { %3797 = vtanh.f32 %v4959_v5  ;;  %v4966_v42 = vadd.f32 %v964_v39, %v962_v45 }
 0x13a   :  { %3799 = vrcp.f32 %v956_v8 }
 0x13b   :  { %3801 = vtanh.f32 %v4966_v42  ;;  %1158 = vmatpush1.bf16.msra.mxu0 %v4715_v50  ;;  %1201 = vmatpush1.bf16.msra.mxu1 %v4751_v56  ;;  %v6768_v56 = vld [vmem:[#allocation15_spill] sm:$0xff] }
 0x13c   :  { %1159 = vmatprep.subr.bf16.mxu0 %v4721_v51  ;;  %1202 = vmatprep.subr.bf16.mxu1 %v4757_v57  ;;  %v6769_v57 = vld [vmem:[#allocation21_spill] sm:$0xff] }
 0x13f   :  { %1160 = vmatpush1.bf16.msra.mxu0 %v4739_v54  ;;  %1203 = vmatpush1.bf16.msra.mxu1 %v4775_v60  ;;  %v6765_v54 = vld [vmem:[#allocation17_spill] sm:$0xff]  ;;  %v6770_v60 = vld [vmem:[#allocation16_spill] sm:$0xff] }
 0x140   :  { %1161 = vmatprep.subr.bf16.mxu0 %v4745_v55  ;;  %1204 = vmatprep.subr.bf16.mxu1 %v4781_v61  ;;  %v6766_v55 = vld [vmem:[#allocation11_spill] sm:$0xff]  ;;  %v6771_v61 = vld [vmem:[#allocation22_spill] sm:$0xff] }
 0x143   :  { %v3798_v46 = vpop.eup %3797  ;;  %1162 = vmatpush1.bf16.msra.mxu0 %v6755_v47  ;;  %1205 = vmatpush1.bf16.msra.mxu1 %v4794_v63  ;;  %v6773_v63 = vld [vmem:[#allocation25_spill] sm:$0xff] }
 0x144   :  { %v3800_v48 = vpop.eup %3799  ;;  %1163 = vmatprep.subr.bf16.mxu0 %v6756_v49  ;;  %1206 = vmatprep.subr.bf16.mxu1 %v4800_v2  ;;  %v969_v50 = vmul.f32 %v3798_v46, %v3796_v43  ;;  %v6757_v2 = vld [vmem:[#allocation9_spill] sm:$0xff] }
 0x145   :  { %v3802_v51 = vpop.eup %3801 }
 0x146   :  { %v970_v52 = vmul.f32 %v3802_v51, %v3800_v48  ;;  %3529 = vst [vmem:[%s6530_s5 + $0x70] sm:$0xff] %v969_v50 }
 0x147   :  { %1164 = vmatpush1.bf16.msra.mxu0 %v4787_v62  ;;  %1207 = vmatpush1.bf16.msra.mxu1 %v4807_v37  ;;  %v6760_v37 = vld [vmem:[#allocation7_spill] sm:$0xff] }
 0x148   :  { %3530 = vst [vmem:[%s6530_s5 + $0x78] sm:$0xff] %v970_v52  ;;  %v1148_v53 = vpack.c.bf16 %v970_v52, %v969_v50  ;;  %1323 = vmatprep.subr.bf16.mxu0 %v4424_v0  ;;  %1366 = vmatprep.subr.bf16.mxu1 %v4454_v6  ;;  %v6758_v0 = vld [vmem:[#allocation6_spill] sm:$0xff]  ;;  %v6759_v6 = vld [vmem:[#allocation12_spill] sm:$0xff]  ;;  %v6772_v62 = vld [vmem:[#allocation19_spill] sm:$0xff] }
 0x149   :  { %v37_v50 = vld [vmem:[%s6525_s0 + $0x48] sm:$0xff]  ;;  %v6786_v52 = vld [vmem:[#allocation38_spill] sm:$0xff] }
 0x14a   :  { %1182 = vmatmul.mubr.bf16.vlgmr.msra.gmra.mrb[12].mxu0 %v1148_v53  ;;  %1225 = vmatmul.mubr.bf16.vlgmr.msra.gmra.mrb[12].mxu1 %v1148_v53 }
 0x14b   :  { %1324 = vmatpush1.bf16.msra.mxu0 %v4429_v1  ;;  %1367 = vmatpush1.bf16.msra.mxu1 %v4459_v7  ;;  %v6761_v1 = vld [vmem:[#allocation13_spill] sm:$0xff]  ;;  %v6762_v7 = vld [vmem:[#allocation8_spill] sm:$0xff] }
 0x14c   :  { %1325 = vmatprep.subr.bf16.mxu0 %v4437_v3  ;;  %1368 = vmatprep.subr.bf16.mxu1 %v4478_v10  ;;  %v6763_v3 = vld [vmem:[#allocation14_spill] sm:$0xff] }
 0x14d   :  { %1355 = vmatprep.mubr.bf16.mxu0 %v6741_v58  ;;  %1398 = vmatprep.mubr.bf16.mxu1 %v6741_v58  ;;  %v6764_v10 = vld [vmem:[#allocation10_spill] sm:$0xff] }
 0x14f   :  { %1326 = vmatpush1.bf16.msra.mxu0 %v4443_v4  ;;  %1369 = vmatpush1.bf16.msra.mxu1 %v6757_v2  ;;  %v6767_v4 = vld [vmem:[#allocation18_spill] sm:$0xff]  ;;  %v1082_v2 = vunpack.c.l.bf16 %v37_v50 }
 0x150   :  { %1327 = vmatprep.subr.bf16.mxu0 %v6758_v0  ;;  %1370 = vmatprep.subr.bf16.mxu1 %v6759_v6  ;;  %v41_v0 = vld [vmem:[%s6525_s0 + $0x68] sm:$0xff]  ;;  %v6787_v6 = vld [vmem:[#allocation37_spill] sm:$0xff] }
 0x153   :  { %1328 = vmatpush1.bf16.msra.mxu0 %v6760_v37  ;;  %1371 = vmatpush1.bf16.msra.mxu1 %v6761_v1  ;;  %v1083_v1 = vunpack.c.h.bf16 %v37_v50 }
 0x154   :  { %1329 = vmatprep.subr.bf16.mxu0 %v6762_v7  ;;  %1372 = vmatprep.subr.bf16.mxu1 %v6763_v3  ;;  %v1086_v3 = vunpack.c.l.bf16 %v41_v0 }
 0x157   :  { %1330 = vmatpush1.bf16.msra.mxu0 %v6764_v10  ;;  %1373 = vmatpush1.bf16.msra.mxu1 %v6765_v54 }
 0x158   :  { %1331 = vmatprep.subr.bf16.mxu0 %v6766_v55  ;;  %1374 = vmatprep.subr.bf16.mxu1 %v6767_v4  ;;  %v1087_v55 = vunpack.c.h.bf16 %v41_v0 }
 0x15b   :  { %1332 = vmatpush1.bf16.msra.mxu0 %v6768_v56  ;;  %1375 = vmatpush1.bf16.msra.mxu1 %v6769_v57 }
 0x15c   :  { %1333 = vmatprep.subr.bf16.mxu0 %v6770_v60  ;;  %1376 = vmatprep.subr.bf16.mxu1 %v6771_v61 }
 0x15f   :  { %1334 = vmatpush1.bf16.msra.mxu0 %v6772_v62  ;;  %1377 = vmatpush1.bf16.msra.mxu1 %v6773_v63 }
 0x160   :  { %1335 = vmatprep.subr.bf16.mxu0 %v6774_v9  ;;  %1378 = vmatprep.subr.bf16.mxu1 %v6775_v32 }
 0x163   :  { %1336 = vmatpush1.bf16.msra.mxu0 %v6776_v35  ;;  %1379 = vmatpush1.bf16.msra.mxu1 %v6777_v20 }
 0x164   :  { %1337 = vmatprep.subr.bf16.mxu0 %v6778_v26  ;;  %1380 = vmatprep.subr.bf16.mxu1 %v6779_v25 }
 0x167   :  { %1338 = vmatpush1.bf16.msra.mxu0 %v6780_v36  ;;  %1381 = vmatpush1.bf16.msra.mxu1 %v6781_v14  ;;  %v3412_v36 = vld [vmem:[%s6526_s1 + $0x190] sm:$0xff] }
 0x168   :  { %1483 = vmatprep.subr.bf16.mxu0 %v6782_v22  ;;  %1526 = vmatprep.subr.bf16.mxu1 %v6783_v59  ;;  %v3414_v59 = vld [vmem:[%s6526_s1 + $0x1b0] sm:$0xff] }
 0x1fd   :  { %v1023_v27 = vpop.f32.mrb[8].mxu0  ;;  %v1066_v18 = vpop.f32.mrb[8].mxu1 }
 0x1fe   :  { %v1024_v21 = vadd.f32 %v1023_v27, %v6784_v31  ;;  %v1025_v19 = vpop.f32.mrb[9].mxu0  ;;  %v1068_v28 = vpop.f32.mrb[9].mxu1  ;;  %v1067_v53 = vadd.f32 %v1066_v18, %v6786_v52 }
 0x1ff   :  { %v1026_v13 = vadd.f32 %v1025_v19, %v6785_v40  ;;  %v1027_v34 = vpop.f32.mrb[10].mxu0  ;;  %v1070_v41 = vpop.f32.mrb[10].mxu1  ;;  %v1069_v37 = vadd.f32 %v1068_v28, %v6787_v6  ;;  %v1241_v19 = vunpack.c.h.bf16 %v3412_v36 }
 0x200   :  { %v1088_v38 = vadd.f32 %v1080_v30, %v1024_v21  ;;  %v1028_v44 = vadd.f32 %v1027_v34, %v6784_v31  ;;  %v1029_v17 = vpop.f32.mrb[11].mxu0  ;;  %v1072_v39 = vpop.f32.mrb[11].mxu1  ;;  %v1071_v7 = vadd.f32 %v1070_v41, %v6786_v52  ;;  %v1090_v10 = vadd.f32 %v1082_v2, %v1067_v53  ;;  %v6790_v53 = vld [vmem:[#allocation41_spill] sm:$0xff] }
 0x201   :  { %v1089_v8 = vadd.f32 %v1081_v29, %v1026_v13  ;;  %v1030_v45 = vadd.f32 %v1029_v17, %v6785_v40  ;;  %v1073_v54 = vadd.f32 %v1072_v39, %v6787_v6  ;;  %v1091_v60 = vadd.f32 %v1083_v1, %v1069_v37  ;;  %v3413_v17 = vld [vmem:[%s6526_s1 + $0x198] sm:$0xff]  ;;  %v6789_v39 = vld [vmem:[#allocation40_spill] sm:$0xff] }
 0x202   :  { %v3531_v43 = vmul.f32 -1.442695, %v1088_v38  ;;  %v1092_v46 = vadd.f32 %v1084_v33, %v1028_v44  ;;  %v1094_v61 = vadd.f32 %v1086_v3, %v1071_v7  ;;  %v1240_v30 = vunpack.c.l.bf16 %v3412_v36  ;;  %v6788_v33 = vld [vmem:[#allocation39_spill] sm:$0xff] }
 0x203   :  { %v3533_v47 = vmul.f32 -1.442695, %v1089_v8  ;;  %v1093_v48 = vadd.f32 %v1085_v16, %v1030_v45  ;;  %v1095_v9 = vadd.f32 %v1087_v55, %v1073_v54  ;;  %v3535_v20 = vmul.f32 -1.442695, %v1091_v60 }
 0x204   :  { %3803 = vpow2.f32 %v3531_v43  ;;  %v3532_v49 = vmul.f32 -1.442695, %v1092_v46  ;;  %v1244_v16 = vunpack.c.l.bf16 %v3414_v59  ;;  %v1245_v43 = vunpack.c.h.bf16 %v3414_v59 }
 0x205   :  { %3805 = vpow2.f32 %v3533_v47  ;;  %v3534_v51 = vmul.f32 -1.442695, %v1093_v48  ;;  %v3536_v25 = vmul.f32 -1.442695, %v1095_v9  ;;  %v1243_v7 = vunpack.c.h.bf16 %v3413_v17 }
 0x206   :  { %3807 = vpow2.f32 %v3532_v49 }
 0x207   :  { %3809 = vpow2.f32 %v3534_v51 }
 0x208   :  { %3811 = vtanh.f32 %v1090_v10 }
 0x20e   :  { %v3804_v4 = vpop.eup %3803 }
 0x20f   :  { %v3806_v56 = vpop.eup %3805  ;;  %v1102_v57 = vadd.f32 1.0, %v3804_v4 }
 0x210   :  { %v1114_v62 = vadd.f32 1.0, %v3806_v56  ;;  %v3808_v63 = vpop.eup %3807 }
 0x211   :  { %3813 = vrcp.f32 %v1102_v57  ;;  %v1103_v32 = vadd.f32 1.0, %v3808_v63  ;;  %v3810_v35 = vpop.eup %3809 }
 0x212   :  { %3815 = vrcp.f32 %v1114_v62  ;;  %v1115_v26 = vadd.f32 1.0, %v3810_v35  ;;  %v3812_v14 = vpop.eup %3811 }
 0x213   :  { %3817 = vtanh.f32 %v1094_v61  ;;  %v3415_v61 = vld [vmem:[%s6526_s1 + $0x1b8] sm:$0xff] }
 0x214   :  { %3819 = vrcp.f32 %v1103_v32  ;;  %v1242_v32 = vunpack.c.l.bf16 %v3413_v17  ;;  %v1246_v36 = vunpack.c.l.bf16 %v3415_v61 }
 0x215   :  { %3821 = vrcp.f32 %v1115_v26  ;;  %v1247_v26 = vunpack.c.h.bf16 %v3415_v61  ;;  %v5130_v61 = vld [vmem:[%s6527_s2 + $0x14c] ss:$16 sps:$4 sm:$0xff]  }
 0x216   :  { %3823 = vpow2.f32 %v3535_v20 }
 0x217   :  { %3825 = vpow2.f32 %v3536_v25 }
 0x21b   :  { %v3814_v22 = vpop.eup %3813 }
 0x21c   :  { %v3816_v23 = vpop.eup %3815  ;;  %v1136_v12 = vmul.f32 %v3814_v22, %v3812_v14 }
 0x21d   :  { %v3818_v27 = vpop.eup %3817  ;;  %v1134_v18 = vmul.f32 %v3816_v23, %v4912_v11  ;;  %v1183_v29 = vpop.f32.mrb[12].mxu0 }
 0x21e   :  { %v1226_v21 = vpop.f32.mrb[12].mxu1  ;;  %v3820_v28 = vpop.eup %3819  ;;  %v1184_v13 = vadd.f32 %v1183_v29, %v6788_v33 }
 0x21f   :  { %v1185_v34 = vpop.f32.mrb[13].mxu0  ;;  %v1228_v41 = vpop.f32.mrb[13].mxu1  ;;  %v5053_v38 = vadd.f32 %v1136_v12, %v1134_v18  ;;  %v1137_v44 = vmul.f32 %v3820_v28, %v3818_v27  ;;  %v1227_v9 = vadd.f32 %v1226_v21, %v4921_v15 }
 0x220   :  { %v1186_v8 = vadd.f32 %v1185_v34, %v6789_v39  ;;  %v1187_v45 = vpop.f32.mrb[14].mxu0  ;;  %v1230_v11 = vpop.f32.mrb[14].mxu1  ;;  %v1248_v47 = vadd.f32 %v1240_v30, %v1184_v13  ;;  %v1229_v4 = vadd.f32 %v1228_v41, %v4925_v24 }
 0x221   :  { %v3822_v46 = vpop.eup %3821  ;;  %v1188_v48 = vadd.f32 %v1187_v45, %v6788_v33  ;;  %v1189_v49 = vpop.f32.mrb[15].mxu0  ;;  %v1231_v25 = vadd.f32 %v1230_v11, %v4921_v15  ;;  %v1250_v14 = vadd.f32 %v1242_v32, %v1227_v9  ;;  %v5151_v9 = vld [vmem:[%s6527_s2 + $0x164] ss:$16 sps:$4 sm:$0xff]   ;;  %v5157_v32 = vld [vmem:[%s6527_s2 + $0x16c] ss:$16 sps:$4 sm:$0xff]  }
 0x222   :  { %v1232_v50 = vpop.f32.mrb[15].mxu1  ;;  %v3824_v51 = vpop.eup %3823  ;;  %v1135_v2 = vmul.f32 %v3822_v46, %v6790_v53  ;;  %v1249_v0 = vadd.f32 %v1241_v19, %v1186_v8  ;;  %v1190_v37 = vadd.f32 %v1189_v49, %v6789_v39  ;;  %v3537_v1 = vmul.f32 -1.442695, %v1248_v47  ;;  %v5088_v53 = vld [vmem:[%s6527_s2 + $0x108] ss:$16 sps:$4 sm:$0xff]  }
 0x223   :  { %v1252_v3 = vadd.f32 %v1244_v16, %v1188_v48  ;;  %v3826_v10 = vpop.eup %3825  ;;  %v1128_v57 = vadd.f32 1.0, %v3824_v51  ;;  %v1251_v35 = vadd.f32 %v1243_v7, %v1229_v4  ;;  %v1233_v20 = vadd.f32 %v1232_v50, %v4925_v24  ;;  %v5082_v51 = vld [vmem:[%s6527_s2 + $0x100] ss:$16 sps:$4 sm:$0xff]  }
 0x224   :  { %v5062_v54 = vadd.f32 %v1137_v44, %v1135_v2  ;;  %v3539_v55 = vmul.f32 -1.442695, %v1249_v0  ;;  %v1253_v56 = vadd.f32 %v1245_v43, %v1190_v37  ;;  %3827 = vpow2.f32 %v3537_v1  ;;  %v5095_v37 = vld [vmem:[%s6527_s2 + $0x124] ss:$16 sps:$4 sm:$0xff]   ;;  %v5101_v1 = vld [vmem:[%s6527_s2 + $0x12c] ss:$16 sps:$4 sm:$0xff]  }
 0x225   :  { %v3538_v60 = vmul.f32 -1.442695, %v1252_v3  ;;  %v1129_v63 = vadd.f32 1.0, %v3826_v10  ;;  %v3541_v22 = vmul.f32 -1.442695, %v1251_v35  ;;  %v1255_v59 = vadd.f32 %v1247_v26, %v1233_v20 }
 0x226   :  { %3829 = vpow2.f32 %v3539_v55  ;;  %v3540_v62 = vmul.f32 -1.442695, %v1253_v56  ;;  %v1254_v23 = vadd.f32 %v1246_v36, %v1231_v25  ;;  %v5111_v4 = vld [vmem:[%s6527_s2 + $0x120] ss:$16 sps:$4 sm:$0xff]   ;;  %v5117_v56 = vld [vmem:[%s6527_s2 + $0x128] ss:$16 sps:$4 sm:$0xff]  }
 0x227   :  { %3831 = vpow2.f32 %v3538_v60  ;;  %v3542_v18 = vmul.f32 -1.442695, %v1255_v59  ;;  %v5124_v60 = vld [vmem:[%s6527_s2 + $0x144] ss:$16 sps:$4 sm:$0xff]   ;;  %v5164_v35 = vld [vmem:[%s6527_s2 + $0x160] ss:$16 sps:$4 sm:$0xff]  }
 0x228   :  { %3833 = vrcp.f32 %v1128_v57  ;;  %v5170_v20 = vld [vmem:[%s6527_s2 + $0x168] ss:$16 sps:$4 sm:$0xff]   ;;  %v5176_v26 = vld [vmem:[%s6527_s2 + $0x184] ss:$16 sps:$4 sm:$0xff]   ;;  %v5182_v25 = vld [vmem:[%s6527_s2 + $0x18c] ss:$16 sps:$4 sm:$0xff]  }
 0x229   :  { %3835 = vpow2.f32 %v3540_v62  ;;  %v5194_v59 = vld [vmem:[%s6527_s2 + $0x188] ss:$16 sps:$4 sm:$0xff]  }
 0x22a   :  { %3837 = vrcp.f32 %v1129_v63  ;;  %v5145_v63 = vld [vmem:[%s6527_s2 + $0x148] ss:$16 sps:$4 sm:$0xff]  }
 0x22b   :  { %3839 = vtanh.f32 %v5053_v38 }
 0x22c   :  { %3841 = vtanh.f32 %v5062_v54 }
 0x22d   :  { %3843 = vtanh.f32 %v1250_v14 }
 0x22e   :  { %v3828_v12 = vpop.eup %3827  ;;  %3845 = vpow2.f32 %v3541_v22  ;;  %v5188_v22 = vld [vmem:[%s6527_s2 + $0x180] ss:$16 sps:$4 sm:$0xff]  }
 0x22f   :  { %v1262_v27 = vadd.f32 1.0, %v3828_v12  ;;  %3847 = vtanh.f32 %v1254_v23  ;;  %v5200_v12 = vld [vmem:[%s6527_s2 + $0x1a4] ss:$16 sps:$4 sm:$0xff]  }
 0x230   :  { %v3830_v30 = vpop.eup %3829 }
 0x231   :  { %v1274_v29 = vadd.f32 1.0, %v3830_v30  ;;  %v3832_v21 = vpop.eup %3831  ;;  %3849 = vrcp.f32 %v1262_v27  ;;  %v5206_v30 = vld [vmem:[%s6527_s2 + $0x1ac] ss:$16 sps:$4 sm:$0xff]  }
 0x232   :  { %v3834_v19 = vpop.eup %3833  ;;  %v1263_v28 = vadd.f32 1.0, %v3832_v21  ;;  %v5221_v21 = vld [vmem:[%s6527_s2 + $0x1a8] ss:$16 sps:$4 sm:$0xff]  }
 0x233   :  { %3851 = vrcp.f32 %v1274_v29  ;;  %v3836_v13 = vpop.eup %3835  ;;  %v5215_v29 = vld [vmem:[%s6527_s2 + $0x1a0] ss:$16 sps:$4 sm:$0xff]  }
 0x234   :  { %3853 = vpow2.f32 %v3542_v18  ;;  %v3838_v34 = vpop.eup %3837  ;;  %v1275_v41 = vadd.f32 1.0, %v3836_v13  ;;  %v5233_v13 = vld [vmem:[%s6527_s2 + $0x1cc] ss:$16 sps:$4 sm:$0xff]  }
 0x235   :  { %3855 = vrcp.f32 %v1263_v28  ;;  %v3840_v16 = vpop.eup %3839  ;;  %v5227_v28 = vld [vmem:[%s6527_s2 + $0x1c4] ss:$16 sps:$4 sm:$0xff]  }
 0x236   :  { %v3842_v44 = vpop.eup %3841  ;;  %3857 = vrcp.f32 %v1275_v41  ;;  %v1142_v17 = vmul.f32 %v3840_v16, %v3834_v19  ;;  %v5242_v41 = vld [vmem:[%s6527_s2 + $0x1c0] ss:$16 sps:$4 sm:$0xff]   ;;  %v5248_v16 = vld [vmem:[%s6527_s2 + $0x1c8] ss:$16 sps:$4 sm:$0xff]  }
 0x237   :  { %v1143_v8 = vmul.f32 %v3842_v44, %v3838_v34  ;;  %v3844_v45 = vpop.eup %3843  ;;  %v5254_v44 = vld [vmem:[%s6527_s2 + $0x1e4] ss:$16 sps:$4 sm:$0xff]  }
 0x238   :  { %3543 = vst [vmem:[%s6529_s4 + $0x10] sm:$0xff] %v1142_v17  ;;  %v3846_v11 = vpop.eup %3845 }
 0x239   :  { %3544 = vst [vmem:[%s6529_s4 + $0x18] sm:$0xff] %v1143_v8  ;;  %v1322_v43 = vpack.c.bf16 %v1143_v8, %v1142_v17  ;;  %v3848_v46 = vpop.eup %3847  ;;  %v1288_v50 = vadd.f32 1.0, %v3846_v11  ;;  %v5260_v17 = vld [vmem:[%s6527_s2 + $0x1ec] ss:$16 sps:$4 sm:$0xff]   ;;  %v5266_v8 = vld [vmem:[%s6527_s2 + $0x1e0] ss:$16 sps:$4 sm:$0xff]  }
 0x23a   :  { %6791 = vst [vmem:[#allocation33_spill] sm:$0xff] %v5260_v17  ;;  %6792 = vst [vmem:[#allocation34_spill] sm:$0xff] %v5266_v8  ;;  %v5278_v11 = vld [vmem:[%s6527_s2 + $0x4] ss:$16 sps:$4 sm:$0xff]  }
 0x23b   :  { %v3850_v47 = vpop.eup %3849  ;;  %1356 = vmatmul.mubr.bf16.vlgmr.msra.gmra.mrb[16].mxu0 %v1322_v43  ;;  %1399 = vmatmul.mubr.bf16.vlgmr.msra.gmra.mrb[16].mxu1 %v1322_v43  ;;  %3859 = vrcp.f32 %v1288_v50  ;;  %6794 = vst [vmem:[#allocation6_spill] sm:$0xff] %v5278_v11  ;;  %v5284_v43 = vld [vmem:[%s6527_s2 + $0xc] ss:$16 sps:$4 sm:$0xff]   ;;  %v5316_v50 = vld [vmem:[%s6527_s2 + $0x20] ss:$16 sps:$4 sm:$0xff]  }
 0x23c   :  { %v1296_v49 = vmul.f32 %v3850_v47, %v3844_v45  ;;  %1484 = vmatpush1.bf16.msra.mxu0 %v5082_v51  ;;  %1527 = vmatpush1.bf16.msra.mxu1 %v5088_v53  ;;  %v5272_v45 = vld [vmem:[%s6527_s2 + $0x1e8] ss:$16 sps:$4 sm:$0xff]   ;;  %6795 = vst [vmem:[#allocation12_spill] sm:$0xff] %v5284_v43  ;;  %6800 = vst [vmem:[#allocation10_spill] sm:$0xff] %v5316_v50 }
 0x23d   :  { %v3852_v48 = vpop.eup %3851  ;;  %1485 = vmatprep.subr.bf16.mxu0 %v5095_v37  ;;  %1528 = vmatprep.subr.bf16.mxu1 %v5101_v1  ;;  %6793 = vst [vmem:[#allocation9_spill] sm:$0xff] %v5272_v45  ;;  %v5296_v47 = vld [vmem:[%s6527_s2 + $0x8] ss:$16 sps:$4 sm:$0xff]  }
 0x23e   :  { %v3854_v2 = vpop.eup %3853  ;;  %v1294_v0 = vmul.f32 %v3852_v48, %v4959_v5  ;;  %1515 = vmatprep.mubr.bf16.mxu0 %v6741_v58  ;;  %1558 = vmatprep.mubr.bf16.mxu1 %v6741_v58  ;;  %6797 = vst [vmem:[#allocation13_spill] sm:$0xff] %v5296_v47  ;;  %v5302_v48 = vld [vmem:[%s6527_s2 + $0x24] ss:$16 sps:$4 sm:$0xff]  }
 0x23f   :  { %v3856_v7 = vpop.eup %3855  ;;  %v1289_v55 = vadd.f32 1.0, %v3854_v2  ;;  %6798 = vst [vmem:[#allocation8_spill] sm:$0xff] %v5302_v48  ;;  %v5322_v2 = vld [vmem:[%s6527_s2 + $0x28] ss:$16 sps:$4 sm:$0xff]  }
 0x240   :  { %v5106_v5 = vadd.f32 %v1296_v49, %v1294_v0  ;;  %v1297_v3 = vmul.f32 %v3856_v7, %v3848_v46  ;;  %v3858_v10 = vpop.eup %3857  ;;  %1486 = vmatpush1.bf16.msra.mxu0 %v5111_v4  ;;  %1529 = vmatpush1.bf16.msra.mxu1 %v5117_v56  ;;  %v5290_v46 = vld [vmem:[%s6527_s2] ss:$16 sps:$4 sm:$0xff]   ;;  %v5308_v49 = vld [vmem:[%s6527_s2 + $0x2c] ss:$16 sps:$4 sm:$0xff]   ;;  %6801 = vst [vmem:[#allocation17_spill] sm:$0xff] %v5322_v2 }
 0x241   :  { %v1295_v57 = vmul.f32 %v3858_v10, %v4966_v42  ;;  %1487 = vmatprep.subr.bf16.mxu0 %v5124_v60  ;;  %1530 = vmatprep.subr.bf16.mxu1 %v5130_v61  ;;  %v5139_v42 = vld [vmem:[%s6527_s2 + $0x140] ss:$16 sps:$4 sm:$0xff]   ;;  %6796 = vst [vmem:[#allocation7_spill] sm:$0xff] %v5290_v46  ;;  %6799 = vst [vmem:[#allocation14_spill] sm:$0xff] %v5308_v49  ;;  %v5328_v0 = vld [vmem:[%s6527_s2 + $0x44] ss:$16 sps:$4 sm:$0xff]  }
 0x242   :  { %3861 = vtanh.f32 %v5106_v5  ;;  %6802 = vst [vmem:[#allocation11_spill] sm:$0xff] %v5328_v0  ;;  %v5334_v7 = vld [vmem:[%s6527_s2 + $0x4c] ss:$16 sps:$4 sm:$0xff]   ;;  %v5346_v10 = vld [vmem:[%s6527_s2 + $0x48] ss:$16 sps:$4 sm:$0xff]  }
 0x243   :  { %v5134_v62 = vadd.f32 %v1297_v3, %v1295_v57  ;;  %3863 = vrcp.f32 %v1289_v55  ;;  %6803 = vst [vmem:[#allocation18_spill] sm:$0xff] %v5334_v7  ;;  %v5340_v3 = vld [vmem:[%s6527_s2 + $0x40] ss:$16 sps:$4 sm:$0xff]   ;;  %6805 = vst [vmem:[#allocation21_spill] sm:$0xff] %v5346_v10  ;;  %v5352_v55 = vld [vmem:[%s6527_s2 + $0x64] ss:$16 sps:$4 sm:$0xff]  }
 0x244   :  { %1488 = vmatpush1.bf16.msra.mxu0 %v5139_v42  ;;  %1531 = vmatpush1.bf16.msra.mxu1 %v5145_v63  ;;  %6804 = vst [vmem:[#allocation15_spill] sm:$0xff] %v5340_v3  ;;  %6806 = vst [vmem:[#allocation16_spill] sm:$0xff] %v5352_v55  ;;  %v5358_v57 = vld [vmem:[%s6527_s2 + $0x6c] ss:$16 sps:$4 sm:$0xff]  }
 0x245   :  { %1489 = vmatprep.subr.bf16.mxu0 %v5151_v9  ;;  %1532 = vmatprep.subr.bf16.mxu1 %v5157_v32  ;;  %3865 = vtanh.f32 %v5134_v62  ;;  %v3860_v36 = vpop.eup %3859  ;;  %6807 = vst [vmem:[#allocation22_spill] sm:$0xff] %v5358_v57 }
 0x248   :  { %1490 = vmatpush1.bf16.msra.mxu0 %v5164_v35  ;;  %1533 = vmatpush1.bf16.msra.mxu1 %v5170_v20 }
 0x249   :  { %1491 = vmatprep.subr.bf16.mxu0 %v5176_v26  ;;  %1534 = vmatprep.subr.bf16.mxu1 %v5182_v25 }
 0x24c   :  { %v3862_v14 = vpop.eup %3861  ;;  %1492 = vmatpush1.bf16.msra.mxu0 %v5188_v22  ;;  %1535 = vmatpush1.bf16.msra.mxu1 %v5194_v59 }
 0x24d   :  { %v1302_v23 = vmul.f32 %v3862_v14, %v3860_v36  ;;  %1493 = vmatprep.subr.bf16.mxu0 %v5200_v12  ;;  %1536 = vmatprep.subr.bf16.mxu1 %v5206_v30  ;;  %v3864_v27 = vpop.eup %3863  ;;  %v5364_v36 = vld [vmem:[%s6527_s2 + $0x60] ss:$16 sps:$4 sm:$0xff]   ;;  %v5370_v14 = vld [vmem:[%s6527_s2 + $0x68] ss:$16 sps:$4 sm:$0xff]  }
 0x24e   :  { %6808 = vst [vmem:[#allocation19_spill] sm:$0xff] %v5364_v36  ;;  %6809 = vst [vmem:[#allocation25_spill] sm:$0xff] %v5370_v14 }
 0x24f   :  { %3545 = vst [vmem:[%s6530_s5 + $0x60] sm:$0xff] %v1302_v23  ;;  %v3866_v18 = vpop.eup %3865 }
 0x250   :  { %1494 = vmatpush1.bf16.msra.mxu0 %v5215_v29  ;;  %1537 = vmatpush1.bf16.msra.mxu1 %v5221_v21  ;;  %v1303_v19 = vmul.f32 %v3866_v18, %v3864_v27  ;;  %v5382_v27 = vld [vmem:[%s6527_s2 + $0x8c] ss:$16 sps:$4 sm:$0xff]   ;;  %v5388_v18 = vld [vmem:[%s6527_s2 + $0x80] ss:$16 sps:$4 sm:$0xff]  }
 0x251   :  { %1495 = vmatprep.subr.bf16.mxu0 %v5227_v28  ;;  %1538 = vmatprep.subr.bf16.mxu1 %v5233_v13  ;;  %6811 = vst [vmem:[#allocation26_spill] sm:$0xff] %v5382_v27  ;;  %6812 = vst [vmem:[#allocation23_spill] sm:$0xff] %v5388_v18 }
 0x252   :  { %3546 = vst [vmem:[%s6530_s5 + $0x68] sm:$0xff] %v1303_v19  ;;  %v1482_v34 = vpack.c.bf16 %v1303_v19, %v1302_v23  ;;  %v5376_v23 = vld [vmem:[%s6527_s2 + $0x84] ss:$16 sps:$4 sm:$0xff]   ;;  %v5394_v19 = vld [vmem:[%s6527_s2 + $0x88] ss:$16 sps:$4 sm:$0xff]  }
 0x253   :  { %6810 = vst [vmem:[#allocation20_spill] sm:$0xff] %v5376_v23  ;;  %6813 = vst [vmem:[#allocation29_spill] sm:$0xff] %v5394_v19 }
 0x254   :  { %1496 = vmatpush1.bf16.msra.mxu0 %v5242_v41  ;;  %1539 = vmatpush1.bf16.msra.mxu1 %v5248_v16 }
 0x255   :  { %1497 = vmatprep.subr.bf16.mxu0 %v5254_v44  ;;  %1540 = vmatprep.subr.bf16.mxu1 %v5260_v17 }
 0x258   :  { %1498 = vmatpush1.bf16.msra.mxu0 %v5266_v8  ;;  %1541 = vmatpush1.bf16.msra.mxu1 %v5272_v45 }
 0x259   :  { %1657 = vmatprep.subr.bf16.mxu0 %v5278_v11  ;;  %1700 = vmatprep.subr.bf16.mxu1 %v5284_v43 }
 0x25b   :  { %1516 = vmatmul.mubr.bf16.vlgmr.msra.gmra.mrb[20].mxu0 %v1482_v34  ;;  %1559 = vmatmul.mubr.bf16.vlgmr.msra.gmra.mrb[20].mxu1 %v1482_v34  ;;  %v5400_v34 = vld [vmem:[%s6527_s2 + $0xa4] ss:$16 sps:$4 sm:$0xff]  }
 0x25c   :  { %1658 = vmatpush1.bf16.msra.mxu0 %v5290_v46  ;;  %1701 = vmatpush1.bf16.msra.mxu1 %v5296_v47  ;;  %6814 = vst [vmem:[#allocation24_spill] sm:$0xff] %v5400_v34 }
 0x25d   :  { %1659 = vmatprep.subr.bf16.mxu0 %v5302_v48  ;;  %1702 = vmatprep.subr.bf16.mxu1 %v5308_v49 }
 0x25e   :  { %1689 = vmatprep.mubr.bf16.mxu0 %v6741_v58  ;;  %1732 = vmatprep.mubr.bf16.mxu1 %v6741_v58 }
 0x260   :  { %1660 = vmatpush1.bf16.msra.mxu0 %v5316_v50  ;;  %1703 = vmatpush1.bf16.msra.mxu1 %v5322_v2 }
 0x261   :  { %1661 = vmatprep.subr.bf16.mxu0 %v5328_v0  ;;  %1704 = vmatprep.subr.bf16.mxu1 %v5334_v7 }
 0x264   :  { %1662 = vmatpush1.bf16.msra.mxu0 %v5340_v3  ;;  %1705 = vmatpush1.bf16.msra.mxu1 %v5346_v10 }
 0x265   :  { %1663 = vmatprep.subr.bf16.mxu0 %v5352_v55  ;;  %1706 = vmatprep.subr.bf16.mxu1 %v5358_v57 }
 0x268   :  { %1664 = vmatpush1.bf16.msra.mxu0 %v5364_v36  ;;  %1707 = vmatpush1.bf16.msra.mxu1 %v5370_v14 }
 0x269   :  { %1665 = vmatprep.subr.bf16.mxu0 %v5376_v23  ;;  %1708 = vmatprep.subr.bf16.mxu1 %v5382_v27  ;;  %v5406_v27 = vld [vmem:[%s6527_s2 + $0xac] ss:$16 sps:$4 sm:$0xff]  }
 0x26a   :  { %6815 = vst [vmem:[#allocation30_spill] sm:$0xff] %v5406_v27 }
 0x26c   :  { %1666 = vmatpush1.bf16.msra.mxu0 %v5388_v18  ;;  %1709 = vmatpush1.bf16.msra.mxu1 %v5394_v19  ;;  %v5412_v18 = vld [vmem:[%s6527_s2 + $0xa0] ss:$16 sps:$4 sm:$0xff]   ;;  %v5418_v19 = vld [vmem:[%s6527_s2 + $0xa8] ss:$16 sps:$4 sm:$0xff]  }
 0x26d   :  { %1667 = vmatprep.subr.bf16.mxu0 %v5400_v34  ;;  %1710 = vmatprep.subr.bf16.mxu1 %v5406_v27  ;;  %6816 = vst [vmem:[#allocation27_spill] sm:$0xff] %v5412_v18  ;;  %6817 = vst [vmem:[#allocation31_spill] sm:$0xff] %v5418_v19  ;;  %v5424_v34 = vld [vmem:[%s6527_s2 + $0xc4] ss:$16 sps:$4 sm:$0xff]   ;;  %v5430_v27 = vld [vmem:[%s6527_s2 + $0xcc] ss:$16 sps:$4 sm:$0xff]  }
 0x26e   :  { %6818 = vst [vmem:[#allocation28_spill] sm:$0xff] %v5424_v34  ;;  %6819 = vst [vmem:[#allocation32_spill] sm:$0xff] %v5430_v27 }
 0x270   :  { %1668 = vmatpush1.bf16.msra.mxu0 %v5412_v18  ;;  %1711 = vmatpush1.bf16.msra.mxu1 %v5418_v19  ;;  %v5436_v18 = vld [vmem:[%s6527_s2 + $0xc0] ss:$16 sps:$4 sm:$0xff]   ;;  %v5442_v19 = vld [vmem:[%s6527_s2 + $0xc8] ss:$16 sps:$4 sm:$0xff]  }
 0x271   :  { %1669 = vmatprep.subr.bf16.mxu0 %v5424_v34  ;;  %1712 = vmatprep.subr.bf16.mxu1 %v5430_v27  ;;  %6820 = vst [vmem:[#allocation39_spill] sm:$0xff] %v5436_v18  ;;  %6821 = vst [vmem:[#allocation40_spill] sm:$0xff] %v5442_v19  ;;  %v5448_v34 = vld [vmem:[%s6527_s2 + $0xe4] ss:$16 sps:$4 sm:$0xff]   ;;  %v5454_v27 = vld [vmem:[%s6527_s2 + $0xec] ss:$16 sps:$4 sm:$0xff]  }
 0x272   :  { %6822 = vst [vmem:[#allocation41_spill] sm:$0xff] %v5448_v34  ;;  %6823 = vst [vmem:[#allocation42_spill] sm:$0xff] %v5454_v27 }
 0x274   :  { %1670 = vmatpush1.bf16.msra.mxu0 %v5436_v18  ;;  %1713 = vmatpush1.bf16.msra.mxu1 %v5442_v19  ;;  %v5460_v18 = vld [vmem:[%s6527_s2 + $0xe0] ss:$16 sps:$4 sm:$0xff]   ;;  %v5466_v19 = vld [vmem:[%s6527_s2 + $0xe8] ss:$16 sps:$4 sm:$0xff]  }
 0x275   :  { %1671 = vmatprep.subr.bf16.mxu0 %v5448_v34  ;;  %1714 = vmatprep.subr.bf16.mxu1 %v5454_v27  ;;  %6824 = vst [vmem:[#allocation43_spill] sm:$0xff] %v5460_v18  ;;  %6825 = vst [vmem:[#allocation44_spill] sm:$0xff] %v5466_v19  ;;  %v5472_v34 = vld [vmem:[%s6527_s2 + $0x104] ss:$16 sps:$4 sm:$0xff]   ;;  %v5478_v27 = vld [vmem:[%s6527_s2 + $0x10c] ss:$16 sps:$4 sm:$0xff]  }
 0x276   :  { %6826 = vst [vmem:[#allocation45_spill] sm:$0xff] %v5472_v34  ;;  %6827 = vst [vmem:[#allocation46_spill] sm:$0xff] %v5478_v27 }
 0x278   :  { %1672 = vmatpush1.bf16.msra.mxu0 %v5460_v18  ;;  %1715 = vmatpush1.bf16.msra.mxu1 %v5466_v19  ;;  %v43_v18 = vld [vmem:[%s6525_s0 + $0x80] sm:$0xff] }
 0x279   :  { %1817 = vmatprep.subr.bf16.mxu0 %v5472_v34  ;;  %1860 = vmatprep.subr.bf16.mxu1 %v5478_v27  ;;  %v47_v19 = vld [vmem:[%s6525_s0 + $0xa0] sm:$0xff]  ;;  %v1414_v23 = vunpack.c.l.bf16 %v43_v18  ;;  %v1415_v57 = vunpack.c.h.bf16 %v43_v18 }
 0x27a   :  { %v1418_v3 = vunpack.c.l.bf16 %v47_v19  ;;  %v1419_v2 = vunpack.c.h.bf16 %v47_v19 }
 0x30e   :  { %v1357_v14 = vpop.f32.mrb[16].mxu0  ;;  %v1400_v36 = vpop.f32.mrb[16].mxu1 }
 0x30f   :  { %v1358_v34 = vadd.f32 %v1357_v14, %v6784_v31  ;;  %v1359_v55 = vpop.f32.mrb[17].mxu0  ;;  %v1402_v10 = vpop.f32.mrb[17].mxu1 }
 0x310   :  { %v1360_v7 = vadd.f32 %v1359_v55, %v6785_v40  ;;  %v1361_v27 = vpop.f32.mrb[18].mxu0  ;;  %v1404_v0 = vpop.f32.mrb[18].mxu1  ;;  %v45_v55 = vld [vmem:[%s6525_s0 + $0x88] sm:$0xff] }
 0x311   :  { %v1422_v50 = vadd.f32 %v1414_v23, %v1358_v34  ;;  %v1362_v49 = vadd.f32 %v1361_v27, %v6784_v31  ;;  %v1363_v48 = vpop.f32.mrb[19].mxu0  ;;  %v1406_v47 = vpop.f32.mrb[19].mxu1  ;;  %v1401_v23 = vadd.f32 %v1400_v36, %v6786_v52  ;;  %v1416_v27 = vunpack.c.l.bf16 %v45_v55 }
 0x312   :  { %v1423_v46 = vadd.f32 %v1415_v57, %v1360_v7  ;;  %v1364_v43 = vadd.f32 %v1363_v48, %v6785_v40  ;;  %v49_v48 = vld [vmem:[%s6525_s0 + $0xa8] sm:$0xff] }
 0x313   :  { %v3547_v11 = vmul.f32 -1.442695, %v1422_v50  ;;  %v1426_v18 = vadd.f32 %v1418_v3, %v1362_v49  ;;  %v1420_v49 = vunpack.c.l.bf16 %v49_v48  ;;  %v1424_v50 = vadd.f32 %v1416_v27, %v1401_v23 }
 0x314   :  { %v3549_v45 = vmul.f32 -1.442695, %v1423_v46  ;;  %v1427_v14 = vadd.f32 %v1419_v2, %v1364_v43  ;;  %v1403_v46 = vadd.f32 %v1402_v10, %v6787_v6  ;;  %v1417_v43 = vunpack.c.h.bf16 %v45_v55 }
 0x315   :  { %3867 = vpow2.f32 %v3547_v11  ;;  %v3548_v8 = vmul.f32 -1.442695, %v1426_v18  ;;  %v1405_v11 = vadd.f32 %v1404_v0, %v6786_v52  ;;  %v1407_v2 = vadd.f32 %v1406_v47, %v6787_v6  ;;  %v3408_v47 = vld [vmem:[%s6526_s1 + $0x150] sm:$0xff] }
 0x316   :  { %3869 = vpow2.f32 %v3549_v45  ;;  %v3550_v19 = vmul.f32 -1.442695, %v1427_v14  ;;  %v1421_v45 = vunpack.c.h.bf16 %v49_v48  ;;  %v1425_v57 = vadd.f32 %v1417_v43, %v1403_v46  ;;  %v3410_v46 = vld [vmem:[%s6526_s1 + $0x170] sm:$0xff] }
 0x317   :  { %3871 = vpow2.f32 %v3548_v8  ;;  %v1428_v36 = vadd.f32 %v1420_v49, %v1405_v11  ;;  %v1574_v49 = vunpack.c.l.bf16 %v3408_v47 }
 0x318   :  { %3873 = vpow2.f32 %v3550_v19  ;;  %v1429_v14 = vadd.f32 %v1421_v45, %v1407_v2  ;;  %v3551_v19 = vmul.f32 -1.442695, %v1425_v57 }
 0x319   :  { %3875 = vtanh.f32 %v1424_v50 }
 0x31a   :  { %v3552_v23 = vmul.f32 -1.442695, %v1429_v14 }
 0x31f   :  { %v3868_v7 = vpop.eup %3867 }
 0x320   :  { %v3870_v8 = vpop.eup %3869  ;;  %v1436_v3 = vadd.f32 1.0, %v3868_v7 }
 0x321   :  { %v1448_v34 = vadd.f32 1.0, %v3870_v8  ;;  %v3872_v18 = vpop.eup %3871  ;;  %v1575_v8 = vunpack.c.h.bf16 %v3408_v47 }
 0x322   :  { %3877 = vrcp.f32 %v1436_v3  ;;  %v1437_v10 = vadd.f32 1.0, %v3872_v18  ;;  %v3874_v55 = vpop.eup %3873  ;;  %v1578_v18 = vunpack.c.l.bf16 %v3410_v46 }
 0x323   :  { %3879 = vrcp.f32 %v1448_v34  ;;  %v1449_v0 = vadd.f32 1.0, %v3874_v55  ;;  %v3876_v27 = vpop.eup %3875  ;;  %v3409_v55 = vld [vmem:[%s6526_s1 + $0x158] sm:$0xff] }
 0x324   :  { %3881 = vtanh.f32 %v1428_v36  ;;  %v1577_v52 = vunpack.c.h.bf16 %v3409_v55 }
 0x325   :  { %3883 = vrcp.f32 %v1437_v10 }
 0x326   :  { %3885 = vrcp.f32 %v1449_v0 }
 0x327   :  { %3887 = vpow2.f32 %v3551_v19 }
 0x328   :  { %3889 = vpow2.f32 %v3552_v23  ;;  %v1579_v23 = vunpack.c.h.bf16 %v3410_v46 }
 0x32c   :  { %v3878_v48 = vpop.eup %3877 }
 0x32d   :  { %v3880_v43 = vpop.eup %3879  ;;  %v1470_v11 = vmul.f32 %v3878_v48, %v3876_v27 }
 0x32e   :  { %v3882_v50 = vpop.eup %3881  ;;  %v1468_v2 = vmul.f32 %v3880_v43, %v5053_v38  ;;  %v1517_v45 = vpop.f32.mrb[20].mxu0 }
 0x32f   :  { %v1560_v7 = vpop.f32.mrb[20].mxu1  ;;  %v3884_v3 = vpop.eup %3883  ;;  %v1518_v57 = vadd.f32 %v1517_v45, %v6788_v33 }
 0x330   :  { %v1519_v36 = vpop.f32.mrb[21].mxu0  ;;  %v1562_v34 = vpop.f32.mrb[21].mxu1  ;;  %v5509_v14 = vadd.f32 %v1470_v11, %v1468_v2  ;;  %v1471_v10 = vmul.f32 %v3884_v3, %v3882_v50 }
 0x331   :  { %v1520_v19 = vadd.f32 %v1519_v36, %v6789_v39  ;;  %v1521_v0 = vpop.f32.mrb[22].mxu0  ;;  %v1564_v38 = vpop.f32.mrb[22].mxu1  ;;  %v1582_v47 = vadd.f32 %v1574_v49, %v1518_v57  ;;  %v1563_v46 = vadd.f32 %v1562_v34, %v4925_v24 }
 0x332   :  { %v3886_v27 = vpop.eup %3885  ;;  %v1522_v48 = vadd.f32 %v1521_v0, %v6788_v33  ;;  %v1523_v43 = vpop.f32.mrb[23].mxu0 }
 0x333   :  { %v1566_v45 = vpop.f32.mrb[23].mxu1  ;;  %v3888_v6 = vpop.eup %3887  ;;  %v1469_v11 = vmul.f32 %v3886_v27, %v5062_v54  ;;  %v1583_v2 = vadd.f32 %v1575_v8, %v1520_v19  ;;  %v1524_v50 = vadd.f32 %v1523_v43, %v6789_v39  ;;  %v3553_v3 = vmul.f32 -1.442695, %v1582_v47  ;;  %v3411_v54 = vld [vmem:[%s6526_s1 + $0x178] sm:$0xff] }
 0x334   :  { %v1586_v40 = vadd.f32 %v1578_v18, %v1522_v48  ;;  %v3890_v31 = vpop.eup %3889  ;;  %v1462_v57 = vadd.f32 1.0, %v3888_v6  ;;  %v1561_v27 = vadd.f32 %v1560_v7, %v4921_v15  ;;  %v1576_v18 = vunpack.c.l.bf16 %v3409_v55 }
 0x335   :  { %v5518_v36 = vadd.f32 %v1471_v10, %v1469_v11  ;;  %v3555_v17 = vmul.f32 -1.442695, %v1583_v2  ;;  %v1587_v49 = vadd.f32 %v1579_v23, %v1524_v50  ;;  %3891 = vpow2.f32 %v3553_v3 }
 0x336   :  { %v3554_v0 = vmul.f32 -1.442695, %v1586_v40  ;;  %v1463_v19 = vadd.f32 1.0, %v3890_v31  ;;  %v1585_v47 = vadd.f32 %v1577_v52, %v1563_v46  ;;  %v1567_v10 = vadd.f32 %v1566_v45, %v4925_v24 }
 0x337   :  { %3893 = vpow2.f32 %v3555_v17  ;;  %v3556_v8 = vmul.f32 -1.442695, %v1587_v49  ;;  %v1581_v48 = vunpack.c.h.bf16 %v3411_v54  ;;  %v1565_v6 = vadd.f32 %v1564_v38, %v4921_v15 }
 0x338   :  { %3895 = vpow2.f32 %v3554_v0  ;;  %v1580_v34 = vunpack.c.l.bf16 %v3411_v54  ;;  %v1584_v40 = vadd.f32 %v1576_v18, %v1561_v27  ;;  %v3557_v23 = vmul.f32 -1.442695, %v1585_v47 }
 0x339   :  { %3897 = vrcp.f32 %v1462_v57  ;;  %v1589_v43 = vadd.f32 %v1581_v48, %v1567_v10 }
 0x33a   :  { %3899 = vpow2.f32 %v3556_v8  ;;  %v1588_v31 = vadd.f32 %v1580_v34, %v1565_v6 }
 0x33b   :  { %3901 = vrcp.f32 %v1463_v19  ;;  %v3558_v55 = vmul.f32 -1.442695, %v1589_v43 }
 0x33c   :  { %3903 = vtanh.f32 %v5509_v14 }
 0x33d   :  { %3905 = vtanh.f32 %v5518_v36 }
 0x33e   :  { %3907 = vtanh.f32 %v1584_v40 }
 0x33f   :  { %v3892_v17 = vpop.eup %3891  ;;  %3909 = vpow2.f32 %v3557_v23 }
 0x340   :  { %v1596_v7 = vadd.f32 1.0, %v3892_v17  ;;  %3911 = vtanh.f32 %v1588_v31 }
 0x341   :  { %v3894_v52 = vpop.eup %3893 }
 0x342   :  { %v1608_v45 = vadd.f32 1.0, %v3894_v52  ;;  %v3896_v38 = vpop.eup %3895  ;;  %3913 = vrcp.f32 %v1596_v7 }
 0x343   :  { %v3898_v11 = vpop.eup %3897  ;;  %v1597_v2 = vadd.f32 1.0, %v3896_v38 }
 0x344   :  { %3915 = vrcp.f32 %v1608_v45  ;;  %v3900_v50 = vpop.eup %3899 }
 0x345   :  { %3917 = vpow2.f32 %v3558_v55  ;;  %v3902_v3 = vpop.eup %3901  ;;  %v1609_v46 = vadd.f32 1.0, %v3900_v50 }
 0x346   :  { %3919 = vrcp.f32 %v1597_v2  ;;  %v3904_v49 = vpop.eup %3903 }
 0x347   :  { %v3906_v57 = vpop.eup %3905  ;;  %3921 = vrcp.f32 %v1609_v46  ;;  %v1476_v0 = vmul.f32 %v3904_v49, %v3898_v11  ;;  %v6829_v46 = vld [vmem:[#allocation34_spill] sm:$0xff]  ;;  %v6830_v49 = vld [vmem:[#allocation9_spill] sm:$0xff] }
 0x348   :  { %v1477_v54 = vmul.f32 %v3906_v57, %v3902_v3  ;;  %v3908_v8 = vpop.eup %3907  ;;  %v6828_v3 = vld [vmem:[#allocation33_spill] sm:$0xff]  ;;  %v6831_v57 = vld [vmem:[#allocation6_spill] sm:$0xff] }
 0x349   :  { %3559 = vst [vmem:[%s6529_s4 + $0x20] sm:$0xff] %v1476_v0  ;;  %v3910_v19 = vpop.eup %3909 }
 0x34a   :  { %3560 = vst [vmem:[%s6529_s4 + $0x28] sm:$0xff] %v1477_v54  ;;  %v1656_v27 = vpack.c.bf16 %v1477_v54, %v1476_v0  ;;  %v3912_v18 = vpop.eup %3911  ;;  %v1622_v6 = vadd.f32 1.0, %v3910_v19  ;;  %v6832_v0 = vld [vmem:[#allocation12_spill] sm:$0xff]  ;;  %v6833_v54 = vld [vmem:[#allocation7_spill] sm:$0xff] }
 0x34b   :  { %v6835_v19 = vld [vmem:[#allocation8_spill] sm:$0xff] }
 0x34c   :  { %v3914_v47 = vpop.eup %3913  ;;  %1690 = vmatmul.mubr.bf16.vlgmr.msra.gmra.mrb[24].mxu0 %v1656_v27  ;;  %1733 = vmatmul.mubr.bf16.vlgmr.msra.gmra.mrb[24].mxu1 %v1656_v27  ;;  %3923 = vrcp.f32 %v1622_v6  ;;  %v6836_v27 = vld [vmem:[#allocation14_spill] sm:$0xff]  ;;  %v6841_v6 = vld [vmem:[#allocation15_spill] sm:$0xff] }
 0x34d   :  { %v1630_v48 = vmul.f32 %v3914_v47, %v3908_v8  ;;  %1818 = vmatpush1.bf16.msra.mxu0 %v5082_v51  ;;  %1861 = vmatpush1.bf16.msra.mxu1 %v5088_v53  ;;  %v6834_v8 = vld [vmem:[#allocation13_spill] sm:$0xff] }
 0x34e   :  { %v3916_v10 = vpop.eup %3915  ;;  %1819 = vmatprep.subr.bf16.mxu0 %v5095_v37  ;;  %1862 = vmatprep.subr.bf16.mxu1 %v5101_v1  ;;  %v6838_v47 = vld [vmem:[#allocation17_spill] sm:$0xff] }
 0x34f   :  { %v3918_v34 = vpop.eup %3917  ;;  %v1628_v40 = vmul.f32 %v3916_v10, %v5106_v5  ;;  %1849 = vmatprep.mubr.bf16.mxu0 %v6741_v58  ;;  %1892 = vmatprep.mubr.bf16.mxu1 %v6741_v58  ;;  %v6839_v10 = vld [vmem:[#allocation11_spill] sm:$0xff] }
 0x350   :  { %v3920_v23 = vpop.eup %3919  ;;  %v1623_v52 = vadd.f32 1.0, %v3918_v34  ;;  %v6842_v34 = vld [vmem:[#allocation21_spill] sm:$0xff] }
 0x351   :  { %v5542_v43 = vadd.f32 %v1630_v48, %v1628_v40  ;;  %v1631_v31 = vmul.f32 %v3920_v23, %v3912_v18  ;;  %v3922_v17 = vpop.eup %3921  ;;  %1820 = vmatpush1.bf16.msra.mxu0 %v5111_v4  ;;  %1863 = vmatpush1.bf16.msra.mxu1 %v5117_v56  ;;  %v6837_v18 = vld [vmem:[#allocation10_spill] sm:$0xff]  ;;  %v6843_v40 = vld [vmem:[#allocation16_spill] sm:$0xff] }
 0x352   :  { %v1629_v5 = vmul.f32 %v3922_v17, %v5134_v62  ;;  %1821 = vmatprep.subr.bf16.mxu0 %v5124_v60  ;;  %1864 = vmatprep.subr.bf16.mxu1 %v5130_v61  ;;  %v6840_v48 = vld [vmem:[#allocation18_spill] sm:$0xff]  ;;  %v6846_v17 = vld [vmem:[#allocation25_spill] sm:$0xff] }
 0x353   :  { %3925 = vtanh.f32 %v5542_v43  ;;  %v6844_v23 = vld [vmem:[#allocation22_spill] sm:$0xff] }
 0x354   :  { %v5550_v7 = vadd.f32 %v1631_v31, %v1629_v5  ;;  %3927 = vrcp.f32 %v1623_v52  ;;  %v6845_v31 = vld [vmem:[#allocation19_spill] sm:$0xff]  ;;  %v6847_v52 = vld [vmem:[#allocation20_spill] sm:$0xff]  ;;  %v6848_v5 = vld [vmem:[#allocation26_spill] sm:$0xff] }
 0x355   :  { %1822 = vmatpush1.bf16.msra.mxu0 %v5139_v42  ;;  %1865 = vmatpush1.bf16.msra.mxu1 %v5145_v63 }
 0x356   :  { %1823 = vmatprep.subr.bf16.mxu0 %v5151_v9  ;;  %1866 = vmatprep.subr.bf16.mxu1 %v5157_v32  ;;  %3929 = vtanh.f32 %v5550_v7  ;;  %v3924_v62 = vpop.eup %3923 }
 0x359   :  { %1824 = vmatpush1.bf16.msra.mxu0 %v5164_v35  ;;  %1867 = vmatpush1.bf16.msra.mxu1 %v5170_v20 }
 0x35a   :  { %1825 = vmatprep.subr.bf16.mxu0 %v5176_v26  ;;  %1868 = vmatprep.subr.bf16.mxu1 %v5182_v25 }
 0x35d   :  { %v3926_v55 = vpop.eup %3925  ;;  %1826 = vmatpush1.bf16.msra.mxu0 %v5188_v22  ;;  %1869 = vmatpush1.bf16.msra.mxu1 %v5194_v59 }
 0x35e   :  { %v1636_v45 = vmul.f32 %v3926_v55, %v3924_v62  ;;  %1827 = vmatprep.subr.bf16.mxu0 %v5200_v12  ;;  %1870 = vmatprep.subr.bf16.mxu1 %v5206_v30  ;;  %v3928_v38 = vpop.eup %3927  ;;  %v6849_v62 = vld [vmem:[#allocation23_spill] sm:$0xff]  ;;  %v6850_v55 = vld [vmem:[#allocation29_spill] sm:$0xff] }
 0x360   :  { %3561 = vst [vmem:[%s6530_s5 + $0x50] sm:$0xff] %v1636_v45  ;;  %v3930_v11 = vpop.eup %3929 }
 0x361   :  { %1828 = vmatpush1.bf16.msra.mxu0 %v5215_v29  ;;  %1871 = vmatpush1.bf16.msra.mxu1 %v5221_v21  ;;  %v1637_v2 = vmul.f32 %v3930_v11, %v3928_v38  ;;  %v6852_v38 = vld [vmem:[#allocation30_spill] sm:$0xff]  ;;  %v6853_v11 = vld [vmem:[#allocation27_spill] sm:$0xff] }
 0x362   :  { %1829 = vmatprep.subr.bf16.mxu0 %v5227_v28  ;;  %1872 = vmatprep.subr.bf16.mxu1 %v5233_v13 }
 0x363   :  { %3562 = vst [vmem:[%s6530_s5 + $0x58] sm:$0xff] %v1637_v2  ;;  %v1816_v50 = vpack.c.bf16 %v1637_v2, %v1636_v45  ;;  %v6851_v45 = vld [vmem:[#allocation24_spill] sm:$0xff]  ;;  %v6854_v2 = vld [vmem:[#allocation31_spill] sm:$0xff] }
 0x365   :  { %1830 = vmatpush1.bf16.msra.mxu0 %v5242_v41  ;;  %1873 = vmatpush1.bf16.msra.mxu1 %v5248_v16 }
 0x366   :  { %1831 = vmatprep.subr.bf16.mxu0 %v5254_v44  ;;  %1874 = vmatprep.subr.bf16.mxu1 %v6828_v3 }
 0x369   :  { %1832 = vmatpush1.bf16.msra.mxu0 %v6829_v46  ;;  %1875 = vmatpush1.bf16.msra.mxu1 %v6830_v49 }
 0x36a   :  { %1991 = vmatprep.subr.bf16.mxu0 %v6831_v57  ;;  %2034 = vmatprep.subr.bf16.mxu1 %v6832_v0 }
 0x36c   :  { %1850 = vmatmul.mubr.bf16.vlgmr.msra.gmra.mrb[28].mxu0 %v1816_v50  ;;  %1893 = vmatmul.mubr.bf16.vlgmr.msra.gmra.mrb[28].mxu1 %v1816_v50  ;;  %v6855_v50 = vld [vmem:[#allocation28_spill] sm:$0xff] }
 0x36d   :  { %1992 = vmatpush1.bf16.msra.mxu0 %v6833_v54  ;;  %2035 = vmatpush1.bf16.msra.mxu1 %v6834_v8 }
 0x36e   :  { %1993 = vmatprep.subr.bf16.mxu0 %v6835_v19  ;;  %2036 = vmatprep.subr.bf16.mxu1 %v6836_v27 }
 0x36f   :  { %2023 = vmatprep.mubr.bf16.mxu0 %v6741_v58  ;;  %2066 = vmatprep.mubr.bf16.mxu1 %v6741_v58 }
 0x371   :  { %1994 = vmatpush1.bf16.msra.mxu0 %v6837_v18  ;;  %2037 = vmatpush1.bf16.msra.mxu1 %v6838_v47 }
 0x372   :  { %1995 = vmatprep.subr.bf16.mxu0 %v6839_v10  ;;  %2038 = vmatprep.subr.bf16.mxu1 %v6840_v48 }
 0x375   :  { %1996 = vmatpush1.bf16.msra.mxu0 %v6841_v6  ;;  %2039 = vmatpush1.bf16.msra.mxu1 %v6842_v34 }
 0x376   :  { %1997 = vmatprep.subr.bf16.mxu0 %v6843_v40  ;;  %2040 = vmatprep.subr.bf16.mxu1 %v6844_v23 }
 0x379   :  { %1998 = vmatpush1.bf16.msra.mxu0 %v6845_v31  ;;  %2041 = vmatpush1.bf16.msra.mxu1 %v6846_v17  ;;  %v6856_v31 = vld [vmem:[#allocation32_spill] sm:$0xff]  ;;  %v6857_v17 = vld [vmem:[#allocation39_spill] sm:$0xff] }
 0x37a   :  { %1999 = vmatprep.subr.bf16.mxu0 %v6847_v52  ;;  %2042 = vmatprep.subr.bf16.mxu1 %v6848_v5  ;;  %v6858_v52 = vld [vmem:[#allocation40_spill] sm:$0xff]  ;;  %v6859_v5 = vld [vmem:[#allocation41_spill] sm:$0xff] }
 0x37d   :  { %2000 = vmatpush1.bf16.msra.mxu0 %v6849_v62  ;;  %2043 = vmatpush1.bf16.msra.mxu1 %v6850_v55  ;;  %v6860_v62 = vld [vmem:[#allocation42_spill] sm:$0xff]  ;;  %v6861_v55 = vld [vmem:[#allocation43_spill] sm:$0xff] }
 0x37e   :  { %2001 = vmatprep.subr.bf16.mxu0 %v6851_v45  ;;  %2044 = vmatprep.subr.bf16.mxu1 %v6852_v38  ;;  %v6862_v45 = vld [vmem:[#allocation44_spill] sm:$0xff]  ;;  %v6863_v38 = vld [vmem:[#allocation45_spill] sm:$0xff] }
 0x381   :  { %2002 = vmatpush1.bf16.msra.mxu0 %v6853_v11  ;;  %2045 = vmatpush1.bf16.msra.mxu1 %v6854_v2  ;;  %v6864_v11 = vld [vmem:[#allocation46_spill] sm:$0xff]  ;;  %v6865_v2 = vld [vmem:[#allocation35_spill] sm:$0xff] }
 0x382   :  { %2003 = vmatprep.subr.bf16.mxu0 %v6855_v50  ;;  %2046 = vmatprep.subr.bf16.mxu1 %v6856_v31  ;;  %v51_v31 = vld [vmem:[%s6525_s0 + $0xc0] sm:$0xff] }
 0x385   :  { %2004 = vmatpush1.bf16.msra.mxu0 %v6857_v17  ;;  %2047 = vmatpush1.bf16.msra.mxu1 %v6858_v52  ;;  %v55_v52 = vld [vmem:[%s6525_s0 + $0xe0] sm:$0xff]  ;;  %v1748_v17 = vunpack.c.l.bf16 %v51_v31 }
 0x386   :  { %2005 = vmatprep.subr.bf16.mxu0 %v6859_v5  ;;  %2048 = vmatprep.subr.bf16.mxu1 %v6860_v62  ;;  %v1749_v62 = vunpack.c.h.bf16 %v51_v31  ;;  %v1752_v40 = vunpack.c.l.bf16 %v55_v52  ;;  %v1753_v48 = vunpack.c.h.bf16 %v55_v52 }
 0x389   :  { %2006 = vmatpush1.bf16.msra.mxu0 %v6861_v55  ;;  %2049 = vmatpush1.bf16.msra.mxu1 %v6862_v45 }
 0x38a   :  { %2151 = vmatprep.subr.bf16.mxu0 %v6863_v38  ;;  %2194 = vmatprep.subr.bf16.mxu1 %v6864_v11  ;;  %v6866_v38 = vld [vmem:[#allocation36_spill] sm:$0xff] }
 0x41f   :  { %v1691_v5 = vpop.f32.mrb[24].mxu0  ;;  %v1734_v50 = vpop.f32.mrb[24].mxu1 }
 0x420   :  { %v1692_v55 = vadd.f32 %v1691_v5, %v6865_v2  ;;  %v1693_v23 = vpop.f32.mrb[25].mxu0  ;;  %v1736_v45 = vpop.f32.mrb[25].mxu1 }
 0x421   :  { %v1694_v34 = vadd.f32 %v1693_v23, %v6866_v38  ;;  %v1695_v11 = vpop.f32.mrb[26].mxu0  ;;  %v1738_v6 = vpop.f32.mrb[26].mxu1  ;;  %v53_v23 = vld [vmem:[%s6525_s0 + $0xc8] sm:$0xff] }
 0x422   :  { %v1756_v10 = vadd.f32 %v1748_v17, %v1692_v55  ;;  %v1696_v47 = vadd.f32 %v1695_v11, %v6865_v2  ;;  %v1697_v18 = vpop.f32.mrb[27].mxu0  ;;  %v1740_v27 = vpop.f32.mrb[27].mxu1  ;;  %v6867_v17 = vld [vmem:[#allocation38_spill] sm:$0xff]  ;;  %v1750_v11 = vunpack.c.l.bf16 %v53_v23 }
 0x423   :  { %v1757_v19 = vadd.f32 %v1749_v62, %v1694_v34  ;;  %v1698_v8 = vadd.f32 %v1697_v18, %v6866_v38  ;;  %v1735_v55 = vadd.f32 %v1734_v50, %v6867_v17  ;;  %v57_v18 = vld [vmem:[%s6525_s0 + $0xe8] sm:$0xff] }
 0x424   :  { %v3563_v54 = vmul.f32 -1.442695, %v1756_v10  ;;  %v1760_v31 = vadd.f32 %v1752_v40, %v1696_v47  ;;  %v6868_v47 = vld [vmem:[#allocation37_spill] sm:$0xff]  ;;  %v1754_v10 = vunpack.c.l.bf16 %v57_v18 }
 0x425   :  { %v3565_v0 = vmul.f32 -1.442695, %v1757_v19  ;;  %v1761_v5 = vadd.f32 %v1753_v48, %v1698_v8  ;;  %v1737_v19 = vadd.f32 %v1736_v45, %v6868_v47  ;;  %v1751_v8 = vunpack.c.h.bf16 %v53_v23 }
 0x426   :  { %3931 = vpow2.f32 %v3563_v54  ;;  %v3564_v57 = vmul.f32 -1.442695, %v1760_v31  ;;  %v1739_v54 = vadd.f32 %v1738_v6, %v6867_v17  ;;  %v1758_v48 = vadd.f32 %v1750_v11, %v1735_v55 }
 0x427   :  { %3933 = vpow2.f32 %v3565_v0  ;;  %v3566_v52 = vmul.f32 -1.442695, %v1761_v5  ;;  %v1741_v34 = vadd.f32 %v1740_v27, %v6868_v47  ;;  %v1755_v0 = vunpack.c.h.bf16 %v57_v18  ;;  %v3404_v27 = vld [vmem:[%s6526_s1 + $0x110] sm:$0xff] }
 0x428   :  { %3935 = vpow2.f32 %v3564_v57  ;;  %v1759_v50 = vadd.f32 %v1751_v8, %v1737_v19  ;;  %v1762_v31 = vadd.f32 %v1754_v10, %v1739_v54  ;;  %v3406_v19 = vld [vmem:[%s6526_s1 + $0x130] sm:$0xff]  ;;  %v1908_v54 = vunpack.c.l.bf16 %v3404_v27 }
 0x429   :  { %3937 = vpow2.f32 %v3566_v52  ;;  %v1763_v52 = vadd.f32 %v1755_v0, %v1741_v34 }
 0x42a   :  { %3939 = vtanh.f32 %v1758_v48  ;;  %v3567_v2 = vmul.f32 -1.442695, %v1759_v50 }
 0x42b   :  { %v3568_v55 = vmul.f32 -1.442695, %v1763_v52 }
 0x430   :  { %v3932_v40 = vpop.eup %3931 }
 0x431   :  { %v3934_v57 = vpop.eup %3933  ;;  %v1770_v62 = vadd.f32 1.0, %v3932_v40 }
 0x432   :  { %v1782_v5 = vadd.f32 1.0, %v3934_v57  ;;  %v3936_v38 = vpop.eup %3935 }
 0x433   :  { %3941 = vrcp.f32 %v1770_v62  ;;  %v1771_v45 = vadd.f32 1.0, %v3936_v38  ;;  %v3938_v23 = vpop.eup %3937 }
 0x434   :  { %3943 = vrcp.f32 %v1782_v5  ;;  %v1783_v6 = vadd.f32 1.0, %v3938_v23  ;;  %v3940_v11 = vpop.eup %3939 }
 0x435   :  { %3945 = vtanh.f32 %v1762_v31  ;;  %v1912_v31 = vunpack.c.l.bf16 %v3406_v19 }
 0x436   :  { %3947 = vrcp.f32 %v1771_v45  ;;  %v3405_v45 = vld [vmem:[%s6526_s1 + $0x118] sm:$0xff] }
 0x437   :  { %3949 = vrcp.f32 %v1783_v6  ;;  %v1911_v17 = vunpack.c.h.bf16 %v3405_v45 }
 0x438   :  { %3951 = vpow2.f32 %v3567_v2  ;;  %v1909_v2 = vunpack.c.h.bf16 %v3404_v27 }
 0x439   :  { %3953 = vpow2.f32 %v3568_v55  ;;  %v1913_v55 = vunpack.c.h.bf16 %v3406_v19 }
 0x43d   :  { %v3942_v18 = vpop.eup %3941 }
 0x43e   :  { %v3944_v38 = vpop.eup %3943  ;;  %v1804_v8 = vmul.f32 %v3942_v18, %v3940_v11 }
 0x43f   :  { %v3946_v10 = vpop.eup %3945  ;;  %v1802_v48 = vmul.f32 %v3944_v38, %v5509_v14  ;;  %v1851_v34 = vpop.f32.mrb[28].mxu0 }
 0x440   :  { %v1894_v0 = vpop.f32.mrb[28].mxu1  ;;  %v3948_v40 = vpop.eup %3947  ;;  %v1852_v57 = vadd.f32 %v1851_v34, %v6788_v33 }
 0x441   :  { %v1853_v62 = vpop.f32.mrb[29].mxu0  ;;  %v1896_v50 = vpop.f32.mrb[29].mxu1  ;;  %v5645_v5 = vadd.f32 %v1804_v8, %v1802_v48  ;;  %v1805_v52 = vmul.f32 %v3948_v40, %v3946_v10 }
 0x442   :  { %v1854_v23 = vadd.f32 %v1853_v62, %v6789_v39  ;;  %v1855_v6 = vpop.f32.mrb[30].mxu0  ;;  %v1898_v14 = vpop.f32.mrb[30].mxu1  ;;  %v1916_v27 = vadd.f32 %v1908_v54, %v1852_v57  ;;  %v1897_v19 = vadd.f32 %v1896_v50, %v4925_v24 }
 0x443   :  { %v3950_v11 = vpop.eup %3949  ;;  %v1856_v18 = vadd.f32 %v1855_v6, %v6788_v33  ;;  %v1857_v38 = vpop.f32.mrb[31].mxu0 }
 0x444   :  { %v1900_v34 = vpop.f32.mrb[31].mxu1  ;;  %v3952_v47 = vpop.eup %3951  ;;  %v1803_v8 = vmul.f32 %v3950_v11, %v5518_v36  ;;  %v1917_v48 = vadd.f32 %v1909_v2, %v1854_v23  ;;  %v1858_v10 = vadd.f32 %v1857_v38, %v6789_v39  ;;  %v3569_v40 = vmul.f32 -1.442695, %v1916_v27  ;;  %v3407_v36 = vld [vmem:[%s6526_s1 + $0x138] sm:$0xff] }
 0x445   :  { %v1920_v49 = vadd.f32 %v1912_v31, %v1856_v18  ;;  %v3954_v46 = vpop.eup %3953  ;;  %v1796_v57 = vadd.f32 1.0, %v3952_v47  ;;  %v1895_v11 = vadd.f32 %v1894_v0, %v4921_v15  ;;  %v1910_v31 = vunpack.c.l.bf16 %v3405_v45 }
 0x446   :  { %v5654_v62 = vadd.f32 %v1805_v52, %v1803_v8  ;;  %v3571_v3 = vmul.f32 -1.442695, %v1917_v48  ;;  %v1921_v54 = vadd.f32 %v1913_v55, %v1858_v10  ;;  %3955 = vpow2.f32 %v3569_v40 }
 0x447   :  { %v3570_v6 = vmul.f32 -1.442695, %v1920_v49  ;;  %v1797_v23 = vadd.f32 1.0, %v3954_v46  ;;  %v1919_v27 = vadd.f32 %v1911_v17, %v1897_v19  ;;  %v1901_v52 = vadd.f32 %v1900_v34, %v4925_v24 }
 0x448   :  { %3957 = vpow2.f32 %v3571_v3  ;;  %v3572_v2 = vmul.f32 -1.442695, %v1921_v54  ;;  %v1915_v18 = vunpack.c.h.bf16 %v3407_v36  ;;  %v1899_v47 = vadd.f32 %v1898_v14, %v4921_v15 }
 0x449   :  { %3959 = vpow2.f32 %v3570_v6  ;;  %v1914_v50 = vunpack.c.l.bf16 %v3407_v36  ;;  %v1918_v49 = vadd.f32 %v1910_v31, %v1895_v11  ;;  %v3573_v55 = vmul.f32 -1.442695, %v1919_v27 }
 0x44a   :  { %3961 = vrcp.f32 %v1796_v57  ;;  %v1923_v38 = vadd.f32 %v1915_v18, %v1901_v52 }
 0x44b   :  { %3963 = vpow2.f32 %v3572_v2  ;;  %v1922_v3 = vadd.f32 %v1914_v50, %v1899_v47 }
 0x44c   :  { %3965 = vrcp.f32 %v1797_v23  ;;  %v3574_v45 = vmul.f32 -1.442695, %v1923_v38 }
 0x44d   :  { %3967 = vtanh.f32 %v5645_v5 }
 0x44e   :  { %3969 = vtanh.f32 %v5654_v62 }
 0x44f   :  { %3971 = vtanh.f32 %v1918_v49 }
 0x450   :  { %v3956_v46 = vpop.eup %3955  ;;  %3973 = vpow2.f32 %v3573_v55 }
 0x451   :  { %v1930_v0 = vadd.f32 1.0, %v3956_v46  ;;  %3975 = vtanh.f32 %v1922_v3 }
 0x452   :  { %v3958_v17 = vpop.eup %3957 }
 0x453   :  { %v1942_v34 = vadd.f32 1.0, %v3958_v17  ;;  %v3960_v14 = vpop.eup %3959  ;;  %3977 = vrcp.f32 %v1930_v0  ;;  %v6888_v17 = vld [vmem:[#allocation20_spill] sm:$0xff]  ;;  %v6889_v0 = vld [vmem:[#allocation26_spill] sm:$0xff] }
 0x454   :  { %v3962_v8 = vpop.eup %3961  ;;  %v1931_v48 = vadd.f32 1.0, %v3960_v14  ;;  %v6892_v14 = vld [vmem:[#allocation24_spill] sm:$0xff] }
 0x455   :  { %3979 = vrcp.f32 %v1942_v34  ;;  %v3964_v10 = vpop.eup %3963  ;;  %v6891_v34 = vld [vmem:[#allocation29_spill] sm:$0xff] }
 0x456   :  { %3981 = vpow2.f32 %v3574_v45  ;;  %v3966_v40 = vpop.eup %3965  ;;  %v1943_v19 = vadd.f32 1.0, %v3964_v10  ;;  %v6890_v45 = vld [vmem:[#allocation23_spill] sm:$0xff] }
 0x457   :  { %3983 = vrcp.f32 %v1931_v48  ;;  %v3968_v54 = vpop.eup %3967  ;;  %v6894_v48 = vld [vmem:[#allocation27_spill] sm:$0xff] }
 0x458   :  { %v3970_v57 = vpop.eup %3969  ;;  %3985 = vrcp.f32 %v1943_v19  ;;  %v1810_v6 = vmul.f32 %v3968_v54, %v3962_v8  ;;  %v6893_v8 = vld [vmem:[#allocation30_spill] sm:$0xff]  ;;  %v6895_v10 = vld [vmem:[#allocation31_spill] sm:$0xff]  ;;  %v6897_v19 = vld [vmem:[#allocation32_spill] sm:$0xff] }
 0x459   :  { %v1811_v36 = vmul.f32 %v3970_v57, %v3966_v40  ;;  %v3972_v2 = vpop.eup %3971  ;;  %v6896_v40 = vld [vmem:[#allocation28_spill] sm:$0xff]  ;;  %v6898_v54 = vld [vmem:[#allocation39_spill] sm:$0xff] }
 0x45a   :  { %3575 = vst [vmem:[%s6529_s4 + $0x30] sm:$0xff] %v1810_v6  ;;  %v3974_v23 = vpop.eup %3973  ;;  %v6899_v57 = vld [vmem:[#allocation40_spill] sm:$0xff] }
 0x45b   :  { %3576 = vst [vmem:[%s6529_s4 + $0x38] sm:$0xff] %v1811_v36  ;;  %v1990_v11 = vpack.c.bf16 %v1811_v36, %v1810_v6  ;;  %v3976_v31 = vpop.eup %3975  ;;  %v1956_v47 = vadd.f32 1.0, %v3974_v23  ;;  %v6900_v6 = vld [vmem:[#allocation41_spill] sm:$0xff]  ;;  %v6901_v36 = vld [vmem:[#allocation42_spill] sm:$0xff]  ;;  %v6903_v23 = vld [vmem:[#allocation44_spill] sm:$0xff] }
 0x45d   :  { %v3978_v27 = vpop.eup %3977  ;;  %2024 = vmatmul.mubr.bf16.vlgmr.msra.gmra.mrb[32].mxu0 %v1990_v11  ;;  %2067 = vmatmul.mubr.bf16.vlgmr.msra.gmra.mrb[32].mxu1 %v1990_v11  ;;  %3987 = vrcp.f32 %v1956_v47  ;;  %v6904_v11 = vld [vmem:[#allocation45_spill] sm:$0xff] }
 0x45e   :  { %v1964_v18 = vmul.f32 %v3978_v27, %v3972_v2  ;;  %2152 = vmatpush1.bf16.msra.mxu0 %v5082_v51  ;;  %2195 = vmatpush1.bf16.msra.mxu1 %v5088_v53  ;;  %v6902_v2 = vld [vmem:[#allocation43_spill] sm:$0xff]  ;;  %v59_v27 = vld [vmem:[%s6525_s0 + $0x100] sm:$0xff] }
 0x45f   :  { %v3980_v52 = vpop.eup %3979  ;;  %2153 = vmatprep.subr.bf16.mxu0 %v5095_v37  ;;  %2196 = vmatprep.subr.bf16.mxu1 %v5101_v1 }
 0x460   :  { %v3982_v50 = vpop.eup %3981  ;;  %v1962_v49 = vmul.f32 %v3980_v52, %v5542_v43  ;;  %2183 = vmatprep.mubr.bf16.mxu0 %v6741_v58  ;;  %2226 = vmatprep.mubr.bf16.mxu1 %v6741_v58  ;;  %v6886_v43 = vld [vmem:[#allocation19_spill] sm:$0xff]  ;;  %v63_v52 = vld [vmem:[%s6525_s0 + $0x120] sm:$0xff] }
 0x461   :  { %v3984_v55 = vpop.eup %3983  ;;  %v1957_v51 = vadd.f32 1.0, %v3982_v50 }
 0x462   :  { %v5678_v38 = vadd.f32 %v1964_v18, %v1962_v49  ;;  %v1965_v3 = vmul.f32 %v3984_v55, %v3976_v31  ;;  %v3986_v46 = vpop.eup %3985  ;;  %2154 = vmatpush1.bf16.msra.mxu0 %v5111_v4  ;;  %2197 = vmatpush1.bf16.msra.mxu1 %v5117_v56  ;;  %v6905_v31 = vld [vmem:[#allocation46_spill] sm:$0xff]  ;;  %v2082_v18 = vunpack.c.l.bf16 %v59_v27  ;;  %v2083_v49 = vunpack.c.h.bf16 %v59_v27  ;;  %v6906_v55 = vld [vmem:[#allocation35_spill] sm:$0xff] }
 0x463   :  { %v1963_v53 = vmul.f32 %v3986_v46, %v5550_v7  ;;  %2155 = vmatprep.subr.bf16.mxu0 %v5124_v60  ;;  %2198 = vmatprep.subr.bf16.mxu1 %v5130_v61  ;;  %v6887_v7 = vld [vmem:[#allocation25_spill] sm:$0xff] }
 0x464   :  { %3989 = vtanh.f32 %v5678_v38 }
 0x465   :  { %v5686_v37 = vadd.f32 %v1965_v3, %v1963_v53  ;;  %3991 = vrcp.f32 %v1957_v51  ;;  %v2086_v53 = vunpack.c.l.bf16 %v63_v52 }
 0x466   :  { %2156 = vmatpush1.bf16.msra.mxu0 %v5139_v42  ;;  %2199 = vmatpush1.bf16.msra.mxu1 %v5145_v63 }
 0x467   :  { %2157 = vmatprep.subr.bf16.mxu0 %v5151_v9  ;;  %2200 = vmatprep.subr.bf16.mxu1 %v5157_v32  ;;  %3993 = vtanh.f32 %v5686_v37  ;;  %v3988_v1 = vpop.eup %3987  ;;  %v6869_v9 = vld [vmem:[#allocation33_spill] sm:$0xff]  ;;  %v6870_v32 = vld [vmem:[#allocation34_spill] sm:$0xff] }
 0x46a   :  { %2158 = vmatpush1.bf16.msra.mxu0 %v5164_v35  ;;  %2201 = vmatpush1.bf16.msra.mxu1 %v5170_v20  ;;  %v6871_v35 = vld [vmem:[#allocation9_spill] sm:$0xff]  ;;  %v6872_v20 = vld [vmem:[#allocation6_spill] sm:$0xff] }
 0x46b   :  { %2159 = vmatprep.subr.bf16.mxu0 %v5176_v26  ;;  %2202 = vmatprep.subr.bf16.mxu1 %v5182_v25  ;;  %v6873_v26 = vld [vmem:[#allocation12_spill] sm:$0xff]  ;;  %v6874_v25 = vld [vmem:[#allocation7_spill] sm:$0xff] }
 0x46e   :  { %v3990_v4 = vpop.eup %3989  ;;  %2160 = vmatpush1.bf16.msra.mxu0 %v5188_v22  ;;  %2203 = vmatpush1.bf16.msra.mxu1 %v5194_v59  ;;  %v6875_v22 = vld [vmem:[#allocation13_spill] sm:$0xff]  ;;  %v6876_v59 = vld [vmem:[#allocation8_spill] sm:$0xff] }
 0x46f   :  { %v1970_v56 = vmul.f32 %v3990_v4, %v3988_v1  ;;  %2161 = vmatprep.subr.bf16.mxu0 %v5200_v12  ;;  %2204 = vmatprep.subr.bf16.mxu1 %v5206_v30  ;;  %v3992_v60 = vpop.eup %3991  ;;  %v6877_v12 = vld [vmem:[#allocation14_spill] sm:$0xff]  ;;  %v6907_v1 = vld [vmem:[#allocation36_spill] sm:$0xff] }
 0x470   :  { %v6878_v30 = vld [vmem:[#allocation10_spill] sm:$0xff] }
 0x471   :  { %3577 = vst [vmem:[%s6530_s5 + $0x40] sm:$0xff] %v1970_v56  ;;  %v3994_v61 = vpop.eup %3993 }
 0x472   :  { %2162 = vmatpush1.bf16.msra.mxu0 %v5215_v29  ;;  %2205 = vmatpush1.bf16.msra.mxu1 %v5221_v21  ;;  %v1971_v42 = vmul.f32 %v3994_v61, %v3992_v60  ;;  %v6879_v29 = vld [vmem:[#allocation17_spill] sm:$0xff]  ;;  %v6880_v21 = vld [vmem:[#allocation11_spill] sm:$0xff]  ;;  %v2087_v61 = vunpack.c.h.bf16 %v63_v52 }
 0x473   :  { %2163 = vmatprep.subr.bf16.mxu0 %v5227_v28  ;;  %2206 = vmatprep.subr.bf16.mxu1 %v5233_v13  ;;  %v6881_v28 = vld [vmem:[#allocation18_spill] sm:$0xff]  ;;  %v6882_v13 = vld [vmem:[#allocation15_spill] sm:$0xff] }
 0x474   :  { %3578 = vst [vmem:[%s6530_s5 + $0x48] sm:$0xff] %v1971_v42  ;;  %v2150_v63 = vpack.c.bf16 %v1971_v42, %v1970_v56 }
 0x476   :  { %2164 = vmatpush1.bf16.msra.mxu0 %v5242_v41  ;;  %2207 = vmatpush1.bf16.msra.mxu1 %v5248_v16  ;;  %v6883_v41 = vld [vmem:[#allocation21_spill] sm:$0xff]  ;;  %v6884_v16 = vld [vmem:[#allocation16_spill] sm:$0xff] }
 0x477   :  { %2165 = vmatprep.subr.bf16.mxu0 %v5254_v44  ;;  %2208 = vmatprep.subr.bf16.mxu1 %v6869_v9  ;;  %v6885_v44 = vld [vmem:[#allocation22_spill] sm:$0xff] }
 0x47a   :  { %2166 = vmatpush1.bf16.msra.mxu0 %v6870_v32  ;;  %2209 = vmatpush1.bf16.msra.mxu1 %v6871_v35 }
 0x47b   :  { %2325 = vmatprep.subr.bf16.mxu0 %v6872_v20  ;;  %2368 = vmatprep.subr.bf16.mxu1 %v6873_v26 }
 0x47d   :  { %2184 = vmatmul.mubr.bf16.vlgmr.msra.gmra.mrb[36].mxu0 %v2150_v63  ;;  %2227 = vmatmul.mubr.bf16.vlgmr.msra.gmra.mrb[36].mxu1 %v2150_v63 }
 0x47e   :  { %2326 = vmatpush1.bf16.msra.mxu0 %v6874_v25  ;;  %2369 = vmatpush1.bf16.msra.mxu1 %v6875_v22 }
 0x47f   :  { %2327 = vmatprep.subr.bf16.mxu0 %v6876_v59  ;;  %2370 = vmatprep.subr.bf16.mxu1 %v6877_v12 }
 0x480   :  { %2357 = vmatprep.mubr.bf16.mxu0 %v6741_v58  ;;  %2400 = vmatprep.mubr.bf16.mxu1 %v6741_v58 }
 0x482   :  { %2328 = vmatpush1.bf16.msra.mxu0 %v6878_v30  ;;  %2371 = vmatpush1.bf16.msra.mxu1 %v6879_v29  ;;  %v61_v30 = vld [vmem:[%s6525_s0 + $0x108] sm:$0xff] }
 0x483   :  { %2329 = vmatprep.subr.bf16.mxu0 %v6880_v21  ;;  %2372 = vmatprep.subr.bf16.mxu1 %v6881_v28  ;;  %v6908_v21 = vld [vmem:[#allocation38_spill] sm:$0xff] }
 0x486   :  { %2330 = vmatpush1.bf16.msra.mxu0 %v6882_v13  ;;  %2373 = vmatpush1.bf16.msra.mxu1 %v6883_v41  ;;  %v2084_v13 = vunpack.c.l.bf16 %v61_v30  ;;  %v65_v41 = vld [vmem:[%s6525_s0 + $0x128] sm:$0xff] }
 0x487   :  { %2331 = vmatprep.subr.bf16.mxu0 %v6884_v16  ;;  %2374 = vmatprep.subr.bf16.mxu1 %v6885_v44  ;;  %v6909_v16 = vld [vmem:[#allocation37_spill] sm:$0xff] }
 0x48a   :  { %2332 = vmatpush1.bf16.msra.mxu0 %v6886_v43  ;;  %2375 = vmatpush1.bf16.msra.mxu1 %v6887_v7  ;;  %v2085_v43 = vunpack.c.h.bf16 %v61_v30 }
 0x48b   :  { %2333 = vmatprep.subr.bf16.mxu0 %v6888_v17  ;;  %2376 = vmatprep.subr.bf16.mxu1 %v6889_v0  ;;  %v2088_v17 = vunpack.c.l.bf16 %v65_v41 }
 0x48e   :  { %2334 = vmatpush1.bf16.msra.mxu0 %v6890_v45  ;;  %2377 = vmatpush1.bf16.msra.mxu1 %v6891_v34  ;;  %v2089_v34 = vunpack.c.h.bf16 %v65_v41 }
 0x48f   :  { %2335 = vmatprep.subr.bf16.mxu0 %v6892_v14  ;;  %2378 = vmatprep.subr.bf16.mxu1 %v6893_v8 }
 0x492   :  { %2336 = vmatpush1.bf16.msra.mxu0 %v6894_v48  ;;  %2379 = vmatpush1.bf16.msra.mxu1 %v6895_v10 }
 0x493   :  { %2337 = vmatprep.subr.bf16.mxu0 %v6896_v40  ;;  %2380 = vmatprep.subr.bf16.mxu1 %v6897_v19 }
 0x496   :  { %2338 = vmatpush1.bf16.msra.mxu0 %v6898_v54  ;;  %2381 = vmatpush1.bf16.msra.mxu1 %v6899_v57 }
 0x497   :  { %2339 = vmatprep.subr.bf16.mxu0 %v6900_v6  ;;  %2382 = vmatprep.subr.bf16.mxu1 %v6901_v36 }
 0x49a   :  { %2340 = vmatpush1.bf16.msra.mxu0 %v6902_v2  ;;  %2383 = vmatpush1.bf16.msra.mxu1 %v6903_v23 }
 0x49b   :  { %2485 = vmatprep.subr.bf16.mxu0 %v6904_v11  ;;  %2528 = vmatprep.subr.bf16.mxu1 %v6905_v31  ;;  %v3400_v31 = vld [vmem:[%s6526_s1 + $0xd0] sm:$0xff] }
 0x530   :  { %v2025_v47 = vpop.f32.mrb[32].mxu0  ;;  %v2068_v50 = vpop.f32.mrb[32].mxu1 }
 0x531   :  { %v2026_v3 = vadd.f32 %v2025_v47, %v6906_v55  ;;  %v2027_v46 = vpop.f32.mrb[33].mxu0  ;;  %v2070_v51 = vpop.f32.mrb[33].mxu1  ;;  %v2069_v28 = vadd.f32 %v2068_v50, %v6908_v21 }
 0x532   :  { %v2028_v4 = vadd.f32 %v2027_v46, %v6907_v1  ;;  %v2029_v56 = vpop.f32.mrb[34].mxu0  ;;  %v2072_v60 = vpop.f32.mrb[34].mxu1  ;;  %v2071_v44 = vadd.f32 %v2070_v51, %v6909_v16 }
 0x533   :  { %v2090_v42 = vadd.f32 %v2082_v18, %v2026_v3  ;;  %v2030_v63 = vadd.f32 %v2029_v56, %v6906_v55  ;;  %v2031_v9 = vpop.f32.mrb[35].mxu0  ;;  %v2074_v32 = vpop.f32.mrb[35].mxu1  ;;  %v2073_v7 = vadd.f32 %v2072_v60, %v6908_v21  ;;  %v2092_v0 = vadd.f32 %v2084_v13, %v2069_v28  ;;  %v3402_v18 = vld [vmem:[%s6526_s1 + $0xf0] sm:$0xff] }
 0x534   :  { %v2091_v35 = vadd.f32 %v2083_v49, %v2028_v4  ;;  %v2032_v20 = vadd.f32 %v2031_v9, %v6907_v1  ;;  %v2075_v45 = vadd.f32 %v2074_v32, %v6909_v16  ;;  %v2093_v10 = vadd.f32 %v2085_v43, %v2071_v44 }
 0x535   :  { %v3579_v26 = vmul.f32 -1.442695, %v2090_v42  ;;  %v2094_v25 = vadd.f32 %v2086_v53, %v2030_v63  ;;  %v2096_v40 = vadd.f32 %v2088_v17, %v2073_v7  ;;  %v2242_v49 = vunpack.c.l.bf16 %v3400_v31 }
 0x536   :  { %v3581_v22 = vmul.f32 -1.442695, %v2091_v35  ;;  %v2095_v59 = vadd.f32 %v2087_v61, %v2032_v20  ;;  %v2097_v57 = vadd.f32 %v2089_v34, %v2075_v45  ;;  %v3583_v2 = vmul.f32 -1.442695, %v2093_v10  ;;  %v3401_v35 = vld [vmem:[%s6526_s1 + $0xd8] sm:$0xff] }
 0x537   :  { %3995 = vpow2.f32 %v3579_v26  ;;  %v3580_v12 = vmul.f32 -1.442695, %v2094_v25  ;;  %v2243_v4 = vunpack.c.h.bf16 %v3400_v31  ;;  %v2246_v63 = vunpack.c.l.bf16 %v3402_v18 }
 0x538   :  { %3997 = vpow2.f32 %v3581_v22  ;;  %v3582_v29 = vmul.f32 -1.442695, %v2095_v59  ;;  %v3584_v11 = vmul.f32 -1.442695, %v2097_v57  ;;  %v2247_v25 = vunpack.c.h.bf16 %v3402_v18 }
 0x539   :  { %3999 = vpow2.f32 %v3580_v12  ;;  %v2245_v7 = vunpack.c.h.bf16 %v3401_v35  ;;  %v2244_v57 = vunpack.c.l.bf16 %v3401_v35 }
 0x53a   :  { %4001 = vpow2.f32 %v3582_v29 }
 0x53b   :  { %4003 = vtanh.f32 %v2092_v0 }
 0x541   :  { %v3996_v14 = vpop.eup %3995 }
 0x542   :  { %v3998_v8 = vpop.eup %3997  ;;  %v2104_v48 = vadd.f32 1.0, %v3996_v14 }
 0x543   :  { %v2116_v19 = vadd.f32 1.0, %v3998_v8  ;;  %v4000_v54 = vpop.eup %3999 }
 0x544   :  { %4005 = vrcp.f32 %v2104_v48  ;;  %v2105_v6 = vadd.f32 1.0, %v4000_v54  ;;  %v4002_v36 = vpop.eup %4001 }
 0x545   :  { %4007 = vrcp.f32 %v2116_v19  ;;  %v2117_v23 = vadd.f32 1.0, %v4002_v36  ;;  %v4004_v27 = vpop.eup %4003 }
 0x546   :  { %4009 = vtanh.f32 %v2096_v40 }
 0x547   :  { %4011 = vrcp.f32 %v2105_v6 }
 0x548   :  { %4013 = vrcp.f32 %v2117_v23 }
 0x549   :  { %4015 = vpow2.f32 %v3583_v2 }
 0x54a   :  { %4017 = vpow2.f32 %v3584_v11 }
 0x54e   :  { %v4006_v52 = vpop.eup %4005 }
 0x54f   :  { %v4008_v47 = vpop.eup %4007  ;;  %v2138_v50 = vmul.f32 %v4006_v52, %v4004_v27 }
 0x550   :  { %v4010_v3 = vpop.eup %4009  ;;  %v2136_v46 = vmul.f32 %v4008_v47, %v5645_v5  ;;  %v2185_v51 = vpop.f32.mrb[36].mxu0 }
 0x551   :  { %v2228_v53 = vpop.f32.mrb[36].mxu1  ;;  %v4012_v56 = vpop.eup %4011  ;;  %v2186_v60 = vadd.f32 %v2185_v51, %v6788_v33 }
 0x552   :  { %v2187_v61 = vpop.f32.mrb[37].mxu0  ;;  %v2230_v42 = vpop.f32.mrb[37].mxu1  ;;  %v5781_v9 = vadd.f32 %v2138_v50, %v2136_v46  ;;  %v2139_v32 = vmul.f32 %v4012_v56, %v4010_v3  ;;  %v2229_v54 = vadd.f32 %v2228_v53, %v4921_v15 }
 0x553   :  { %v2188_v20 = vadd.f32 %v2187_v61, %v6789_v39  ;;  %v2189_v26 = vpop.f32.mrb[38].mxu0  ;;  %v2232_v5 = vpop.f32.mrb[38].mxu1  ;;  %v2250_v59 = vadd.f32 %v2242_v49, %v2186_v60  ;;  %v2231_v14 = vadd.f32 %v2230_v42, %v4925_v24 }
 0x554   :  { %v4014_v22 = vpop.eup %4013  ;;  %v2190_v12 = vadd.f32 %v2189_v26, %v6788_v33  ;;  %v2191_v30 = vpop.f32.mrb[39].mxu0  ;;  %v2233_v23 = vadd.f32 %v2232_v5, %v4921_v15  ;;  %v2252_v31 = vadd.f32 %v2244_v57, %v2229_v54  ;;  %v5879_v54 = vld [vmem:[%s6527_s2 + $0x164] ss:$16 sps:$4 sm:$0xff]   ;;  %v5885_v57 = vld [vmem:[%s6527_s2 + $0x16c] ss:$16 sps:$4 sm:$0xff]  }
 0x555   :  { %v2234_v29 = vpop.f32.mrb[39].mxu1  ;;  %v4016_v28 = vpop.eup %4015  ;;  %v2137_v13 = vmul.f32 %v4014_v22, %v5654_v62  ;;  %v2251_v41 = vadd.f32 %v2243_v4, %v2188_v20  ;;  %v2192_v44 = vadd.f32 %v2191_v30, %v6789_v39  ;;  %v3585_v43 = vmul.f32 -1.442695, %v2250_v59  ;;  %v3403_v62 = vld [vmem:[%s6526_s1 + $0xf8] sm:$0xff] }
 0x556   :  { %v2254_v17 = vadd.f32 %v2246_v63, %v2190_v12  ;;  %v4018_v0 = vpop.eup %4017  ;;  %v2130_v48 = vadd.f32 1.0, %v4016_v28  ;;  %v2253_v6 = vadd.f32 %v2245_v7, %v2231_v14  ;;  %v2235_v36 = vadd.f32 %v2234_v29, %v4925_v24  ;;  %v5810_v29 = vld [vmem:[%s6527_s2 + $0x100] ss:$16 sps:$4 sm:$0xff]   ;;  %v5816_v28 = vld [vmem:[%s6527_s2 + $0x108] ss:$16 sps:$4 sm:$0xff]  }
 0x557   :  { %v5790_v45 = vadd.f32 %v2139_v32, %v2137_v13  ;;  %v3587_v34 = vmul.f32 -1.442695, %v2251_v41  ;;  %v2255_v8 = vadd.f32 %v2247_v25, %v2192_v44  ;;  %4019 = vpow2.f32 %v3585_v43  ;;  %v5823_v44 = vld [vmem:[%s6527_s2 + $0x124] ss:$16 sps:$4 sm:$0xff]   ;;  %v5829_v43 = vld [vmem:[%s6527_s2 + $0x12c] ss:$16 sps:$4 sm:$0xff]  }
 0x558   :  { %v3586_v10 = vmul.f32 -1.442695, %v2254_v17  ;;  %v2131_v19 = vadd.f32 1.0, %v4018_v0  ;;  %v2249_v2 = vunpack.c.h.bf16 %v3403_v62  ;;  %v2248_v11 = vunpack.c.l.bf16 %v3403_v62  ;;  %v5839_v14 = vld [vmem:[%s6527_s2 + $0x120] ss:$16 sps:$4 sm:$0xff]  }
 0x559   :  { %4021 = vpow2.f32 %v3587_v34  ;;  %v3588_v40 = vmul.f32 -1.442695, %v2255_v8  ;;  %v3589_v27 = vmul.f32 -1.442695, %v2253_v6  ;;  %v5845_v8 = vld [vmem:[%s6527_s2 + $0x128] ss:$16 sps:$4 sm:$0xff]  }
 0x55a   :  { %4023 = vpow2.f32 %v3586_v10  ;;  %v2257_v52 = vadd.f32 %v2249_v2, %v2235_v36  ;;  %v2256_v18 = vadd.f32 %v2248_v11, %v2233_v23  ;;  %v5852_v10 = vld [vmem:[%s6527_s2 + $0x144] ss:$16 sps:$4 sm:$0xff]   ;;  %v5858_v62 = vld [vmem:[%s6527_s2 + $0x14c] ss:$16 sps:$4 sm:$0xff]   ;;  %v5892_v6 = vld [vmem:[%s6527_s2 + $0x160] ss:$16 sps:$4 sm:$0xff]  }
 0x55b   :  { %4025 = vrcp.f32 %v2130_v48  ;;  %v5898_v36 = vld [vmem:[%s6527_s2 + $0x168] ss:$16 sps:$4 sm:$0xff]   ;;  %v5904_v2 = vld [vmem:[%s6527_s2 + $0x184] ss:$16 sps:$4 sm:$0xff]   ;;  %v5910_v23 = vld [vmem:[%s6527_s2 + $0x18c] ss:$16 sps:$4 sm:$0xff]  }
 0x55c   :  { %4027 = vpow2.f32 %v3588_v40  ;;  %v3590_v3 = vmul.f32 -1.442695, %v2257_v52  ;;  %v5922_v52 = vld [vmem:[%s6527_s2 + $0x188] ss:$16 sps:$4 sm:$0xff]  }
 0x55d   :  { %4029 = vrcp.f32 %v2131_v19  ;;  %v5873_v19 = vld [vmem:[%s6527_s2 + $0x148] ss:$16 sps:$4 sm:$0xff]  }
 0x55e   :  { %4031 = vtanh.f32 %v5781_v9 }
 0x55f   :  { %4033 = vtanh.f32 %v5790_v45 }
 0x560   :  { %4035 = vtanh.f32 %v2252_v31 }
 0x561   :  { %v4020_v47 = vpop.eup %4019  ;;  %4037 = vpow2.f32 %v3589_v27  ;;  %v5916_v27 = vld [vmem:[%s6527_s2 + $0x180] ss:$16 sps:$4 sm:$0xff]  }
 0x562   :  { %v2264_v49 = vadd.f32 1.0, %v4020_v47  ;;  %4039 = vtanh.f32 %v2256_v18  ;;  %v5928_v47 = vld [vmem:[%s6527_s2 + $0x1a4] ss:$16 sps:$4 sm:$0xff]  }
 0x563   :  { %v4022_v50 = vpop.eup %4021 }
 0x564   :  { %v2276_v46 = vadd.f32 1.0, %v4022_v50  ;;  %v4024_v51 = vpop.eup %4023  ;;  %4041 = vrcp.f32 %v2264_v49  ;;  %v5934_v50 = vld [vmem:[%s6527_s2 + $0x1ac] ss:$16 sps:$4 sm:$0xff]  }
 0x565   :  { %v4026_v53 = vpop.eup %4025  ;;  %v2265_v4 = vadd.f32 1.0, %v4024_v51  ;;  %v5949_v51 = vld [vmem:[%s6527_s2 + $0x1a8] ss:$16 sps:$4 sm:$0xff]  }
 0x566   :  { %4043 = vrcp.f32 %v2276_v46  ;;  %v4028_v56 = vpop.eup %4027  ;;  %v5943_v46 = vld [vmem:[%s6527_s2 + $0x1a0] ss:$16 sps:$4 sm:$0xff]  }
 0x567   :  { %4045 = vpow2.f32 %v3590_v3  ;;  %v4030_v60 = vpop.eup %4029  ;;  %v2277_v61 = vadd.f32 1.0, %v4028_v56  ;;  %v5961_v56 = vld [vmem:[%s6527_s2 + $0x1cc] ss:$16 sps:$4 sm:$0xff]  }
 0x568   :  { %4047 = vrcp.f32 %v2265_v4  ;;  %v4032_v42 = vpop.eup %4031  ;;  %v5955_v4 = vld [vmem:[%s6527_s2 + $0x1c4] ss:$16 sps:$4 sm:$0xff]  }
 0x569   :  { %v4034_v63 = vpop.eup %4033  ;;  %4049 = vrcp.f32 %v2277_v61  ;;  %v2144_v32 = vmul.f32 %v4032_v42, %v4026_v53  ;;  %v5970_v61 = vld [vmem:[%s6527_s2 + $0x1c0] ss:$16 sps:$4 sm:$0xff]   ;;  %v5976_v42 = vld [vmem:[%s6527_s2 + $0x1c8] ss:$16 sps:$4 sm:$0xff]  }
 0x56a   :  { %v2145_v35 = vmul.f32 %v4034_v63, %v4030_v60  ;;  %v4036_v20 = vpop.eup %4035  ;;  %v5982_v63 = vld [vmem:[%s6527_s2 + $0x1e4] ss:$16 sps:$4 sm:$0xff]  }
 0x56b   :  { %3591 = vst [vmem:[%s6529_s4 + $0x40] sm:$0xff] %v2144_v32  ;;  %v4038_v26 = vpop.eup %4037 }
 0x56c   :  { %3592 = vst [vmem:[%s6529_s4 + $0x48] sm:$0xff] %v2145_v35  ;;  %v2324_v5 = vpack.c.bf16 %v2145_v35, %v2144_v32  ;;  %v4040_v25 = vpop.eup %4039  ;;  %v2290_v30 = vadd.f32 1.0, %v4038_v26  ;;  %v5988_v32 = vld [vmem:[%s6527_s2 + $0x1ec] ss:$16 sps:$4 sm:$0xff]   ;;  %v5994_v35 = vld [vmem:[%s6527_s2 + $0x1e0] ss:$16 sps:$4 sm:$0xff]  }
 0x56d   :  { %6910 = vst [vmem:[#allocation33_spill] sm:$0xff] %v5988_v32  ;;  %6911 = vst [vmem:[#allocation34_spill] sm:$0xff] %v5994_v35  ;;  %v6006_v26 = vld [vmem:[%s6527_s2 + $0x4] ss:$16 sps:$4 sm:$0xff]  }
 0x56e   :  { %v4042_v22 = vpop.eup %4041  ;;  %2358 = vmatmul.mubr.bf16.vlgmr.msra.gmra.mrb[40].mxu0 %v2324_v5  ;;  %2401 = vmatmul.mubr.bf16.vlgmr.msra.gmra.mrb[40].mxu1 %v2324_v5  ;;  %4051 = vrcp.f32 %v2290_v30  ;;  %6913 = vst [vmem:[#allocation6_spill] sm:$0xff] %v6006_v26  ;;  %v6012_v5 = vld [vmem:[%s6527_s2 + $0xc] ss:$16 sps:$4 sm:$0xff]   ;;  %v6044_v30 = vld [vmem:[%s6527_s2 + $0x20] ss:$16 sps:$4 sm:$0xff]  }
 0x56f   :  { %v2298_v12 = vmul.f32 %v4042_v22, %v4036_v20  ;;  %2486 = vmatpush1.bf16.msra.mxu0 %v5810_v29  ;;  %2529 = vmatpush1.bf16.msra.mxu1 %v5816_v28  ;;  %v6000_v20 = vld [vmem:[%s6527_s2 + $0x1e8] ss:$16 sps:$4 sm:$0xff]   ;;  %6914 = vst [vmem:[#allocation12_spill] sm:$0xff] %v6012_v5  ;;  %6919 = vst [vmem:[#allocation10_spill] sm:$0xff] %v6044_v30 }
 0x570   :  { %v4044_v59 = vpop.eup %4043  ;;  %2487 = vmatprep.subr.bf16.mxu0 %v5823_v44  ;;  %2530 = vmatprep.subr.bf16.mxu1 %v5829_v43  ;;  %6912 = vst [vmem:[#allocation9_spill] sm:$0xff] %v6000_v20  ;;  %v6024_v22 = vld [vmem:[%s6527_s2 + $0x8] ss:$16 sps:$4 sm:$0xff]  }
 0x571   :  { %v4046_v13 = vpop.eup %4045  ;;  %v2296_v41 = vmul.f32 %v4044_v59, %v5678_v38  ;;  %2517 = vmatprep.mubr.bf16.mxu0 %v6741_v58  ;;  %2560 = vmatprep.mubr.bf16.mxu1 %v6741_v58  ;;  %6916 = vst [vmem:[#allocation13_spill] sm:$0xff] %v6024_v22  ;;  %v6030_v59 = vld [vmem:[%s6527_s2 + $0x24] ss:$16 sps:$4 sm:$0xff]  }
 0x572   :  { %v4048_v7 = vpop.eup %4047  ;;  %v2291_v34 = vadd.f32 1.0, %v4046_v13  ;;  %6917 = vst [vmem:[#allocation8_spill] sm:$0xff] %v6030_v59  ;;  %v6050_v13 = vld [vmem:[%s6527_s2 + $0x28] ss:$16 sps:$4 sm:$0xff]  }
 0x573   :  { %v5834_v38 = vadd.f32 %v2298_v12, %v2296_v41  ;;  %v2299_v17 = vmul.f32 %v4048_v7, %v4040_v25  ;;  %v4050_v0 = vpop.eup %4049  ;;  %2488 = vmatpush1.bf16.msra.mxu0 %v5839_v14  ;;  %2531 = vmatpush1.bf16.msra.mxu1 %v5845_v8  ;;  %v6018_v25 = vld [vmem:[%s6527_s2] ss:$16 sps:$4 sm:$0xff]   ;;  %v6036_v12 = vld [vmem:[%s6527_s2 + $0x2c] ss:$16 sps:$4 sm:$0xff]   ;;  %6920 = vst [vmem:[#allocation17_spill] sm:$0xff] %v6050_v13 }
 0x574   :  { %v2297_v48 = vmul.f32 %v4050_v0, %v5686_v37  ;;  %2489 = vmatprep.subr.bf16.mxu0 %v5852_v10  ;;  %2532 = vmatprep.subr.bf16.mxu1 %v5858_v62  ;;  %v5867_v37 = vld [vmem:[%s6527_s2 + $0x140] ss:$16 sps:$4 sm:$0xff]   ;;  %6915 = vst [vmem:[#allocation7_spill] sm:$0xff] %v6018_v25  ;;  %6918 = vst [vmem:[#allocation14_spill] sm:$0xff] %v6036_v12  ;;  %v6056_v41 = vld [vmem:[%s6527_s2 + $0x44] ss:$16 sps:$4 sm:$0xff]  }
 0x575   :  { %4053 = vtanh.f32 %v5834_v38  ;;  %6921 = vst [vmem:[#allocation11_spill] sm:$0xff] %v6056_v41  ;;  %v6062_v7 = vld [vmem:[%s6527_s2 + $0x4c] ss:$16 sps:$4 sm:$0xff]   ;;  %v6074_v0 = vld [vmem:[%s6527_s2 + $0x48] ss:$16 sps:$4 sm:$0xff]  }
 0x576   :  { %v5862_v40 = vadd.f32 %v2299_v17, %v2297_v48  ;;  %4055 = vrcp.f32 %v2291_v34  ;;  %6922 = vst [vmem:[#allocation18_spill] sm:$0xff] %v6062_v7  ;;  %v6068_v17 = vld [vmem:[%s6527_s2 + $0x40] ss:$16 sps:$4 sm:$0xff]   ;;  %6924 = vst [vmem:[#allocation21_spill] sm:$0xff] %v6074_v0  ;;  %v6080_v34 = vld [vmem:[%s6527_s2 + $0x64] ss:$16 sps:$4 sm:$0xff]  }
 0x577   :  { %2490 = vmatpush1.bf16.msra.mxu0 %v5867_v37  ;;  %2533 = vmatpush1.bf16.msra.mxu1 %v5873_v19  ;;  %6923 = vst [vmem:[#allocation15_spill] sm:$0xff] %v6068_v17  ;;  %6925 = vst [vmem:[#allocation16_spill] sm:$0xff] %v6080_v34  ;;  %v6086_v48 = vld [vmem:[%s6527_s2 + $0x6c] ss:$16 sps:$4 sm:$0xff]  }
 0x578   :  { %2491 = vmatprep.subr.bf16.mxu0 %v5879_v54  ;;  %2534 = vmatprep.subr.bf16.mxu1 %v5885_v57  ;;  %4057 = vtanh.f32 %v5862_v40  ;;  %v4052_v11 = vpop.eup %4051  ;;  %6926 = vst [vmem:[#allocation22_spill] sm:$0xff] %v6086_v48 }
 0x57b   :  { %2492 = vmatpush1.bf16.msra.mxu0 %v5892_v6  ;;  %2535 = vmatpush1.bf16.msra.mxu1 %v5898_v36 }
 0x57c   :  { %2493 = vmatprep.subr.bf16.mxu0 %v5904_v2  ;;  %2536 = vmatprep.subr.bf16.mxu1 %v5910_v23 }
 0x57f   :  { %v4054_v31 = vpop.eup %4053  ;;  %2494 = vmatpush1.bf16.msra.mxu0 %v5916_v27  ;;  %2537 = vmatpush1.bf16.msra.mxu1 %v5922_v52 }
 0x580   :  { %v2304_v18 = vmul.f32 %v4054_v31, %v4052_v11  ;;  %2495 = vmatprep.subr.bf16.mxu0 %v5928_v47  ;;  %2538 = vmatprep.subr.bf16.mxu1 %v5934_v50  ;;  %v4056_v49 = vpop.eup %4055  ;;  %v6092_v11 = vld [vmem:[%s6527_s2 + $0x60] ss:$16 sps:$4 sm:$0xff]   ;;  %v6098_v31 = vld [vmem:[%s6527_s2 + $0x68] ss:$16 sps:$4 sm:$0xff]  }
 0x581   :  { %6927 = vst [vmem:[#allocation19_spill] sm:$0xff] %v6092_v11  ;;  %6928 = vst [vmem:[#allocation25_spill] sm:$0xff] %v6098_v31 }
 0x582   :  { %3593 = vst [vmem:[%s6530_s5 + $0x30] sm:$0xff] %v2304_v18  ;;  %v4058_v3 = vpop.eup %4057 }
 0x583   :  { %2496 = vmatpush1.bf16.msra.mxu0 %v5943_v46  ;;  %2539 = vmatpush1.bf16.msra.mxu1 %v5949_v51  ;;  %v2305_v53 = vmul.f32 %v4058_v3, %v4056_v49  ;;  %v6110_v49 = vld [vmem:[%s6527_s2 + $0x8c] ss:$16 sps:$4 sm:$0xff]   ;;  %v6116_v3 = vld [vmem:[%s6527_s2 + $0x80] ss:$16 sps:$4 sm:$0xff]  }
 0x584   :  { %2497 = vmatprep.subr.bf16.mxu0 %v5955_v4  ;;  %2540 = vmatprep.subr.bf16.mxu1 %v5961_v56  ;;  %6930 = vst [vmem:[#allocation26_spill] sm:$0xff] %v6110_v49  ;;  %6931 = vst [vmem:[#allocation23_spill] sm:$0xff] %v6116_v3 }
 0x585   :  { %3594 = vst [vmem:[%s6530_s5 + $0x38] sm:$0xff] %v2305_v53  ;;  %v2484_v60 = vpack.c.bf16 %v2305_v53, %v2304_v18  ;;  %v6104_v18 = vld [vmem:[%s6527_s2 + $0x84] ss:$16 sps:$4 sm:$0xff]   ;;  %v6122_v53 = vld [vmem:[%s6527_s2 + $0x88] ss:$16 sps:$4 sm:$0xff]  }
 0x586   :  { %6929 = vst [vmem:[#allocation20_spill] sm:$0xff] %v6104_v18  ;;  %6932 = vst [vmem:[#allocation29_spill] sm:$0xff] %v6122_v53 }
 0x587   :  { %2498 = vmatpush1.bf16.msra.mxu0 %v5970_v61  ;;  %2541 = vmatpush1.bf16.msra.mxu1 %v5976_v42 }
 0x588   :  { %2499 = vmatprep.subr.bf16.mxu0 %v5982_v63  ;;  %2542 = vmatprep.subr.bf16.mxu1 %v5988_v32 }
 0x58b   :  { %2500 = vmatpush1.bf16.msra.mxu0 %v5994_v35  ;;  %2543 = vmatpush1.bf16.msra.mxu1 %v6000_v20 }
 0x58c   :  { %2659 = vmatprep.subr.bf16.mxu0 %v6006_v26  ;;  %2702 = vmatprep.subr.bf16.mxu1 %v6012_v5 }
 0x58e   :  { %2518 = vmatmul.mubr.bf16.vlgmr.msra.gmra.mrb[44].mxu0 %v2484_v60  ;;  %2561 = vmatmul.mubr.bf16.vlgmr.msra.gmra.mrb[44].mxu1 %v2484_v60  ;;  %v6128_v60 = vld [vmem:[%s6527_s2 + $0xa4] ss:$16 sps:$4 sm:$0xff]  }
 0x58f   :  { %2660 = vmatpush1.bf16.msra.mxu0 %v6018_v25  ;;  %2703 = vmatpush1.bf16.msra.mxu1 %v6024_v22  ;;  %6933 = vst [vmem:[#allocation24_spill] sm:$0xff] %v6128_v60 }
 0x590   :  { %2661 = vmatprep.subr.bf16.mxu0 %v6030_v59  ;;  %2704 = vmatprep.subr.bf16.mxu1 %v6036_v12 }
 0x591   :  { %2691 = vmatprep.mubr.bf16.mxu0 %v6741_v58  ;;  %2734 = vmatprep.mubr.bf16.mxu1 %v6741_v58 }
 0x593   :  { %2662 = vmatpush1.bf16.msra.mxu0 %v6044_v30  ;;  %2705 = vmatpush1.bf16.msra.mxu1 %v6050_v13 }
 0x594   :  { %2663 = vmatprep.subr.bf16.mxu0 %v6056_v41  ;;  %2706 = vmatprep.subr.bf16.mxu1 %v6062_v7 }
 0x597   :  { %2664 = vmatpush1.bf16.msra.mxu0 %v6068_v17  ;;  %2707 = vmatpush1.bf16.msra.mxu1 %v6074_v0 }
 0x598   :  { %2665 = vmatprep.subr.bf16.mxu0 %v6080_v34  ;;  %2708 = vmatprep.subr.bf16.mxu1 %v6086_v48 }
 0x59b   :  { %2666 = vmatpush1.bf16.msra.mxu0 %v6092_v11  ;;  %2709 = vmatpush1.bf16.msra.mxu1 %v6098_v31 }
 0x59c   :  { %2667 = vmatprep.subr.bf16.mxu0 %v6104_v18  ;;  %2710 = vmatprep.subr.bf16.mxu1 %v6110_v49  ;;  %v6134_v49 = vld [vmem:[%s6527_s2 + $0xac] ss:$16 sps:$4 sm:$0xff]  }
 0x59d   :  { %6934 = vst [vmem:[#allocation30_spill] sm:$0xff] %v6134_v49 }
 0x59f   :  { %2668 = vmatpush1.bf16.msra.mxu0 %v6116_v3  ;;  %2711 = vmatpush1.bf16.msra.mxu1 %v6122_v53  ;;  %v6140_v3 = vld [vmem:[%s6527_s2 + $0xa0] ss:$16 sps:$4 sm:$0xff]   ;;  %v6146_v53 = vld [vmem:[%s6527_s2 + $0xa8] ss:$16 sps:$4 sm:$0xff]  }
 0x5a0   :  { %2669 = vmatprep.subr.bf16.mxu0 %v6128_v60  ;;  %2712 = vmatprep.subr.bf16.mxu1 %v6134_v49  ;;  %6935 = vst [vmem:[#allocation27_spill] sm:$0xff] %v6140_v3  ;;  %6936 = vst [vmem:[#allocation31_spill] sm:$0xff] %v6146_v53  ;;  %v6152_v60 = vld [vmem:[%s6527_s2 + $0xc4] ss:$16 sps:$4 sm:$0xff]   ;;  %v6158_v49 = vld [vmem:[%s6527_s2 + $0xcc] ss:$16 sps:$4 sm:$0xff]  }
 0x5a1   :  { %6937 = vst [vmem:[#allocation28_spill] sm:$0xff] %v6152_v60  ;;  %6938 = vst [vmem:[#allocation32_spill] sm:$0xff] %v6158_v49 }
 0x5a3   :  { %2670 = vmatpush1.bf16.msra.mxu0 %v6140_v3  ;;  %2713 = vmatpush1.bf16.msra.mxu1 %v6146_v53  ;;  %v6164_v3 = vld [vmem:[%s6527_s2 + $0xc0] ss:$16 sps:$4 sm:$0xff]   ;;  %v6170_v53 = vld [vmem:[%s6527_s2 + $0xc8] ss:$16 sps:$4 sm:$0xff]  }
 0x5a4   :  { %2671 = vmatprep.subr.bf16.mxu0 %v6152_v60  ;;  %2714 = vmatprep.subr.bf16.mxu1 %v6158_v49  ;;  %6939 = vst [vmem:[#allocation39_spill] sm:$0xff] %v6164_v3  ;;  %6940 = vst [vmem:[#allocation40_spill] sm:$0xff] %v6170_v53  ;;  %v6176_v60 = vld [vmem:[%s6527_s2 + $0xe4] ss:$16 sps:$4 sm:$0xff]   ;;  %v6182_v49 = vld [vmem:[%s6527_s2 + $0xec] ss:$16 sps:$4 sm:$0xff]  }
 0x5a5   :  { %6941 = vst [vmem:[#allocation41_spill] sm:$0xff] %v6176_v60  ;;  %6942 = vst [vmem:[#allocation42_spill] sm:$0xff] %v6182_v49 }
 0x5a7   :  { %2672 = vmatpush1.bf16.msra.mxu0 %v6164_v3  ;;  %2715 = vmatpush1.bf16.msra.mxu1 %v6170_v53  ;;  %v6188_v3 = vld [vmem:[%s6527_s2 + $0xe0] ss:$16 sps:$4 sm:$0xff]   ;;  %v6194_v53 = vld [vmem:[%s6527_s2 + $0xe8] ss:$16 sps:$4 sm:$0xff]  }
 0x5a8   :  { %2673 = vmatprep.subr.bf16.mxu0 %v6176_v60  ;;  %2716 = vmatprep.subr.bf16.mxu1 %v6182_v49  ;;  %6943 = vst [vmem:[#allocation43_spill] sm:$0xff] %v6188_v3  ;;  %6944 = vst [vmem:[#allocation44_spill] sm:$0xff] %v6194_v53  ;;  %v6200_v60 = vld [vmem:[%s6527_s2 + $0x104] ss:$16 sps:$4 sm:$0xff]   ;;  %v6206_v49 = vld [vmem:[%s6527_s2 + $0x10c] ss:$16 sps:$4 sm:$0xff]  }
 0x5a9   :  { %6945 = vst [vmem:[#allocation45_spill] sm:$0xff] %v6200_v60  ;;  %6946 = vst [vmem:[#allocation46_spill] sm:$0xff] %v6206_v49 }
 0x5ab   :  { %2674 = vmatpush1.bf16.msra.mxu0 %v6188_v3  ;;  %2717 = vmatpush1.bf16.msra.mxu1 %v6194_v53  ;;  %v67_v3 = vld [vmem:[%s6525_s0 + $0x140] sm:$0xff] }
 0x5ac   :  { %2819 = vmatprep.subr.bf16.mxu0 %v6200_v60  ;;  %2862 = vmatprep.subr.bf16.mxu1 %v6206_v49  ;;  %v71_v53 = vld [vmem:[%s6525_s0 + $0x160] sm:$0xff]  ;;  %v2416_v18 = vunpack.c.l.bf16 %v67_v3  ;;  %v2417_v48 = vunpack.c.h.bf16 %v67_v3 }
 0x5ad   :  { %v2420_v17 = vunpack.c.l.bf16 %v71_v53  ;;  %v2421_v13 = vunpack.c.h.bf16 %v71_v53 }
 0x641   :  { %v2359_v31 = vpop.f32.mrb[40].mxu0  ;;  %v2402_v11 = vpop.f32.mrb[40].mxu1 }
 0x642   :  { %v2360_v60 = vadd.f32 %v2359_v31, %v6906_v55  ;;  %v2361_v34 = vpop.f32.mrb[41].mxu0  ;;  %v2404_v0 = vpop.f32.mrb[41].mxu1 }
 0x643   :  { %v2362_v7 = vadd.f32 %v2361_v34, %v6907_v1  ;;  %v2363_v49 = vpop.f32.mrb[42].mxu0  ;;  %v2406_v41 = vpop.f32.mrb[42].mxu1  ;;  %v69_v34 = vld [vmem:[%s6525_s0 + $0x148] sm:$0xff] }
 0x644   :  { %v2424_v30 = vadd.f32 %v2416_v18, %v2360_v60  ;;  %v2364_v12 = vadd.f32 %v2363_v49, %v6906_v55  ;;  %v2365_v59 = vpop.f32.mrb[43].mxu0  ;;  %v2408_v22 = vpop.f32.mrb[43].mxu1  ;;  %v2403_v18 = vadd.f32 %v2402_v11, %v6908_v21  ;;  %v2418_v49 = vunpack.c.l.bf16 %v69_v34 }
 0x645   :  { %v2425_v25 = vadd.f32 %v2417_v48, %v2362_v7  ;;  %v2366_v5 = vadd.f32 %v2365_v59, %v6907_v1  ;;  %v73_v59 = vld [vmem:[%s6525_s0 + $0x168] sm:$0xff] }
 0x646   :  { %v3595_v26 = vmul.f32 -1.442695, %v2424_v30  ;;  %v2428_v3 = vadd.f32 %v2420_v17, %v2364_v12  ;;  %v2422_v12 = vunpack.c.l.bf16 %v73_v59  ;;  %v2426_v30 = vadd.f32 %v2418_v49, %v2403_v18 }
 0x647   :  { %v3597_v20 = vmul.f32 -1.442695, %v2425_v25  ;;  %v2429_v31 = vadd.f32 %v2421_v13, %v2366_v5  ;;  %v2405_v25 = vadd.f32 %v2404_v0, %v6909_v16  ;;  %v2419_v5 = vunpack.c.h.bf16 %v69_v34 }
 0x648   :  { %4059 = vpow2.f32 %v3595_v26  ;;  %v3596_v35 = vmul.f32 -1.442695, %v2428_v3  ;;  %v2407_v26 = vadd.f32 %v2406_v41, %v6908_v21  ;;  %v2409_v13 = vadd.f32 %v2408_v22, %v6909_v16  ;;  %v3396_v22 = vld [vmem:[%s6526_s1 + $0x90] sm:$0xff] }
 0x649   :  { %4061 = vpow2.f32 %v3597_v20  ;;  %v3598_v53 = vmul.f32 -1.442695, %v2429_v31  ;;  %v2423_v20 = vunpack.c.h.bf16 %v73_v59  ;;  %v2427_v48 = vadd.f32 %v2419_v5, %v2405_v25  ;;  %v3398_v25 = vld [vmem:[%s6526_s1 + $0xb0] sm:$0xff] }
 0x64a   :  { %4063 = vpow2.f32 %v3596_v35  ;;  %v2430_v11 = vadd.f32 %v2422_v12, %v2407_v26  ;;  %v2576_v12 = vunpack.c.l.bf16 %v3396_v22 }
 0x64b   :  { %4065 = vpow2.f32 %v3598_v53  ;;  %v2431_v31 = vadd.f32 %v2423_v20, %v2409_v13  ;;  %v3599_v53 = vmul.f32 -1.442695, %v2427_v48 }
 0x64c   :  { %4067 = vtanh.f32 %v2426_v30 }
 0x64d   :  { %v3600_v18 = vmul.f32 -1.442695, %v2431_v31 }
 0x652   :  { %v4060_v7 = vpop.eup %4059 }
 0x653   :  { %v4062_v35 = vpop.eup %4061  ;;  %v2438_v17 = vadd.f32 1.0, %v4060_v7 }
 0x654   :  { %v2450_v60 = vadd.f32 1.0, %v4062_v35  ;;  %v4064_v3 = vpop.eup %4063  ;;  %v2577_v35 = vunpack.c.h.bf16 %v3396_v22 }
 0x655   :  { %4069 = vrcp.f32 %v2438_v17  ;;  %v2439_v0 = vadd.f32 1.0, %v4064_v3  ;;  %v4066_v34 = vpop.eup %4065  ;;  %v2580_v3 = vunpack.c.l.bf16 %v3398_v25 }
 0x656   :  { %4071 = vrcp.f32 %v2450_v60  ;;  %v2451_v41 = vadd.f32 1.0, %v4066_v34  ;;  %v4068_v49 = vpop.eup %4067  ;;  %v3397_v34 = vld [vmem:[%s6526_s1 + $0x98] sm:$0xff] }
 0x657   :  { %4073 = vtanh.f32 %v2430_v11  ;;  %v2579_v21 = vunpack.c.h.bf16 %v3397_v34 }
 0x658   :  { %4075 = vrcp.f32 %v2439_v0 }
 0x659   :  { %4077 = vrcp.f32 %v2451_v41 }
 0x65a   :  { %4079 = vpow2.f32 %v3599_v53 }
 0x65b   :  { %4081 = vpow2.f32 %v3600_v18  ;;  %v2581_v18 = vunpack.c.h.bf16 %v3398_v25 }
 0x65f   :  { %v4070_v59 = vpop.eup %4069 }
 0x660   :  { %v4072_v5 = vpop.eup %4071  ;;  %v2472_v26 = vmul.f32 %v4070_v59, %v4068_v49 }
 0x661   :  { %v4074_v30 = vpop.eup %4073  ;;  %v2470_v13 = vmul.f32 %v4072_v5, %v5781_v9  ;;  %v2519_v20 = vpop.f32.mrb[44].mxu0 }
 0x662   :  { %v2562_v7 = vpop.f32.mrb[44].mxu1  ;;  %v4076_v17 = vpop.eup %4075  ;;  %v2520_v48 = vadd.f32 %v2519_v20, %v6788_v33 }
 0x663   :  { %v2521_v11 = vpop.f32.mrb[45].mxu0  ;;  %v2564_v60 = vpop.f32.mrb[45].mxu1  ;;  %v6237_v31 = vadd.f32 %v2472_v26, %v2470_v13  ;;  %v2473_v0 = vmul.f32 %v4076_v17, %v4074_v30 }
 0x664   :  { %v2522_v53 = vadd.f32 %v2521_v11, %v6789_v39  ;;  %v2523_v41 = vpop.f32.mrb[46].mxu0  ;;  %v2566_v9 = vpop.f32.mrb[46].mxu1  ;;  %v2584_v22 = vadd.f32 %v2576_v12, %v2520_v48  ;;  %v2565_v25 = vadd.f32 %v2564_v60, %v4925_v24 }
 0x665   :  { %v4078_v49 = vpop.eup %4077  ;;  %v2524_v59 = vadd.f32 %v2523_v41, %v6788_v33  ;;  %v2525_v5 = vpop.f32.mrb[47].mxu0 }
 0x666   :  { %v2568_v20 = vpop.f32.mrb[47].mxu1  ;;  %v4080_v16 = vpop.eup %4079  ;;  %v2471_v26 = vmul.f32 %v4078_v49, %v5790_v45  ;;  %v2585_v13 = vadd.f32 %v2577_v35, %v2522_v53  ;;  %v2526_v30 = vadd.f32 %v2525_v5, %v6789_v39  ;;  %v3601_v17 = vmul.f32 -1.442695, %v2584_v22  ;;  %v3399_v45 = vld [vmem:[%s6526_s1 + $0xb8] sm:$0xff] }
 0x667   :  { %v2588_v1 = vadd.f32 %v2580_v3, %v2524_v59  ;;  %v4082_v55 = vpop.eup %4081  ;;  %v2464_v48 = vadd.f32 1.0, %v4080_v16  ;;  %v2563_v49 = vadd.f32 %v2562_v7, %v4921_v15  ;;  %v2578_v3 = vunpack.c.l.bf16 %v3397_v34 }
 0x668   :  { %v6246_v11 = vadd.f32 %v2473_v0, %v2471_v26  ;;  %v3603_v32 = vmul.f32 -1.442695, %v2585_v13  ;;  %v2589_v12 = vadd.f32 %v2581_v18, %v2526_v30  ;;  %4083 = vpow2.f32 %v3601_v17 }
 0x669   :  { %v3602_v41 = vmul.f32 -1.442695, %v2588_v1  ;;  %v2465_v53 = vadd.f32 1.0, %v4082_v55  ;;  %v2587_v22 = vadd.f32 %v2579_v21, %v2565_v25  ;;  %v2569_v0 = vadd.f32 %v2568_v20, %v4925_v24 }
 0x66a   :  { %4085 = vpow2.f32 %v3603_v32  ;;  %v3604_v35 = vmul.f32 -1.442695, %v2589_v12  ;;  %v2583_v59 = vunpack.c.h.bf16 %v3399_v45  ;;  %v2567_v16 = vadd.f32 %v2566_v9, %v4921_v15 }
 0x66b   :  { %4087 = vpow2.f32 %v3602_v41  ;;  %v2582_v60 = vunpack.c.l.bf16 %v3399_v45  ;;  %v2586_v1 = vadd.f32 %v2578_v3, %v2563_v49  ;;  %v3605_v18 = vmul.f32 -1.442695, %v2587_v22 }
 0x66c   :  { %4089 = vrcp.f32 %v2464_v48  ;;  %v2591_v5 = vadd.f32 %v2583_v59, %v2569_v0 }
 0x66d   :  { %4091 = vpow2.f32 %v3604_v35  ;;  %v2590_v55 = vadd.f32 %v2582_v60, %v2567_v16 }
 0x66e   :  { %4093 = vrcp.f32 %v2465_v53  ;;  %v3606_v34 = vmul.f32 -1.442695, %v2591_v5 }
 0x66f   :  { %4095 = vtanh.f32 %v6237_v31 }
 0x670   :  { %4097 = vtanh.f32 %v6246_v11 }
 0x671   :  { %4099 = vtanh.f32 %v2586_v1 }
 0x672   :  { %v4084_v32 = vpop.eup %4083  ;;  %4101 = vpow2.f32 %v3605_v18 }
 0x673   :  { %v2598_v7 = vadd.f32 1.0, %v4084_v32  ;;  %4103 = vtanh.f32 %v2590_v55 }
 0x674   :  { %v4086_v21 = vpop.eup %4085 }
 0x675   :  { %v2610_v20 = vadd.f32 1.0, %v4086_v21  ;;  %v4088_v9 = vpop.eup %4087  ;;  %4105 = vrcp.f32 %v2598_v7 }
 0x676   :  { %v4090_v26 = vpop.eup %4089  ;;  %v2599_v13 = vadd.f32 1.0, %v4088_v9 }
 0x677   :  { %4107 = vrcp.f32 %v2610_v20  ;;  %v4092_v30 = vpop.eup %4091 }
 0x678   :  { %4109 = vpow2.f32 %v3606_v34  ;;  %v4094_v17 = vpop.eup %4093  ;;  %v2611_v25 = vadd.f32 1.0, %v4092_v30 }
 0x679   :  { %4111 = vrcp.f32 %v2599_v13  ;;  %v4096_v12 = vpop.eup %4095 }
 0x67a   :  { %v4098_v48 = vpop.eup %4097  ;;  %4113 = vrcp.f32 %v2611_v25  ;;  %v2478_v41 = vmul.f32 %v4096_v12, %v4090_v26  ;;  %v6948_v25 = vld [vmem:[#allocation34_spill] sm:$0xff]  ;;  %v6949_v12 = vld [vmem:[#allocation9_spill] sm:$0xff] }
 0x67b   :  { %v2479_v45 = vmul.f32 %v4098_v48, %v4094_v17  ;;  %v4100_v35 = vpop.eup %4099  ;;  %v6947_v17 = vld [vmem:[#allocation33_spill] sm:$0xff]  ;;  %v6950_v48 = vld [vmem:[#allocation6_spill] sm:$0xff] }
 0x67c   :  { %3607 = vst [vmem:[%s6529_s4 + $0x50] sm:$0xff] %v2478_v41  ;;  %v4102_v53 = vpop.eup %4101 }
 0x67d   :  { %3608 = vst [vmem:[%s6529_s4 + $0x58] sm:$0xff] %v2479_v45  ;;  %v2658_v49 = vpack.c.bf16 %v2479_v45, %v2478_v41  ;;  %v4104_v3 = vpop.eup %4103  ;;  %v2624_v16 = vadd.f32 1.0, %v4102_v53  ;;  %v6951_v41 = vld [vmem:[#allocation12_spill] sm:$0xff]  ;;  %v6952_v45 = vld [vmem:[#allocation7_spill] sm:$0xff] }
 0x67e   :  { %v6954_v53 = vld [vmem:[#allocation8_spill] sm:$0xff] }
 0x67f   :  { %v4106_v22 = vpop.eup %4105  ;;  %2692 = vmatmul.mubr.bf16.vlgmr.msra.gmra.mrb[48].mxu0 %v2658_v49  ;;  %2735 = vmatmul.mubr.bf16.vlgmr.msra.gmra.mrb[48].mxu1 %v2658_v49  ;;  %4115 = vrcp.f32 %v2624_v16  ;;  %v6955_v49 = vld [vmem:[#allocation14_spill] sm:$0xff]  ;;  %v6960_v16 = vld [vmem:[#allocation15_spill] sm:$0xff] }
 0x680   :  { %v2632_v59 = vmul.f32 %v4106_v22, %v4100_v35  ;;  %2820 = vmatpush1.bf16.msra.mxu0 %v5810_v29  ;;  %2863 = vmatpush1.bf16.msra.mxu1 %v5816_v28  ;;  %v6953_v35 = vld [vmem:[#allocation13_spill] sm:$0xff] }
 0x681   :  { %v4108_v0 = vpop.eup %4107  ;;  %2821 = vmatprep.subr.bf16.mxu0 %v5823_v44  ;;  %2864 = vmatprep.subr.bf16.mxu1 %v5829_v43  ;;  %v6957_v22 = vld [vmem:[#allocation17_spill] sm:$0xff] }
 0x682   :  { %v4110_v60 = vpop.eup %4109  ;;  %v2630_v1 = vmul.f32 %v4108_v0, %v5834_v38  ;;  %2851 = vmatprep.mubr.bf16.mxu0 %v6741_v58  ;;  %2894 = vmatprep.mubr.bf16.mxu1 %v6741_v58  ;;  %v6958_v0 = vld [vmem:[#allocation11_spill] sm:$0xff] }
 0x683   :  { %v4112_v18 = vpop.eup %4111  ;;  %v2625_v21 = vadd.f32 1.0, %v4110_v60  ;;  %v6961_v60 = vld [vmem:[#allocation21_spill] sm:$0xff] }
 0x684   :  { %v6270_v5 = vadd.f32 %v2632_v59, %v2630_v1  ;;  %v2633_v55 = vmul.f32 %v4112_v18, %v4104_v3  ;;  %v4114_v32 = vpop.eup %4113  ;;  %2822 = vmatpush1.bf16.msra.mxu0 %v5839_v14  ;;  %2865 = vmatpush1.bf16.msra.mxu1 %v5845_v8  ;;  %v6956_v3 = vld [vmem:[#allocation10_spill] sm:$0xff]  ;;  %v6962_v1 = vld [vmem:[#allocation16_spill] sm:$0xff] }
 0x685   :  { %v2631_v38 = vmul.f32 %v4114_v32, %v5862_v40  ;;  %2823 = vmatprep.subr.bf16.mxu0 %v5852_v10  ;;  %2866 = vmatprep.subr.bf16.mxu1 %v5858_v62  ;;  %v6959_v59 = vld [vmem:[#allocation18_spill] sm:$0xff]  ;;  %v6965_v32 = vld [vmem:[#allocation25_spill] sm:$0xff] }
 0x686   :  { %4117 = vtanh.f32 %v6270_v5  ;;  %v6963_v18 = vld [vmem:[#allocation22_spill] sm:$0xff] }
 0x687   :  { %v6278_v7 = vadd.f32 %v2633_v55, %v2631_v38  ;;  %4119 = vrcp.f32 %v2625_v21  ;;  %v6964_v55 = vld [vmem:[#allocation19_spill] sm:$0xff]  ;;  %v6966_v21 = vld [vmem:[#allocation20_spill] sm:$0xff]  ;;  %v6967_v38 = vld [vmem:[#allocation26_spill] sm:$0xff] }
 0x688   :  { %2824 = vmatpush1.bf16.msra.mxu0 %v5867_v37  ;;  %2867 = vmatpush1.bf16.msra.mxu1 %v5873_v19 }
 0x689   :  { %2825 = vmatprep.subr.bf16.mxu0 %v5879_v54  ;;  %2868 = vmatprep.subr.bf16.mxu1 %v5885_v57  ;;  %4121 = vtanh.f32 %v6278_v7  ;;  %v4116_v40 = vpop.eup %4115 }
 0x68c   :  { %2826 = vmatpush1.bf16.msra.mxu0 %v5892_v6  ;;  %2869 = vmatpush1.bf16.msra.mxu1 %v5898_v36 }
 0x68d   :  { %2827 = vmatprep.subr.bf16.mxu0 %v5904_v2  ;;  %2870 = vmatprep.subr.bf16.mxu1 %v5910_v23 }
 0x690   :  { %v4118_v34 = vpop.eup %4117  ;;  %2828 = vmatpush1.bf16.msra.mxu0 %v5916_v27  ;;  %2871 = vmatpush1.bf16.msra.mxu1 %v5922_v52 }
 0x691   :  { %v2638_v20 = vmul.f32 %v4118_v34, %v4116_v40  ;;  %2829 = vmatprep.subr.bf16.mxu0 %v5928_v47  ;;  %2872 = vmatprep.subr.bf16.mxu1 %v5934_v50  ;;  %v4120_v9 = vpop.eup %4119  ;;  %v6968_v40 = vld [vmem:[#allocation23_spill] sm:$0xff]  ;;  %v6969_v34 = vld [vmem:[#allocation29_spill] sm:$0xff] }
 0x693   :  { %3609 = vst [vmem:[%s6530_s5 + $0x20] sm:$0xff] %v2638_v20  ;;  %v4122_v26 = vpop.eup %4121 }
 0x694   :  { %2830 = vmatpush1.bf16.msra.mxu0 %v5943_v46  ;;  %2873 = vmatpush1.bf16.msra.mxu1 %v5949_v51  ;;  %v2639_v13 = vmul.f32 %v4122_v26, %v4120_v9  ;;  %v6971_v9 = vld [vmem:[#allocation30_spill] sm:$0xff]  ;;  %v6972_v26 = vld [vmem:[#allocation27_spill] sm:$0xff] }
 0x695   :  { %2831 = vmatprep.subr.bf16.mxu0 %v5955_v4  ;;  %2874 = vmatprep.subr.bf16.mxu1 %v5961_v56 }
 0x696   :  { %3610 = vst [vmem:[%s6530_s5 + $0x28] sm:$0xff] %v2639_v13  ;;  %v2818_v30 = vpack.c.bf16 %v2639_v13, %v2638_v20  ;;  %v6970_v20 = vld [vmem:[#allocation24_spill] sm:$0xff]  ;;  %v6973_v13 = vld [vmem:[#allocation31_spill] sm:$0xff] }
 0x698   :  { %2832 = vmatpush1.bf16.msra.mxu0 %v5970_v61  ;;  %2875 = vmatpush1.bf16.msra.mxu1 %v5976_v42 }
 0x699   :  { %2833 = vmatprep.subr.bf16.mxu0 %v5982_v63  ;;  %2876 = vmatprep.subr.bf16.mxu1 %v6947_v17 }
 0x69c   :  { %2834 = vmatpush1.bf16.msra.mxu0 %v6948_v25  ;;  %2877 = vmatpush1.bf16.msra.mxu1 %v6949_v12 }
 0x69d   :  { %2993 = vmatprep.subr.bf16.mxu0 %v6950_v48  ;;  %3036 = vmatprep.subr.bf16.mxu1 %v6951_v41  ;;  %v6975_v48 = vld [vmem:[#allocation32_spill] sm:$0xff]  ;;  %v6976_v41 = vld [vmem:[#allocation39_spill] sm:$0xff] }
 0x69f   :  { %2852 = vmatmul.mubr.bf16.vlgmr.msra.gmra.mrb[52].mxu0 %v2818_v30  ;;  %2895 = vmatmul.mubr.bf16.vlgmr.msra.gmra.mrb[52].mxu1 %v2818_v30  ;;  %v6974_v30 = vld [vmem:[#allocation28_spill] sm:$0xff] }
 0x6a0   :  { %2994 = vmatpush1.bf16.msra.mxu0 %v6952_v45  ;;  %3037 = vmatpush1.bf16.msra.mxu1 %v6953_v35  ;;  %v6977_v45 = vld [vmem:[#allocation40_spill] sm:$0xff]  ;;  %v6978_v35 = vld [vmem:[#allocation41_spill] sm:$0xff] }
 0x6a1   :  { %2995 = vmatprep.subr.bf16.mxu0 %v6954_v53  ;;  %3038 = vmatprep.subr.bf16.mxu1 %v6955_v49  ;;  %v6979_v53 = vld [vmem:[#allocation42_spill] sm:$0xff]  ;;  %v6980_v49 = vld [vmem:[#allocation43_spill] sm:$0xff] }
 0x6a2   :  { %3025 = vmatprep.mubr.bf16.mxu0 %v6741_v58  ;;  %3068 = vmatprep.mubr.bf16.mxu1 %v6741_v58 }
 0x6a4   :  { %2996 = vmatpush1.bf16.msra.mxu0 %v6956_v3  ;;  %3039 = vmatpush1.bf16.msra.mxu1 %v6957_v22  ;;  %v6981_v3 = vld [vmem:[#allocation44_spill] sm:$0xff]  ;;  %v6982_v22 = vld [vmem:[#allocation45_spill] sm:$0xff] }
 0x6a5   :  { %2997 = vmatprep.subr.bf16.mxu0 %v6958_v0  ;;  %3040 = vmatprep.subr.bf16.mxu1 %v6959_v59  ;;  %v6983_v0 = vld [vmem:[#allocation46_spill] sm:$0xff] }
 0x6a6   :  { %v75_v59 = vld [vmem:[%s6525_s0 + $0x180] sm:$0xff] }
 0x6a8   :  { %2998 = vmatpush1.bf16.msra.mxu0 %v6960_v16  ;;  %3041 = vmatpush1.bf16.msra.mxu1 %v6961_v60  ;;  %v79_v16 = vld [vmem:[%s6525_s0 + $0x1a0] sm:$0xff]  ;;  %v2750_v60 = vunpack.c.l.bf16 %v75_v59 }
 0x6a9   :  { %2999 = vmatprep.subr.bf16.mxu0 %v6962_v1  ;;  %3042 = vmatprep.subr.bf16.mxu1 %v6963_v18 }
 0x6ac   :  { %3000 = vmatpush1.bf16.msra.mxu0 %v6964_v55  ;;  %3043 = vmatpush1.bf16.msra.mxu1 %v6965_v32  ;;  %v2751_v55 = vunpack.c.h.bf16 %v75_v59  ;;  %v6984_v32 = vld [vmem:[#allocation35_spill] sm:$0xff] }
 0x6ad   :  { %3001 = vmatprep.subr.bf16.mxu0 %v6966_v21  ;;  %3044 = vmatprep.subr.bf16.mxu1 %v6967_v38 }
 0x6b0   :  { %3002 = vmatpush1.bf16.msra.mxu0 %v6968_v40  ;;  %3045 = vmatpush1.bf16.msra.mxu1 %v6969_v34  ;;  %v2754_v34 = vunpack.c.l.bf16 %v79_v16 }
 0x6b1   :  { %3003 = vmatprep.subr.bf16.mxu0 %v6970_v20  ;;  %3046 = vmatprep.subr.bf16.mxu1 %v6971_v9  ;;  %v6985_v20 = vld [vmem:[#allocation36_spill] sm:$0xff] }
 0x6b4   :  { %3004 = vmatpush1.bf16.msra.mxu0 %v6972_v26  ;;  %3047 = vmatpush1.bf16.msra.mxu1 %v6973_v13 }
 0x6b5   :  { %3005 = vmatprep.subr.bf16.mxu0 %v6974_v30  ;;  %3048 = vmatprep.subr.bf16.mxu1 %v6975_v48  ;;  %v2755_v30 = vunpack.c.h.bf16 %v79_v16 }
 0x6b8   :  { %3006 = vmatpush1.bf16.msra.mxu0 %v6976_v41  ;;  %3049 = vmatpush1.bf16.msra.mxu1 %v6977_v45 }
 0x6b9   :  { %3007 = vmatprep.subr.bf16.mxu0 %v6978_v35  ;;  %3050 = vmatprep.subr.bf16.mxu1 %v6979_v53 }
 0x6bc   :  { %3008 = vmatpush1.bf16.msra.mxu0 %v6980_v49  ;;  %3051 = vmatpush1.bf16.msra.mxu1 %v6981_v3 }
 0x6bd   :  { %3153 = vmatprep.subr.bf16.mxu0 %v6982_v22  ;;  %3196 = vmatprep.subr.bf16.mxu1 %v6983_v0 }
 0x752   :  { %v2693_v1 = vpop.f32.mrb[48].mxu0  ;;  %v2736_v18 = vpop.f32.mrb[48].mxu1 }
 0x753   :  { %v2694_v21 = vadd.f32 %v2693_v1, %v6984_v32  ;;  %v2695_v38 = vpop.f32.mrb[49].mxu0  ;;  %v2738_v40 = vpop.f32.mrb[49].mxu1 }
 0x754   :  { %v2696_v9 = vadd.f32 %v2695_v38, %v6985_v20  ;;  %v2697_v26 = vpop.f32.mrb[50].mxu0  ;;  %v2740_v13 = vpop.f32.mrb[50].mxu1  ;;  %v77_v38 = vld [vmem:[%s6525_s0 + $0x188] sm:$0xff] }
 0x755   :  { %v2758_v48 = vadd.f32 %v2750_v60, %v2694_v21  ;;  %v2698_v41 = vadd.f32 %v2697_v26, %v6984_v32  ;;  %v2699_v45 = vpop.f32.mrb[51].mxu0  ;;  %v2742_v35 = vpop.f32.mrb[51].mxu1  ;;  %v6986_v60 = vld [vmem:[#allocation38_spill] sm:$0xff]  ;;  %v2752_v26 = vunpack.c.l.bf16 %v77_v38 }
 0x756   :  { %v2759_v53 = vadd.f32 %v2751_v55, %v2696_v9  ;;  %v2700_v49 = vadd.f32 %v2699_v45, %v6985_v20  ;;  %v2737_v21 = vadd.f32 %v2736_v18, %v6986_v60  ;;  %v81_v55 = vld [vmem:[%s6525_s0 + $0x1a8] sm:$0xff] }
 0x757   :  { %v3611_v3 = vmul.f32 -1.442695, %v2758_v48  ;;  %v2762_v22 = vadd.f32 %v2754_v34, %v2698_v41  ;;  %v6987_v34 = vld [vmem:[#allocation37_spill] sm:$0xff]  ;;  %v2741_v48 = vadd.f32 %v2740_v13, %v6986_v60  ;;  %v2756_v41 = vunpack.c.l.bf16 %v81_v55 }
 0x758   :  { %v3613_v0 = vmul.f32 -1.442695, %v2759_v53  ;;  %v2763_v59 = vadd.f32 %v2755_v30, %v2700_v49  ;;  %v2739_v9 = vadd.f32 %v2738_v40, %v6987_v34  ;;  %v2753_v30 = vunpack.c.h.bf16 %v77_v38 }
 0x759   :  { %4123 = vpow2.f32 %v3611_v3  ;;  %v3612_v1 = vmul.f32 -1.442695, %v2762_v22  ;;  %v2760_v45 = vadd.f32 %v2752_v26, %v2737_v21  ;;  %v2743_v53 = vadd.f32 %v2742_v35, %v6987_v34  ;;  %v3392_v35 = vld [vmem:[%s6526_s1 + $0x50] sm:$0xff] }
 0x75a   :  { %4125 = vpow2.f32 %v3613_v0  ;;  %v3614_v16 = vmul.f32 -1.442695, %v2763_v59  ;;  %v2757_v49 = vunpack.c.h.bf16 %v81_v55  ;;  %v2761_v18 = vadd.f32 %v2753_v30, %v2739_v9  ;;  %v3394_v9 = vld [vmem:[%s6526_s1 + $0x70] sm:$0xff] }
 0x75b   :  { %4127 = vpow2.f32 %v3612_v1  ;;  %v2764_v59 = vadd.f32 %v2756_v41, %v2741_v48  ;;  %v2910_v48 = vunpack.c.l.bf16 %v3392_v35 }
 0x75c   :  { %4129 = vpow2.f32 %v3614_v16  ;;  %v2765_v16 = vadd.f32 %v2757_v49, %v2743_v53  ;;  %v3615_v32 = vmul.f32 -1.442695, %v2761_v18 }
 0x75d   :  { %4131 = vtanh.f32 %v2760_v45 }
 0x75e   :  { %v3616_v21 = vmul.f32 -1.442695, %v2765_v16 }
 0x763   :  { %v4124_v3 = vpop.eup %4123 }
 0x764   :  { %v4126_v22 = vpop.eup %4125  ;;  %v2772_v0 = vadd.f32 1.0, %v4124_v3 }
 0x765   :  { %v2784_v1 = vadd.f32 1.0, %v4126_v22  ;;  %v4128_v20 = vpop.eup %4127 }
 0x766   :  { %4133 = vrcp.f32 %v2772_v0  ;;  %v2773_v40 = vadd.f32 1.0, %v4128_v20  ;;  %v4130_v38 = vpop.eup %4129 }
 0x767   :  { %4135 = vrcp.f32 %v2784_v1  ;;  %v2785_v13 = vadd.f32 1.0, %v4130_v38  ;;  %v4132_v26 = vpop.eup %4131 }
 0x768   :  { %4137 = vtanh.f32 %v2764_v59  ;;  %v2914_v59 = vunpack.c.l.bf16 %v3394_v9 }
 0x769   :  { %4139 = vrcp.f32 %v2773_v40  ;;  %v3393_v40 = vld [vmem:[%s6526_s1 + $0x58] sm:$0xff] }
 0x76a   :  { %4141 = vrcp.f32 %v2785_v13  ;;  %v2913_v34 = vunpack.c.h.bf16 %v3393_v40 }
 0x76b   :  { %4143 = vpow2.f32 %v3615_v32  ;;  %v2911_v32 = vunpack.c.h.bf16 %v3392_v35 }
 0x76c   :  { %4145 = vpow2.f32 %v3616_v21  ;;  %v2915_v21 = vunpack.c.h.bf16 %v3394_v9 }
 0x770   :  { %v4134_v55 = vpop.eup %4133 }
 0x771   :  { %v4136_v20 = vpop.eup %4135  ;;  %v2806_v30 = vmul.f32 %v4134_v55, %v4132_v26 }
 0x772   :  { %v4138_v41 = vpop.eup %4137  ;;  %v2804_v45 = vmul.f32 %v4136_v20, %v6237_v31  ;;  %v2853_v53 = vpop.f32.mrb[52].mxu0 }
 0x773   :  { %v2896_v49 = vpop.f32.mrb[52].mxu1  ;;  %v4140_v3 = vpop.eup %4139  ;;  %v2854_v22 = vadd.f32 %v2853_v53, %v6788_v33 }
 0x774   :  { %v2855_v0 = vpop.f32.mrb[53].mxu0  ;;  %v2898_v18 = vpop.f32.mrb[53].mxu1  ;;  %v6373_v1 = vadd.f32 %v2806_v30, %v2804_v45  ;;  %v2807_v16 = vmul.f32 %v4140_v3, %v4138_v41 }
 0x775   :  { %v2856_v38 = vadd.f32 %v2855_v0, %v6789_v39  ;;  %v2857_v13 = vpop.f32.mrb[54].mxu0  ;;  %v2900_v31 = vpop.f32.mrb[54].mxu1  ;;  %v2918_v35 = vadd.f32 %v2910_v48, %v2854_v22  ;;  %v2899_v9 = vadd.f32 %v2898_v18, %v4925_v24 }
 0x776   :  { %v4142_v26 = vpop.eup %4141  ;;  %v2858_v55 = vadd.f32 %v2857_v13, %v6788_v33  ;;  %v2859_v20 = vpop.f32.mrb[55].mxu0 }
 0x777   :  { %v2902_v53 = vpop.f32.mrb[55].mxu1  ;;  %v4144_v60 = vpop.eup %4143  ;;  %v2805_v30 = vmul.f32 %v4142_v26, %v6246_v11  ;;  %v2919_v45 = vadd.f32 %v2911_v32, %v2856_v38  ;;  %v2860_v41 = vadd.f32 %v2859_v20, %v6789_v39  ;;  %v3617_v3 = vmul.f32 -1.442695, %v2918_v35  ;;  %v3395_v11 = vld [vmem:[%s6526_s1 + $0x78] sm:$0xff] }
 0x778   :  { %v2922_v12 = vadd.f32 %v2914_v59, %v2858_v55  ;;  %v4146_v25 = vpop.eup %4145  ;;  %v2798_v22 = vadd.f32 1.0, %v4144_v60  ;;  %v2897_v26 = vadd.f32 %v2896_v49, %v4921_v15  ;;  %v2912_v59 = vunpack.c.l.bf16 %v3393_v40 }
 0x779   :  { %v6382_v0 = vadd.f32 %v2807_v16, %v2805_v30  ;;  %v3619_v17 = vmul.f32 -1.442695, %v2919_v45  ;;  %v2923_v48 = vadd.f32 %v2915_v21, %v2860_v41  ;;  %4147 = vpow2.f32 %v3617_v3 }
 0x77a   :  { %v3618_v13 = vmul.f32 -1.442695, %v2922_v12  ;;  %v2799_v38 = vadd.f32 1.0, %v4146_v25  ;;  %v2921_v35 = vadd.f32 %v2913_v34, %v2899_v9  ;;  %v2903_v16 = vadd.f32 %v2902_v53, %v4925_v24 }
 0x77b   :  { %4149 = vpow2.f32 %v3619_v17  ;;  %v3620_v32 = vmul.f32 -1.442695, %v2923_v48  ;;  %v2917_v55 = vunpack.c.h.bf16 %v3395_v11  ;;  %v2901_v60 = vadd.f32 %v2900_v31, %v4921_v15 }
 0x77c   :  { %4151 = vpow2.f32 %v3618_v13  ;;  %v2916_v18 = vunpack.c.l.bf16 %v3395_v11  ;;  %v2920_v12 = vadd.f32 %v2912_v59, %v2897_v26  ;;  %v3621_v21 = vmul.f32 -1.442695, %v2921_v35 }
 0x77d   :  { %4153 = vrcp.f32 %v2798_v22  ;;  %v2925_v20 = vadd.f32 %v2917_v55, %v2903_v16 }
 0x77e   :  { %4155 = vpow2.f32 %v3620_v32  ;;  %v2924_v17 = vadd.f32 %v2916_v18, %v2901_v60 }
 0x77f   :  { %4157 = vrcp.f32 %v2799_v38  ;;  %v3622_v40 = vmul.f32 -1.442695, %v2925_v20 }
 0x780   :  { %4159 = vtanh.f32 %v6373_v1 }
 0x781   :  { %4161 = vtanh.f32 %v6382_v0 }
 0x782   :  { %4163 = vtanh.f32 %v2920_v12 }
 0x783   :  { %v4148_v25 = vpop.eup %4147  ;;  %4165 = vpow2.f32 %v3621_v21 }
 0x784   :  { %v2932_v49 = vadd.f32 1.0, %v4148_v25  ;;  %4167 = vtanh.f32 %v2924_v17 }
 0x785   :  { %v4150_v34 = vpop.eup %4149 }
 0x786   :  { %v2944_v53 = vadd.f32 1.0, %v4150_v34  ;;  %v4152_v31 = vpop.eup %4151  ;;  %4169 = vrcp.f32 %v2932_v49  ;;  %v85_v34 = vld [vmem:[%s6525_s0 + $0x1c8] sm:$0xff] }
 0x787   :  { %v4154_v30 = vpop.eup %4153  ;;  %v2933_v45 = vadd.f32 1.0, %v4152_v31 }
 0x788   :  { %4171 = vrcp.f32 %v2944_v53  ;;  %v4156_v41 = vpop.eup %4155 }
 0x789   :  { %4173 = vpow2.f32 %v3622_v40  ;;  %v4158_v3 = vpop.eup %4157  ;;  %v2945_v9 = vadd.f32 1.0, %v4156_v41 }
 0x78a   :  { %4175 = vrcp.f32 %v2933_v45  ;;  %v4160_v48 = vpop.eup %4159 }
 0x78b   :  { %v4162_v22 = vpop.eup %4161  ;;  %4177 = vrcp.f32 %v2945_v9  ;;  %v2812_v13 = vmul.f32 %v4160_v48, %v4154_v30  ;;  %v89_v30 = vld [vmem:[%s6525_s0 + $0x1e8] sm:$0xff]  ;;  %v6993_v48 = vld [vmem:[#allocation37_spill] sm:$0xff] }
 0x78c   :  { %v2813_v11 = vmul.f32 %v4162_v22, %v4158_v3  ;;  %v4164_v32 = vpop.eup %4163 }
 0x78d   :  { %3623 = vst [vmem:[%s6529_s4 + $0x60] sm:$0xff] %v2812_v13  ;;  %v4166_v38 = vpop.eup %4165 }
 0x78e   :  { %3624 = vst [vmem:[%s6529_s4 + $0x68] sm:$0xff] %v2813_v11  ;;  %v2992_v26 = vpack.c.bf16 %v2813_v11, %v2812_v13  ;;  %v4168_v59 = vpop.eup %4167  ;;  %v2958_v60 = vadd.f32 1.0, %v4166_v38  ;;  %v3087_v13 = vunpack.c.h.bf16 %v85_v34 }
 0x790   :  { %v4170_v35 = vpop.eup %4169  ;;  %3026 = vmatmul.mubr.bf16.vlgmr.msra.gmra.mrb[56].mxu0 %v2992_v26  ;;  %3069 = vmatmul.mubr.bf16.vlgmr.msra.gmra.mrb[56].mxu1 %v2992_v26  ;;  %4179 = vrcp.f32 %v2958_v60  ;;  %v3091_v26 = vunpack.c.h.bf16 %v89_v30 }
 0x791   :  { %v2966_v55 = vmul.f32 %v4170_v35, %v4164_v32  ;;  %3154 = vmatpush1.bf16.msra.mxu0 %v5810_v29  ;;  %3197 = vmatpush1.bf16.msra.mxu1 %v5816_v28  ;;  %v6994_v35 = vld [vmem:[#allocation38_spill] sm:$0xff] }
 0x792   :  { %v4172_v16 = vpop.eup %4171  ;;  %3155 = vmatprep.subr.bf16.mxu0 %v5823_v44  ;;  %3198 = vmatprep.subr.bf16.mxu1 %v5829_v43 }
 0x793   :  { %v4174_v18 = vpop.eup %4173  ;;  %v2964_v12 = vmul.f32 %v4172_v16, %v6270_v5  ;;  %3185 = vmatprep.mubr.bf16.mxu0 %v6741_v58  ;;  %3228 = vmatprep.mubr.bf16.mxu1 %v6741_v58 }
 0x794   :  { %v4176_v21 = vpop.eup %4175  ;;  %v2959_v29 = vadd.f32 1.0, %v4174_v18 }
 0x795   :  { %v6406_v20 = vadd.f32 %v2966_v55, %v2964_v12  ;;  %v2967_v17 = vmul.f32 %v4176_v21, %v4168_v59  ;;  %v4178_v25 = vpop.eup %4177  ;;  %3156 = vmatpush1.bf16.msra.mxu0 %v5839_v14  ;;  %3199 = vmatpush1.bf16.msra.mxu1 %v5845_v8  ;;  %v3086_v55 = vunpack.c.l.bf16 %v85_v34 }
 0x796   :  { %v2965_v28 = vmul.f32 %v4178_v25, %v6278_v7  ;;  %3157 = vmatprep.subr.bf16.mxu0 %v5852_v10  ;;  %3200 = vmatprep.subr.bf16.mxu1 %v5858_v62  ;;  %v3090_v25 = vunpack.c.l.bf16 %v89_v30 }
 0x797   :  { %4181 = vtanh.f32 %v6406_v20 }
 0x798   :  { %v6414_v44 = vadd.f32 %v2967_v17, %v2965_v28  ;;  %4183 = vrcp.f32 %v2959_v29 }
 0x799   :  { %3158 = vmatpush1.bf16.msra.mxu0 %v5867_v37  ;;  %3201 = vmatpush1.bf16.msra.mxu1 %v5873_v19  ;;  %v6988_v19 = vld [vmem:[#allocation33_spill] sm:$0xff] }
 0x79a   :  { %3159 = vmatprep.subr.bf16.mxu0 %v5879_v54  ;;  %3202 = vmatprep.subr.bf16.mxu1 %v5885_v57  ;;  %4185 = vtanh.f32 %v6414_v44  ;;  %v4180_v58 = vpop.eup %4179  ;;  %v6989_v54 = vld [vmem:[#allocation34_spill] sm:$0xff]  ;;  %v6990_v57 = vld [vmem:[#allocation9_spill] sm:$0xff] }
 0x79d   :  { %3160 = vmatpush1.bf16.msra.mxu0 %v5892_v6  ;;  %3203 = vmatpush1.bf16.msra.mxu1 %v5898_v36  ;;  %v83_v6 = vld [vmem:[%s6525_s0 + $0x1c0] sm:$0xff] }
 0x79e   :  { %3161 = vmatprep.subr.bf16.mxu0 %v5904_v2  ;;  %3204 = vmatprep.subr.bf16.mxu1 %v5910_v23  ;;  %v87_v36 = vld [vmem:[%s6525_s0 + $0x1e0] sm:$0xff]  ;;  %v3084_v2 = vunpack.c.l.bf16 %v83_v6 }
 0x79f   :  { %v3089_v5 = vunpack.c.h.bf16 %v87_v36 }
 0x7a1   :  { %v4182_v43 = vpop.eup %4181  ;;  %3162 = vmatpush1.bf16.msra.mxu0 %v5916_v27  ;;  %3205 = vmatpush1.bf16.msra.mxu1 %v5922_v52  ;;  %v3085_v52 = vunpack.c.h.bf16 %v83_v6  ;;  %v3388_v6 = vld [vmem:[%s6526_s1 + $0x10] sm:$0xff] }
 0x7a2   :  { %v2972_v14 = vmul.f32 %v4182_v43, %v4180_v58  ;;  %3163 = vmatprep.subr.bf16.mxu0 %v5928_v47  ;;  %3206 = vmatprep.subr.bf16.mxu1 %v5934_v50  ;;  %v4184_v8 = vpop.eup %4183  ;;  %v6991_v47 = vld [vmem:[#allocation35_spill] sm:$0xff] }
 0x7a4   :  { %3625 = vst [vmem:[%s6530_s5 + $0x10] sm:$0xff] %v2972_v14  ;;  %v4186_v10 = vpop.eup %4185 }
 0x7a5   :  { %3164 = vmatpush1.bf16.msra.mxu0 %v5943_v46  ;;  %3207 = vmatpush1.bf16.msra.mxu1 %v5949_v51  ;;  %v2973_v62 = vmul.f32 %v4186_v10, %v4184_v8 }
 0x7a6   :  { %3165 = vmatprep.subr.bf16.mxu0 %v5955_v4  ;;  %3208 = vmatprep.subr.bf16.mxu1 %v5961_v56  ;;  %v3088_v4 = vunpack.c.l.bf16 %v87_v36  ;;  %v6992_v56 = vld [vmem:[#allocation36_spill] sm:$0xff] }
 0x7a7   :  { %3626 = vst [vmem:[%s6530_s5 + $0x18] sm:$0xff] %v2973_v62  ;;  %v3152_v37 = vpack.c.bf16 %v2973_v62, %v2972_v14 }
 0x7a9   :  { %3166 = vmatpush1.bf16.msra.mxu0 %v5970_v61  ;;  %3209 = vmatpush1.bf16.msra.mxu1 %v5976_v42 }
 0x7aa   :  { %3167 = vmatprep.subr.bf16.mxu0 %v5982_v63  ;;  %3210 = vmatprep.subr.bf16.mxu1 %v6988_v19 }
 0x7ad   :  { %3168 = vmatpush1.bf16.msra.mxu0 %v6989_v54  ;;  %3211 = vmatpush1.bf16.msra.mxu1 %v6990_v57 }
 0x7b0   :  { %3186 = vmatmul.mubr.bf16.vlgmr.msra.gmra.mrb[60].mxu0 %v3152_v37  ;;  %3229 = vmatmul.mubr.bf16.vlgmr.msra.gmra.mrb[60].mxu1 %v3152_v37 }
 0x863   :  { %v3027_v23 = vpop.f32.mrb[56].mxu0  ;;  %v3070_v27 = vpop.f32.mrb[56].mxu1 }
 0x864   :  { %v3028_v50 = vadd.f32 %v3027_v23, %v6991_v47  ;;  %v3029_v46 = vpop.f32.mrb[57].mxu0  ;;  %v3072_v51 = vpop.f32.mrb[57].mxu1  ;;  %v3071_v16 = vadd.f32 %v3070_v27, %v6994_v35  ;;  %v3390_v23 = vld [vmem:[%s6526_s1 + $0x30] sm:$0xff] }
 0x865   :  { %v3030_v61 = vadd.f32 %v3029_v46, %v6992_v56  ;;  %v3031_v42 = vpop.f32.mrb[58].mxu0  ;;  %v3074_v63 = vpop.f32.mrb[58].mxu1  ;;  %v3073_v22 = vadd.f32 %v3072_v51, %v6993_v48  ;;  %v3247_v34 = vunpack.c.l.bf16 %v3390_v23 }
 0x866   :  { %v3092_v7 = vadd.f32 %v3084_v2, %v3028_v50  ;;  %v3032_v49 = vadd.f32 %v3031_v42, %v6991_v47  ;;  %v3033_v40 = vpop.f32.mrb[59].mxu0  ;;  %v3076_v53 = vpop.f32.mrb[59].mxu1  ;;  %v3094_v12 = vadd.f32 %v3086_v55, %v3071_v16  ;;  %v3075_v17 = vadd.f32 %v3074_v63, %v6994_v35 }
 0x867   :  { %v3093_v31 = vadd.f32 %v3085_v52, %v3030_v61  ;;  %v3034_v45 = vadd.f32 %v3033_v40, %v6992_v56  ;;  %v3077_v38 = vadd.f32 %v3076_v53, %v6993_v48  ;;  %v3095_v60 = vadd.f32 %v3087_v13, %v3073_v22  ;;  %v3389_v13 = vld [vmem:[%s6526_s1 + $0x18] sm:$0xff] }
 0x868   :  { %v3627_v41 = vmul.f32 -1.442695, %v3092_v7  ;;  %v3096_v3 = vadd.f32 %v3088_v4, %v3032_v49  ;;  %v3098_v14 = vadd.f32 %v3090_v25, %v3075_v17  ;;  %v3243_v50 = vunpack.c.l.bf16 %v3388_v6 }
 0x869   :  { %v3629_v9 = vmul.f32 -1.442695, %v3093_v31  ;;  %v3097_v11 = vadd.f32 %v3089_v5, %v3034_v45  ;;  %v3099_v18 = vadd.f32 %v3091_v26, %v3077_v38  ;;  %v3631_v21 = vmul.f32 -1.442695, %v3095_v60 }
 0x86a   :  { %4187 = vpow2.f32 %v3627_v41  ;;  %v3628_v32 = vmul.f32 -1.442695, %v3096_v3  ;;  %v3244_v61 = vunpack.c.h.bf16 %v3388_v6  ;;  %v3246_v55 = vunpack.c.h.bf16 %v3389_v13 }
 0x86b   :  { %4189 = vpow2.f32 %v3629_v9  ;;  %v3630_v59 = vmul.f32 -1.442695, %v3097_v11  ;;  %v3632_v29 = vmul.f32 -1.442695, %v3099_v18 }
 0x86c   :  { %4191 = vpow2.f32 %v3628_v32  ;;  %v3248_v32 = vunpack.c.h.bf16 %v3390_v23 }
 0x86d   :  { %4193 = vpow2.f32 %v3630_v59 }
 0x86e   :  { %4195 = vtanh.f32 %v3094_v12 }
 0x86f   :  { %4197 = vpow2.f32 %v3631_v21  ;;  %v3245_v21 = vunpack.c.l.bf16 %v3389_v13 }
 0x870   :  { %4199 = vpow2.f32 %v3632_v29 }
 0x874   :  { %v4188_v28 = vpop.eup %4187 }
 0x875   :  { %v4190_v58 = vpop.eup %4189  ;;  %v3106_v43 = vadd.f32 1.0, %v4188_v28 }
 0x876   :  { %v3118_v8 = vadd.f32 1.0, %v4190_v58  ;;  %v4192_v10 = vpop.eup %4191 }
 0x877   :  { %4201 = vrcp.f32 %v3106_v43  ;;  %v3107_v62 = vadd.f32 1.0, %v4192_v10  ;;  %v4194_v37 = vpop.eup %4193 }
 0x878   :  { %4203 = vrcp.f32 %v3118_v8  ;;  %v3119_v19 = vadd.f32 1.0, %v4194_v37  ;;  %v4196_v54 = vpop.eup %4195 }
 0x879   :  { %4205 = vtanh.f32 %v3098_v14  ;;  %v4198_v57 = vpop.eup %4197 }
 0x87a   :  { %4207 = vrcp.f32 %v3107_v62  ;;  %v4200_v36 = vpop.eup %4199  ;;  %v3132_v47 = vadd.f32 1.0, %v4198_v57 }
 0x87b   :  { %4209 = vrcp.f32 %v3119_v19  ;;  %v3133_v53 = vadd.f32 1.0, %v4200_v36 }
 0x87c   :  { %4211 = vrcp.f32 %v3132_v47 }
 0x881   :  { %v4202_v2 = vpop.eup %4201 }
 0x882   :  { %v4204_v27 = vpop.eup %4203  ;;  %v3140_v52 = vmul.f32 %v4202_v2, %v4196_v54 }
 0x883   :  { %v4206_v46 = vpop.eup %4205  ;;  %v3138_v51 = vmul.f32 %v4204_v27, %v6373_v1  ;;  %v3187_v4 = vpop.f32.mrb[60].mxu0 }
 0x884   :  { %v3230_v56 = vpop.f32.mrb[60].mxu1  ;;  %v4208_v42 = vpop.eup %4207  ;;  %v3188_v63 = vadd.f32 %v3187_v4, %v6788_v33 }
 0x885   :  { %v3189_v5 = vpop.f32.mrb[61].mxu0  ;;  %v3232_v7 = vpop.f32.mrb[61].mxu1  ;;  %v3142_v49 = vadd.f32 %v3140_v52, %v3138_v51  ;;  %v3141_v40 = vmul.f32 %v4208_v42, %v4206_v46  ;;  %v3231_v12 = vadd.f32 %v3230_v56, %v4921_v15 }
 0x886   :  { %v3190_v31 = vadd.f32 %v3189_v5, %v6789_v39  ;;  %v3191_v30 = vpop.f32.mrb[62].mxu0  ;;  %v3234_v45 = vpop.f32.mrb[62].mxu1  ;;  %v3251_v3 = vadd.f32 %v3243_v50, %v3188_v63  ;;  %v3233_v16 = vadd.f32 %v3232_v7, %v4925_v24 }
 0x887   :  { %v4210_v41 = vpop.eup %4209  ;;  %v3192_v1 = vadd.f32 %v3191_v30, %v6788_v33  ;;  %v3193_v9 = vpop.f32.mrb[63].mxu0  ;;  %4213 = vtanh.f32 %v3142_v49  ;;  %3332 = vst [vmem:[%s6532_s7] sm:$0xff] %v3142_v49  ;;  %v3235_v58 = vadd.f32 %v3234_v45, %v4921_v15  ;;  %v3253_v8 = vadd.f32 %v3245_v21, %v3231_v12 }
 0x888   :  { %v3236_v48 = vpop.f32.mrb[63].mxu1  ;;  %v3139_v22 = vmul.f32 %v4210_v41, %v6382_v0  ;;  %v3252_v11 = vadd.f32 %v3244_v61, %v3190_v31  ;;  %v3633_v38 = vmul.f32 -1.442695, %v3251_v3  ;;  %4215 = vrcp.f32 %v3133_v53  ;;  %v3391_v0 = vld [vmem:[%s6526_s1 + $0x38] sm:$0xff]  ;;  %v4212_v28 = vpop.eup %4211 }
 0x889   :  { %v3255_v26 = vadd.f32 %v3247_v34, %v3192_v1  ;;  %v3194_v35 = vadd.f32 %v3193_v9, %v6789_v39  ;;  %v3254_v17 = vadd.f32 %v3246_v55, %v3233_v16  ;;  %v3237_v25 = vadd.f32 %v3236_v48, %v4925_v24 }
 0x88a   :  { %v3143_v59 = vadd.f32 %v3141_v40, %v3139_v22  ;;  %v3635_v33 = vmul.f32 -1.442695, %v3252_v11  ;;  %4217 = vpow2.f32 %v3633_v38  ;;  %v3250_v29 = vunpack.c.h.bf16 %v3391_v0 }
 0x88b   :  { %v3634_v60 = vmul.f32 -1.442695, %v3255_v26  ;;  %v3256_v18 = vadd.f32 %v3248_v32, %v3194_v35  ;;  %v3249_v43 = vunpack.c.l.bf16 %v3391_v0  ;;  %v3637_v62 = vmul.f32 -1.442695, %v3254_v17 }
 0x88c   :  { %4219 = vtanh.f32 %v3143_v59  ;;  %3333 = vst [vmem:[%s6532_s7 + $0x8] sm:$0xff] %v3143_v59  ;;  %v3258_v37 = vadd.f32 %v3250_v29, %v3237_v25 }
 0x88d   :  { %4221 = vpow2.f32 %v3635_v33  ;;  %v3636_v39 = vmul.f32 -1.442695, %v3256_v18  ;;  %v3257_v24 = vadd.f32 %v3249_v43, %v3235_v58 }
 0x88e   :  { %4223 = vpow2.f32 %v3634_v60  ;;  %v3638_v2 = vmul.f32 -1.442695, %v3258_v37 }
 0x88f   :  { %4225 = vpow2.f32 %v3636_v39 }
 0x890   :  { %4227 = vtanh.f32 %v3253_v8 }
 0x891   :  { %v4214_v14 = vpop.eup %4213  ;;  %4229 = vpow2.f32 %v3637_v62 }
 0x892   :  { %v3146_v10 = vmul.f32 %v4214_v14, %v4212_v28  ;;  %v4216_v19 = vpop.eup %4215 }
 0x894   :  { %v4218_v54 = vpop.eup %4217  ;;  %3639 = vst [vmem:[%s6529_s4 + $0x70] sm:$0xff] %v3146_v10  ;;  %3324 = vst [vmem:[%s6531_s6] sm:$0xff] %v3146_v10 }
 0x895   :  { %v3265_v15 = vadd.f32 1.0, %v4218_v54 }
 0x896   :  { %v4220_v57 = vpop.eup %4219 }
 0x897   :  { %v4222_v6 = vpop.eup %4221  ;;  %v3147_v36 = vmul.f32 %v4220_v57, %v4216_v19  ;;  %4231 = vrcp.f32 %v3265_v15 }
 0x898   :  { %v3277_v23 = vadd.f32 1.0, %v4222_v6  ;;  %v4224_v27 = vpop.eup %4223  ;;  %4233 = vtanh.f32 %v3257_v24 }
 0x899   :  { %3640 = vst [vmem:[%s6529_s4 + $0x78] sm:$0xff] %v3147_v36  ;;  %3325 = vst [vmem:[%s6531_s6 + $0x8] sm:$0xff] %v3147_v36  ;;  %v3266_v52 = vadd.f32 1.0, %v4224_v27  ;;  %v4226_v47 = vpop.eup %4225 }
 0x89a   :  { %4235 = vrcp.f32 %v3277_v23  ;;  %v3278_v50 = vadd.f32 1.0, %v4226_v47  ;;  %v4228_v46 = vpop.eup %4227 }
 0x89b   :  { %4237 = vpow2.f32 %v3638_v2  ;;  %v4230_v51 = vpop.eup %4229 }
 0x89c   :  { %4239 = vrcp.f32 %v3266_v52  ;;  %v3291_v63 = vadd.f32 1.0, %v4230_v51 }
 0x89d   :  { %4241 = vrcp.f32 %v3278_v50 }
 0x89e   :  { %4243 = vrcp.f32 %v3291_v63 }
 0x8a1   :  { %v4232_v4 = vpop.eup %4231 }
 0x8a2   :  { %v4234_v56 = vpop.eup %4233  ;;  %v3299_v61 = vmul.f32 %v4232_v4, %v4228_v46 }
 0x8a4   :  { %v4236_v42 = vpop.eup %4235 }
 0x8a5   :  { %v4238_v5 = vpop.eup %4237  ;;  %v3297_v7 = vmul.f32 %v4236_v42, %v6406_v20 }
 0x8a6   :  { %v4240_v34 = vpop.eup %4239  ;;  %v3292_v31 = vadd.f32 1.0, %v4238_v5 }
 0x8a7   :  { %v3301_v49 = vadd.f32 %v3299_v61, %v3297_v7  ;;  %v3300_v40 = vmul.f32 %v4240_v34, %v4234_v56  ;;  %v4242_v53 = vpop.eup %4241 }
 0x8a8   :  { %v3298_v30 = vmul.f32 %v4242_v53, %v6414_v44  ;;  %v4244_v20 = vpop.eup %4243 }
 0x8a9   :  { %4245 = vtanh.f32 %v3301_v49  ;;  %3334 = vst [vmem:[%s6532_s7 + $0x10] sm:$0xff] %v3301_v49 }
 0x8aa   :  { %v3302_v45 = vadd.f32 %v3300_v40, %v3298_v30  ;;  %4247 = vrcp.f32 %v3292_v31 }
 0x8ac   :  { %4249 = vtanh.f32 %v3302_v45  ;;  %3335 = vst [vmem:[%s6532_s7 + $0x18] sm:$0xff] %v3302_v45 }
 0x8b3   :  { %v4246_v41 = vpop.eup %4245 }
 0x8b4   :  { %v3305_v3 = vmul.f32 %v4246_v41, %v4244_v20  ;;  %v4248_v1 = vpop.eup %4247 }
 0x8b6   :  { %3318 = vst [vmem:[%s6530_s5] sm:$0xff] %v3305_v3  ;;  %3326 = vst [vmem:[%s6531_s6 + $0x10] sm:$0xff] %v3305_v3  ;;  %v4250_v44 = vpop.eup %4249 }
 0x8b7   :  { %v3306_v9 = vmul.f32 %v4250_v44, %v4248_v1 }
 0x8b9   :  { %3319 = vst [vmem:[%s6530_s5 + $0x8] sm:$0xff] %v3306_v9  ;;  %3327 = vst [vmem:[%s6531_s6 + $0x18] sm:$0xff] %v3306_v9 }

</bundles_post_ra>
